<compile_context>
chip_gen: v5e
topology: v5e:2x2
jax: 0.10.0
libtpu: 0.0.40
codegen_flags: <defaults>
</compile_context>

<pallas_src>
import jax
import jax.numpy as jnp
from jax.experimental import pallas as pl
from jax.experimental.pallas import tpu as pltpu


def lstm_aggregator_kernel(x_ref, w_ih_t_ref, w_hh_t_ref, w_lin_t_ref, b_lin_ref,
                           out_ref, xproj_ref, hist_ref):
    """x: (T, D) bf16 last-batch-row sequence, w_ih_t: (D, 4Hp) bf16,
    w_hh_t: (Hp, 4Hp) bf16, w_lin_t: (Hp, D) f32, b_lin: (1, D) f32,
    out: (T, D) f32, xproj scratch: (T, 4Hp) f32, hist scratch: (T, Hp) f32."""
    T = x_ref.shape[0]
    Hp = w_hh_t_ref.shape[0]

    # Hoisted, time-independent input projection (bf16 MXU operands, f32 acc),
    # staged through VMEM so only one (1, Hp) row is pulled back per gate/step.
    xproj_ref[...] = jnp.dot(x_ref[...], w_ih_t_ref[...],
                             preferred_element_type=jnp.float32)

    h = jnp.zeros((1, Hp), jnp.float32)
    c = jnp.zeros((1, Hp), jnp.float32)

    # T is small and static -> fully unrolled; only h/c (2 vregs) carry across steps.
    for t in range(T):
        h_b = h.astype(jnp.bfloat16)

        # Per-gate dots read an (Hp, Hp) bf16 slice of W_hh straight from VMEM,
        # bounding the RHS live range to ~8 vregs (no whole-weight value spills).
        def gate(g):
            pre = xproj_ref[t:t + 1, g * Hp:(g + 1) * Hp]
            return pre + jnp.dot(h_b, w_hh_t_ref[:, g * Hp:(g + 1) * Hp],
                                 preferred_element_type=jnp.float32)

        # PyTorch LSTM gate order: i, f, g, o (each a whole 128-lane block).
        i_g = jax.nn.sigmoid(gate(0))
        f_g = jax.nn.sigmoid(gate(1))
        g_g = jnp.tanh(gate(2))
        o_g = jax.nn.sigmoid(gate(3))
        c = f_g * c + i_g * g_g
        h = o_g * jnp.tanh(c)

        # Single-sublane store, off the recurrence's dependency chain.
        hist_ref[t:t + 1, :] = h

    # Final linear on the VMEM-resident history (f32 for output accuracy):
    # (T, Hp) @ (Hp, D) + (1, D), one lane-dense output store.
    out_ref[...] = (jnp.dot(hist_ref[...], w_lin_t_ref[...],
                            preferred_element_type=jnp.float32)
                    + b_lin_ref[...])


def _pad_gate_cols(w_t, H, Hp):
    """w_t: (rows, 4H), gate order i,f,g,o along columns -> (rows, 4Hp) with each
    gate block zero-padded from H to Hp columns (padded lanes stay exactly 0)."""
    blocks = [jnp.pad(w_t[:, g * H:(g + 1) * H], ((0, 0), (0, Hp - H)))
              for g in range(4)]
    return jnp.concatenate(blocks, axis=1)


def prepare_params(w_ih, w_hh, w_lin, b_lin):
    """One-time weight prep (module init): transpose, pad H -> Hp (multiple of
    128 lanes), cast the LSTM weights to bf16 for the MXU.  PyTorch layouts:
    w_ih (4H, D), w_hh (4H, H), w_lin (D, H), b_lin (D,)."""
    H = w_hh.shape[1]
    D = w_ih.shape[1]
    Hp = ((H + 127) // 128) * 128

    w_ih_t = _pad_gate_cols(jnp.asarray(w_ih, jnp.float32).T, H, Hp)     # (D, 4Hp)
    w_hh_t = _pad_gate_cols(jnp.asarray(w_hh, jnp.float32).T, H, Hp)     # (H, 4Hp)
    w_hh_t = jnp.pad(w_hh_t, ((0, Hp - H), (0, 0)))                      # (Hp, 4Hp)
    w_lin_t = jnp.pad(jnp.asarray(w_lin, jnp.float32).T,
                      ((0, Hp - H), (0, 0)))                             # (Hp, D)
    b_lin2d = jnp.asarray(b_lin, jnp.float32).reshape(1, D)              # (1, D)

    return (w_ih_t.astype(jnp.bfloat16),
            w_hh_t.astype(jnp.bfloat16),
            w_lin_t,
            b_lin2d)


@jax.jit
def lstm_aggregator(ft, w_ih_t, w_hh_t, w_lin_t, b_lin2d):
    """ft: (B, T, D) float32; remaining args from prepare_params()."""
    B, T, D = ft.shape
    Hp = w_hh_t.shape[0]

    # Only hidden[-1] (the last batch element's sequence) is consumed downstream,
    # and LSTM batch rows are independent -> run the recurrence on that row only.
    x = ft[-1].astype(jnp.bfloat16)                                      # (T, D)

    vmem = pl.BlockSpec(memory_space=pltpu.MemorySpace.VMEM)
    return pl.pallas_call(
        lstm_aggregator_kernel,
        out_shape=jax.ShapeDtypeStruct((T, D), jnp.float32),
        in_specs=[vmem] * 5,
        out_specs=vmem,
        scratch_shapes=[pltpu.VMEM((T, 4 * Hp), jnp.float32),   # xproj staging
                        pltpu.VMEM((T, Hp), jnp.float32)],      # hidden history
    )(x, w_ih_t, w_hh_t, w_lin_t, b_lin2d)


def lstm_aggregator_ref(ft, w_ih, w_hh, w_lin, b_lin):
    """Pure-JAX f32 reference with identical PyTorch LSTM semantics (full batch)."""
    B, T, D = ft.shape
    H = w_hh.shape[1]
    h = jnp.zeros((B, H), jnp.float32)
    c = jnp.zeros((B, H), jnp.float32)
    hs = []
    for t in range(T):
        x = ft[:, t, :]
        gates = x @ w_ih.T + h @ w_hh.T
        i, f, g, o = jnp.split(gates, 4, axis=1)
        i = jax.nn.sigmoid(i)
        f = jax.nn.sigmoid(f)
        g = jnp.tanh(g)
        o = jax.nn.sigmoid(o)
        c = f * c + i * g
        h = o * jnp.tanh(c)
        hs.append(h[-1])
    hseq = jnp.stack(hs)                 # (T, H) — hidden[-1] for batch_first LSTM
    return hseq @ w_lin.T + b_lin        # (T, D)
    # NOTE: PyTorch's squeeze(dim=0) only changes the shape when T == 1.


if __name__ == "__main__":
    # Small shapes consistent with the module: batch=2, seq=8, input_dim=32, pooling_dim=64.
    B, T, D, H = 2, 8, 32, 64

    key = jax.random.PRNGKey(0)
    k_ft, k_ih, k_hh, k_lw, k_lb = jax.random.split(key, 5)

    scale_lstm = 1.0 / jnp.sqrt(H)
    scale_lin = 1.0 / jnp.sqrt(H)

    ft = jax.random.normal(k_ft, (B, T, D), jnp.float32)
    w_ih = jax.random.uniform(k_ih, (4 * H, D), jnp.float32, -scale_lstm, scale_lstm)
    w_hh = jax.random.uniform(k_hh, (4 * H, H), jnp.float32, -scale_lstm, scale_lstm)
    w_lin = jax.random.uniform(k_lw, (D, H), jnp.float32, -scale_lin, scale_lin)
    b_lin = jax.random.uniform(k_lb, (D,), jnp.float32, -scale_lin, scale_lin)

    # One-time weight prep (module init), then the lean jitted per-call path.
    params = prepare_params(w_ih, w_hh, w_lin, b_lin)
    out = lstm_aggregator(ft, *params)
    out = jax.block_until_ready(out)

    ref = lstm_aggregator_ref(ft, w_ih, w_hh, w_lin, b_lin)
    assert out.shape == (T, D), out.shape
    # Tolerance reflects bf16 MXU operands in the recurrence (f32 accumulation,
    # f32 gate math / final linear); typical max abs error is ~1e-2.
    assert jnp.allclose(out, ref, atol=5e-2, rtol=5e-2), "mismatch vs reference"

    print("KERNEL_OK")
</pallas_src>

<mosaic_0001>
module attributes {stable_mosaic.version = 11 : i64} {
  func.func @lstm_aggregator_kernel(%arg0: memref<8x32xbf16, #tpu.memory_space<vmem>>, %arg1: memref<32x512xbf16, #tpu.memory_space<vmem>>, %arg2: memref<128x512xbf16, #tpu.memory_space<vmem>>, %arg3: memref<128x32xf32, #tpu.memory_space<vmem>>, %arg4: memref<1x32xf32, #tpu.memory_space<vmem>>, %arg5: memref<8x32xf32, #tpu.memory_space<vmem>>, %arg6: memref<8x512xf32, #tpu.memory_space<vmem>>, %arg7: memref<8x128xf32, #tpu.memory_space<vmem>>) attributes {dimension_semantics = [], scalar_prefetch = 0 : i64, scratch_operands = 2 : i64, tpu.core_type = #tpu.core_type<tc>} {
    %c0 = arith.constant 0 : index
    %c0_0 = arith.constant 0 : index
    %0 = vector.load %arg0[%c0, %c0_0] : memref<8x32xbf16, #tpu.memory_space<vmem>>, vector<8x32xbf16>
    %c0_1 = arith.constant 0 : index
    %c0_2 = arith.constant 0 : index
    %1 = vector.load %arg1[%c0_1, %c0_2] : memref<32x512xbf16, #tpu.memory_space<vmem>>, vector<32x512xbf16>
    %cst = arith.constant dense<0.000000e+00> : vector<8x512xf32>
    %2 = tpu.matmul %0, %1, %cst {dimension_numbers = #tpu.dot_dimension_numbers<[1], [0], [0], [1], [0, 0, 1, 1], [], []>} : vector<8x32xbf16>, vector<32x512xbf16>, vector<8x512xf32> -> vector<8x512xf32>
    %c0_3 = arith.constant 0 : index
    %c0_4 = arith.constant 0 : index
    %3 = vector.load %arg6[%c0_3, %c0_4] : memref<8x512xf32, #tpu.memory_space<vmem>>, vector<8x512xf32>
    tpu.vector_store %arg6[%c0_3, %c0_4], %2 {strides = array<i32>} : memref<8x512xf32, #tpu.memory_space<vmem>>, vector<8x512xf32>,
    %cst_5 = arith.constant 0.000000e+00 : f32
    %4 = vector.broadcast %cst_5 : f32 to vector<1x128xf32>
    %cst_6 = arith.constant 0.000000e+00 : f32
    %5 = vector.broadcast %cst_6 : f32 to vector<1x128xf32>
    %6 = arith.truncf %4 : vector<1x128xf32> to vector<1x128xbf16>
    %c0_7 = arith.constant 0 : index
    %c0_8 = arith.constant 0 : index
    %7 = vector.load %arg6[%c0_7, %c0_8] : memref<8x512xf32, #tpu.memory_space<vmem>>, vector<1x128xf32>
    %c0_9 = arith.constant 0 : index
    %c0_10 = arith.constant 0 : index
    %8 = vector.load %arg2[%c0_9, %c0_10] : memref<128x512xbf16, #tpu.memory_space<vmem>>, vector<128x128xbf16>
    %cst_11 = arith.constant dense<0.000000e+00> : vector<1x128xf32>
    %9 = tpu.matmul %6, %8, %cst_11 {dimension_numbers = #tpu.dot_dimension_numbers<[1], [0], [0], [1], [0, 0, 1, 1], [], []>} : vector<1x128xbf16>, vector<128x128xbf16>, vector<1x128xf32> -> vector<1x128xf32>
    %10 = arith.addf %7, %9 : vector<1x128xf32>
    %11 = arith.negf %10 : vector<1x128xf32>
    %12 = math.exp %11 : vector<1x128xf32>
    %cst_12 = arith.constant 1.000000e+00 : f32
    %13 = vector.broadcast %cst_12 : f32 to vector<1x128xf32>
    %14 = arith.addf %13, %12 : vector<1x128xf32>
    %15 = arith.divf %13, %14 : vector<1x128xf32>
    %c0_13 = arith.constant 0 : index
    %c128 = arith.constant 128 : index
    %16 = vector.load %arg6[%c0_13, %c128] : memref<8x512xf32, #tpu.memory_space<vmem>>, vector<1x128xf32>
    %c0_14 = arith.constant 0 : index
    %c128_15 = arith.constant 128 : index
    %17 = vector.load %arg2[%c0_14, %c128_15] : memref<128x512xbf16, #tpu.memory_space<vmem>>, vector<128x128xbf16>
    %cst_16 = arith.constant dense<0.000000e+00> : vector<1x128xf32>
    %18 = tpu.matmul %6, %17, %cst_16 {dimension_numbers = #tpu.dot_dimension_numbers<[1], [0], [0], [1], [0, 0, 1, 1], [], []>} : vector<1x128xbf16>, vector<128x128xbf16>, vector<1x128xf32> -> vector<1x128xf32>
    %19 = arith.addf %16, %18 : vector<1x128xf32>
    %20 = arith.negf %19 : vector<1x128xf32>
    %21 = math.exp %20 : vector<1x128xf32>
    %cst_17 = arith.constant 1.000000e+00 : f32
    %22 = vector.broadcast %cst_17 : f32 to vector<1x128xf32>
    %23 = arith.addf %22, %21 : vector<1x128xf32>
    %24 = arith.divf %22, %23 : vector<1x128xf32>
    %c0_18 = arith.constant 0 : index
    %c256 = arith.constant 256 : index
    %25 = vector.load %arg6[%c0_18, %c256] : memref<8x512xf32, #tpu.memory_space<vmem>>, vector<1x128xf32>
    %c0_19 = arith.constant 0 : index
    %c256_20 = arith.constant 256 : index
    %26 = vector.load %arg2[%c0_19, %c256_20] : memref<128x512xbf16, #tpu.memory_space<vmem>>, vector<128x128xbf16>
    %cst_21 = arith.constant dense<0.000000e+00> : vector<1x128xf32>
    %27 = tpu.matmul %6, %26, %cst_21 {dimension_numbers = #tpu.dot_dimension_numbers<[1], [0], [0], [1], [0, 0, 1, 1], [], []>} : vector<1x128xbf16>, vector<128x128xbf16>, vector<1x128xf32> -> vector<1x128xf32>
    %28 = arith.addf %25, %27 : vector<1x128xf32>
    %29 = math.tanh %28 : vector<1x128xf32>
    %c0_22 = arith.constant 0 : index
    %c384 = arith.constant 384 : index
    %30 = vector.load %arg6[%c0_22, %c384] : memref<8x512xf32, #tpu.memory_space<vmem>>, vector<1x128xf32>
    %c0_23 = arith.constant 0 : index
    %c384_24 = arith.constant 384 : index
    %31 = vector.load %arg2[%c0_23, %c384_24] : memref<128x512xbf16, #tpu.memory_space<vmem>>, vector<128x128xbf16>
    %cst_25 = arith.constant dense<0.000000e+00> : vector<1x128xf32>
    %32 = tpu.matmul %6, %31, %cst_25 {dimension_numbers = #tpu.dot_dimension_numbers<[1], [0], [0], [1], [0, 0, 1, 1], [], []>} : vector<1x128xbf16>, vector<128x128xbf16>, vector<1x128xf32> -> vector<1x128xf32>
    %33 = arith.addf %30, %32 : vector<1x128xf32>
    %34 = arith.negf %33 : vector<1x128xf32>
    %35 = math.exp %34 : vector<1x128xf32>
    %cst_26 = arith.constant 1.000000e+00 : f32
    %36 = vector.broadcast %cst_26 : f32 to vector<1x128xf32>
    %37 = arith.addf %36, %35 : vector<1x128xf32>
    %38 = arith.divf %36, %37 : vector<1x128xf32>
    %39 = arith.mulf %24, %5 : vector<1x128xf32>
    %40 = arith.mulf %15, %29 : vector<1x128xf32>
    %41 = arith.addf %39, %40 : vector<1x128xf32>
    %42 = math.tanh %41 : vector<1x128xf32>
    %43 = arith.mulf %38, %42 : vector<1x128xf32>
    %c0_27 = arith.constant 0 : index
    %c0_28 = arith.constant 0 : index
    %44 = vector.load %arg7[%c0_27, %c0_28] : memref<8x128xf32, #tpu.memory_space<vmem>>, vector<1x128xf32>
    tpu.vector_store %arg7[%c0_27, %c0_28], %43 {strides = array<i32>} : memref<8x128xf32, #tpu.memory_space<vmem>>, vector<1x128xf32>,
    %45 = arith.truncf %43 : vector<1x128xf32> to vector<1x128xbf16>
    %c1 = arith.constant 1 : index
    %c0_29 = arith.constant 0 : index
    %46 = vector.load %arg6[%c1, %c0_29] : memref<8x512xf32, #tpu.memory_space<vmem>>, vector<1x128xf32>
    %c0_30 = arith.constant 0 : index
    %c0_31 = arith.constant 0 : index
    %47 = vector.load %arg2[%c0_30, %c0_31] : memref<128x512xbf16, #tpu.memory_space<vmem>>, vector<128x128xbf16>
    %cst_32 = arith.constant dense<0.000000e+00> : vector<1x128xf32>
    %48 = tpu.matmul %45, %47, %cst_32 {dimension_numbers = #tpu.dot_dimension_numbers<[1], [0], [0], [1], [0, 0, 1, 1], [], []>} : vector<1x128xbf16>, vector<128x128xbf16>, vector<1x128xf32> -> vector<1x128xf32>
    %49 = arith.addf %46, %48 : vector<1x128xf32>
    %50 = arith.negf %49 : vector<1x128xf32>
    %51 = math.exp %50 : vector<1x128xf32>
    %cst_33 = arith.constant 1.000000e+00 : f32
    %52 = vector.broadcast %cst_33 : f32 to vector<1x128xf32>
    %53 = arith.addf %52, %51 : vector<1x128xf32>
    %54 = arith.divf %52, %53 : vector<1x128xf32>
    %c1_34 = arith.constant 1 : index
    %c128_35 = arith.constant 128 : index
    %55 = vector.load %arg6[%c1_34, %c128_35] : memref<8x512xf32, #tpu.memory_space<vmem>>, vector<1x128xf32>
    %c0_36 = arith.constant 0 : index
    %c128_37 = arith.constant 128 : index
    %56 = vector.load %arg2[%c0_36, %c128_37] : memref<128x512xbf16, #tpu.memory_space<vmem>>, vector<128x128xbf16>
    %cst_38 = arith.constant dense<0.000000e+00> : vector<1x128xf32>
    %57 = tpu.matmul %45, %56, %cst_38 {dimension_numbers = #tpu.dot_dimension_numbers<[1], [0], [0], [1], [0, 0, 1, 1], [], []>} : vector<1x128xbf16>, vector<128x128xbf16>, vector<1x128xf32> -> vector<1x128xf32>
    %58 = arith.addf %55, %57 : vector<1x128xf32>
    %59 = arith.negf %58 : vector<1x128xf32>
    %60 = math.exp %59 : vector<1x128xf32>
    %cst_39 = arith.constant 1.000000e+00 : f32
    %61 = vector.broadcast %cst_39 : f32 to vector<1x128xf32>
    %62 = arith.addf %61, %60 : vector<1x128xf32>
    %63 = arith.divf %61, %62 : vector<1x128xf32>
    %c1_40 = arith.constant 1 : index
    %c256_41 = arith.constant 256 : index
    %64 = vector.load %arg6[%c1_40, %c256_41] : memref<8x512xf32, #tpu.memory_space<vmem>>, vector<1x128xf32>
    %c0_42 = arith.constant 0 : index
    %c256_43 = arith.constant 256 : index
    %65 = vector.load %arg2[%c0_42, %c256_43] : memref<128x512xbf16, #tpu.memory_space<vmem>>, vector<128x128xbf16>
    %cst_44 = arith.constant dense<0.000000e+00> : vector<1x128xf32>
    %66 = tpu.matmul %45, %65, %cst_44 {dimension_numbers = #tpu.dot_dimension_numbers<[1], [0], [0], [1], [0, 0, 1, 1], [], []>} : vector<1x128xbf16>, vector<128x128xbf16>, vector<1x128xf32> -> vector<1x128xf32>
    %67 = arith.addf %64, %66 : vector<1x128xf32>
    %68 = math.tanh %67 : vector<1x128xf32>
    %c1_45 = arith.constant 1 : index
    %c384_46 = arith.constant 384 : index
    %69 = vector.load %arg6[%c1_45, %c384_46] : memref<8x512xf32, #tpu.memory_space<vmem>>, vector<1x128xf32>
    %c0_47 = arith.constant 0 : index
    %c384_48 = arith.constant 384 : index
    %70 = vector.load %arg2[%c0_47, %c384_48] : memref<128x512xbf16, #tpu.memory_space<vmem>>, vector<128x128xbf16>
    %cst_49 = arith.constant dense<0.000000e+00> : vector<1x128xf32>
    %71 = tpu.matmul %45, %70, %cst_49 {dimension_numbers = #tpu.dot_dimension_numbers<[1], [0], [0], [1], [0, 0, 1, 1], [], []>} : vector<1x128xbf16>, vector<128x128xbf16>, vector<1x128xf32> -> vector<1x128xf32>
    %72 = arith.addf %69, %71 : vector<1x128xf32>
    %73 = arith.negf %72 : vector<1x128xf32>
    %74 = math.exp %73 : vector<1x128xf32>
    %cst_50 = arith.constant 1.000000e+00 : f32
    %75 = vector.broadcast %cst_50 : f32 to vector<1x128xf32>
    %76 = arith.addf %75, %74 : vector<1x128xf32>
    %77 = arith.divf %75, %76 : vector<1x128xf32>
    %78 = arith.mulf %63, %41 : vector<1x128xf32>
    %79 = arith.mulf %54, %68 : vector<1x128xf32>
    %80 = arith.addf %78, %79 : vector<1x128xf32>
    %81 = math.tanh %80 : vector<1x128xf32>
    %82 = arith.mulf %77, %81 : vector<1x128xf32>
    %c1_51 = arith.constant 1 : index
    %c0_52 = arith.constant 0 : index
    %83 = vector.load %arg7[%c1_51, %c0_52] : memref<8x128xf32, #tpu.memory_space<vmem>>, vector<1x128xf32>
    tpu.vector_store %arg7[%c1_51, %c0_52], %82 {strides = array<i32>} : memref<8x128xf32, #tpu.memory_space<vmem>>, vector<1x128xf32>,
    %84 = arith.truncf %82 : vector<1x128xf32> to vector<1x128xbf16>
    %c2 = arith.constant 2 : index
    %c0_53 = arith.constant 0 : index
    %85 = vector.load %arg6[%c2, %c0_53] : memref<8x512xf32, #tpu.memory_space<vmem>>, vector<1x128xf32>
    %c0_54 = arith.constant 0 : index
    %c0_55 = arith.constant 0 : index
    %86 = vector.load %arg2[%c0_54, %c0_55] : memref<128x512xbf16, #tpu.memory_space<vmem>>, vector<128x128xbf16>
    %cst_56 = arith.constant dense<0.000000e+00> : vector<1x128xf32>
    %87 = tpu.matmul %84, %86, %cst_56 {dimension_numbers = #tpu.dot_dimension_numbers<[1], [0], [0], [1], [0, 0, 1, 1], [], []>} : vector<1x128xbf16>, vector<128x128xbf16>, vector<1x128xf32> -> vector<1x128xf32>
    %88 = arith.addf %85, %87 : vector<1x128xf32>
    %89 = arith.negf %88 : vector<1x128xf32>
    %90 = math.exp %89 : vector<1x128xf32>
    %cst_57 = arith.constant 1.000000e+00 : f32
    %91 = vector.broadcast %cst_57 : f32 to vector<1x128xf32>
    %92 = arith.addf %91, %90 : vector<1x128xf32>
    %93 = arith.divf %91, %92 : vector<1x128xf32>
    %c2_58 = arith.constant 2 : index
    %c128_59 = arith.constant 128 : index
    %94 = vector.load %arg6[%c2_58, %c128_59] : memref<8x512xf32, #tpu.memory_space<vmem>>, vector<1x128xf32>
    %c0_60 = arith.constant 0 : index
    %c128_61 = arith.constant 128 : index
    %95 = vector.load %arg2[%c0_60, %c128_61] : memref<128x512xbf16, #tpu.memory_space<vmem>>, vector<128x128xbf16>
    %cst_62 = arith.constant dense<0.000000e+00> : vector<1x128xf32>
    %96 = tpu.matmul %84, %95, %cst_62 {dimension_numbers = #tpu.dot_dimension_numbers<[1], [0], [0], [1], [0, 0, 1, 1], [], []>} : vector<1x128xbf16>, vector<128x128xbf16>, vector<1x128xf32> -> vector<1x128xf32>
    %97 = arith.addf %94, %96 : vector<1x128xf32>
    %98 = arith.negf %97 : vector<1x128xf32>
    %99 = math.exp %98 : vector<1x128xf32>
    %cst_63 = arith.constant 1.000000e+00 : f32
    %100 = vector.broadcast %cst_63 : f32 to vector<1x128xf32>
    %101 = arith.addf %100, %99 : vector<1x128xf32>
    %102 = arith.divf %100, %101 : vector<1x128xf32>
    %c2_64 = arith.constant 2 : index
    %c256_65 = arith.constant 256 : index
    %103 = vector.load %arg6[%c2_64, %c256_65] : memref<8x512xf32, #tpu.memory_space<vmem>>, vector<1x128xf32>
    %c0_66 = arith.constant 0 : index
    %c256_67 = arith.constant 256 : index
    %104 = vector.load %arg2[%c0_66, %c256_67] : memref<128x512xbf16, #tpu.memory_space<vmem>>, vector<128x128xbf16>
    %cst_68 = arith.constant dense<0.000000e+00> : vector<1x128xf32>
    %105 = tpu.matmul %84, %104, %cst_68 {dimension_numbers = #tpu.dot_dimension_numbers<[1], [0], [0], [1], [0, 0, 1, 1], [], []>} : vector<1x128xbf16>, vector<128x128xbf16>, vector<1x128xf32> -> vector<1x128xf32>
    %106 = arith.addf %103, %105 : vector<1x128xf32>
    %107 = math.tanh %106 : vector<1x128xf32>
    %c2_69 = arith.constant 2 : index
    %c384_70 = arith.constant 384 : index
    %108 = vector.load %arg6[%c2_69, %c384_70] : memref<8x512xf32, #tpu.memory_space<vmem>>, vector<1x128xf32>
    %c0_71 = arith.constant 0 : index
    %c384_72 = arith.constant 384 : index
    %109 = vector.load %arg2[%c0_71, %c384_72] : memref<128x512xbf16, #tpu.memory_space<vmem>>, vector<128x128xbf16>
    %cst_73 = arith.constant dense<0.000000e+00> : vector<1x128xf32>
    %110 = tpu.matmul %84, %109, %cst_73 {dimension_numbers = #tpu.dot_dimension_numbers<[1], [0], [0], [1], [0, 0, 1, 1], [], []>} : vector<1x128xbf16>, vector<128x128xbf16>, vector<1x128xf32> -> vector<1x128xf32>
    %111 = arith.addf %108, %110 : vector<1x128xf32>
    %112 = arith.negf %111 : vector<1x128xf32>
    %113 = math.exp %112 : vector<1x128xf32>
    %cst_74 = arith.constant 1.000000e+00 : f32
    %114 = vector.broadcast %cst_74 : f32 to vector<1x128xf32>
    %115 = arith.addf %114, %113 : vector<1x128xf32>
    %116 = arith.divf %114, %115 : vector<1x128xf32>
    %117 = arith.mulf %102, %80 : vector<1x128xf32>
    %118 = arith.mulf %93, %107 : vector<1x128xf32>
    %119 = arith.addf %117, %118 : vector<1x128xf32>
    %120 = math.tanh %119 : vector<1x128xf32>
    %121 = arith.mulf %116, %120 : vector<1x128xf32>
    %c2_75 = arith.constant 2 : index
    %c0_76 = arith.constant 0 : index
    %122 = vector.load %arg7[%c2_75, %c0_76] : memref<8x128xf32, #tpu.memory_space<vmem>>, vector<1x128xf32>
    tpu.vector_store %arg7[%c2_75, %c0_76], %121 {strides = array<i32>} : memref<8x128xf32, #tpu.memory_space<vmem>>, vector<1x128xf32>,
    %123 = arith.truncf %121 : vector<1x128xf32> to vector<1x128xbf16>
    %c3 = arith.constant 3 : index
    %c0_77 = arith.constant 0 : index
    %124 = vector.load %arg6[%c3, %c0_77] : memref<8x512xf32, #tpu.memory_space<vmem>>, vector<1x128xf32>
    %c0_78 = arith.constant 0 : index
    %c0_79 = arith.constant 0 : index
    %125 = vector.load %arg2[%c0_78, %c0_79] : memref<128x512xbf16, #tpu.memory_space<vmem>>, vector<128x128xbf16>
    %cst_80 = arith.constant dense<0.000000e+00> : vector<1x128xf32>
    %126 = tpu.matmul %123, %125, %cst_80 {dimension_numbers = #tpu.dot_dimension_numbers<[1], [0], [0], [1], [0, 0, 1, 1], [], []>} : vector<1x128xbf16>, vector<128x128xbf16>, vector<1x128xf32> -> vector<1x128xf32>
    %127 = arith.addf %124, %126 : vector<1x128xf32>
    %128 = arith.negf %127 : vector<1x128xf32>
    %129 = math.exp %128 : vector<1x128xf32>
    %cst_81 = arith.constant 1.000000e+00 : f32
    %130 = vector.broadcast %cst_81 : f32 to vector<1x128xf32>
    %131 = arith.addf %130, %129 : vector<1x128xf32>
    %132 = arith.divf %130, %131 : vector<1x128xf32>
    %c3_82 = arith.constant 3 : index
    %c128_83 = arith.constant 128 : index
    %133 = vector.load %arg6[%c3_82, %c128_83] : memref<8x512xf32, #tpu.memory_space<vmem>>, vector<1x128xf32>
    %c0_84 = arith.constant 0 : index
    %c128_85 = arith.constant 128 : index
    %134 = vector.load %arg2[%c0_84, %c128_85] : memref<128x512xbf16, #tpu.memory_space<vmem>>, vector<128x128xbf16>
    %cst_86 = arith.constant dense<0.000000e+00> : vector<1x128xf32>
    %135 = tpu.matmul %123, %134, %cst_86 {dimension_numbers = #tpu.dot_dimension_numbers<[1], [0], [0], [1], [0, 0, 1, 1], [], []>} : vector<1x128xbf16>, vector<128x128xbf16>, vector<1x128xf32> -> vector<1x128xf32>
    %136 = arith.addf %133, %135 : vector<1x128xf32>
    %137 = arith.negf %136 : vector<1x128xf32>
    %138 = math.exp %137 : vector<1x128xf32>
    %cst_87 = arith.constant 1.000000e+00 : f32
    %139 = vector.broadcast %cst_87 : f32 to vector<1x128xf32>
    %140 = arith.addf %139, %138 : vector<1x128xf32>
    %141 = arith.divf %139, %140 : vector<1x128xf32>
    %c3_88 = arith.constant 3 : index
    %c256_89 = arith.constant 256 : index
    %142 = vector.load %arg6[%c3_88, %c256_89] : memref<8x512xf32, #tpu.memory_space<vmem>>, vector<1x128xf32>
    %c0_90 = arith.constant 0 : index
    %c256_91 = arith.constant 256 : index
    %143 = vector.load %arg2[%c0_90, %c256_91] : memref<128x512xbf16, #tpu.memory_space<vmem>>, vector<128x128xbf16>
    %cst_92 = arith.constant dense<0.000000e+00> : vector<1x128xf32>
    %144 = tpu.matmul %123, %143, %cst_92 {dimension_numbers = #tpu.dot_dimension_numbers<[1], [0], [0], [1], [0, 0, 1, 1], [], []>} : vector<1x128xbf16>, vector<128x128xbf16>, vector<1x128xf32> -> vector<1x128xf32>
    %145 = arith.addf %142, %144 : vector<1x128xf32>
    %146 = math.tanh %145 : vector<1x128xf32>
    %c3_93 = arith.constant 3 : index
    %c384_94 = arith.constant 384 : index
    %147 = vector.load %arg6[%c3_93, %c384_94] : memref<8x512xf32, #tpu.memory_space<vmem>>, vector<1x128xf32>
    %c0_95 = arith.constant 0 : index
    %c384_96 = arith.constant 384 : index
    %148 = vector.load %arg2[%c0_95, %c384_96] : memref<128x512xbf16, #tpu.memory_space<vmem>>, vector<128x128xbf16>
    %cst_97 = arith.constant dense<0.000000e+00> : vector<1x128xf32>
    %149 = tpu.matmul %123, %148, %cst_97 {dimension_numbers = #tpu.dot_dimension_numbers<[1], [0], [0], [1], [0, 0, 1, 1], [], []>} : vector<1x128xbf16>, vector<128x128xbf16>, vector<1x128xf32> -> vector<1x128xf32>
    %150 = arith.addf %147, %149 : vector<1x128xf32>
    %151 = arith.negf %150 : vector<1x128xf32>
    %152 = math.exp %151 : vector<1x128xf32>
    %cst_98 = arith.constant 1.000000e+00 : f32
    %153 = vector.broadcast %cst_98 : f32 to vector<1x128xf32>
    %154 = arith.addf %153, %152 : vector<1x128xf32>
    %155 = arith.divf %153, %154 : vector<1x128xf32>
    %156 = arith.mulf %141, %119 : vector<1x128xf32>
    %157 = arith.mulf %132, %146 : vector<1x128xf32>
    %158 = arith.addf %156, %157 : vector<1x128xf32>
    %159 = math.tanh %158 : vector<1x128xf32>
    %160 = arith.mulf %155, %159 : vector<1x128xf32>
    %c3_99 = arith.constant 3 : index
    %c0_100 = arith.constant 0 : index
    %161 = vector.load %arg7[%c3_99, %c0_100] : memref<8x128xf32, #tpu.memory_space<vmem>>, vector<1x128xf32>
    tpu.vector_store %arg7[%c3_99, %c0_100], %160 {strides = array<i32>} : memref<8x128xf32, #tpu.memory_space<vmem>>, vector<1x128xf32>,
    %162 = arith.truncf %160 : vector<1x128xf32> to vector<1x128xbf16>
    %c4 = arith.constant 4 : index
    %c0_101 = arith.constant 0 : index
    %163 = vector.load %arg6[%c4, %c0_101] : memref<8x512xf32, #tpu.memory_space<vmem>>, vector<1x128xf32>
    %c0_102 = arith.constant 0 : index
    %c0_103 = arith.constant 0 : index
    %164 = vector.load %arg2[%c0_102, %c0_103] : memref<128x512xbf16, #tpu.memory_space<vmem>>, vector<128x128xbf16>
    %cst_104 = arith.constant dense<0.000000e+00> : vector<1x128xf32>
    %165 = tpu.matmul %162, %164, %cst_104 {dimension_numbers = #tpu.dot_dimension_numbers<[1], [0], [0], [1], [0, 0, 1, 1], [], []>} : vector<1x128xbf16>, vector<128x128xbf16>, vector<1x128xf32> -> vector<1x128xf32>
    %166 = arith.addf %163, %165 : vector<1x128xf32>
    %167 = arith.negf %166 : vector<1x128xf32>
    %168 = math.exp %167 : vector<1x128xf32>
    %cst_105 = arith.constant 1.000000e+00 : f32
    %169 = vector.broadcast %cst_105 : f32 to vector<1x128xf32>
    %170 = arith.addf %169, %168 : vector<1x128xf32>
    %171 = arith.divf %169, %170 : vector<1x128xf32>
    %c4_106 = arith.constant 4 : index
    %c128_107 = arith.constant 128 : index
    %172 = vector.load %arg6[%c4_106, %c128_107] : memref<8x512xf32, #tpu.memory_space<vmem>>, vector<1x128xf32>
    %c0_108 = arith.constant 0 : index
    %c128_109 = arith.constant 128 : index
    %173 = vector.load %arg2[%c0_108, %c128_109] : memref<128x512xbf16, #tpu.memory_space<vmem>>, vector<128x128xbf16>
    %cst_110 = arith.constant dense<0.000000e+00> : vector<1x128xf32>
    %174 = tpu.matmul %162, %173, %cst_110 {dimension_numbers = #tpu.dot_dimension_numbers<[1], [0], [0], [1], [0, 0, 1, 1], [], []>} : vector<1x128xbf16>, vector<128x128xbf16>, vector<1x128xf32> -> vector<1x128xf32>
    %175 = arith.addf %172, %174 : vector<1x128xf32>
    %176 = arith.negf %175 : vector<1x128xf32>
    %177 = math.exp %176 : vector<1x128xf32>
    %cst_111 = arith.constant 1.000000e+00 : f32
    %178 = vector.broadcast %cst_111 : f32 to vector<1x128xf32>
    %179 = arith.addf %178, %177 : vector<1x128xf32>
    %180 = arith.divf %178, %179 : vector<1x128xf32>
    %c4_112 = arith.constant 4 : index
    %c256_113 = arith.constant 256 : index
    %181 = vector.load %arg6[%c4_112, %c256_113] : memref<8x512xf32, #tpu.memory_space<vmem>>, vector<1x128xf32>
    %c0_114 = arith.constant 0 : index
    %c256_115 = arith.constant 256 : index
    %182 = vector.load %arg2[%c0_114, %c256_115] : memref<128x512xbf16, #tpu.memory_space<vmem>>, vector<128x128xbf16>
    %cst_116 = arith.constant dense<0.000000e+00> : vector<1x128xf32>
    %183 = tpu.matmul %162, %182, %cst_116 {dimension_numbers = #tpu.dot_dimension_numbers<[1], [0], [0], [1], [0, 0, 1, 1], [], []>} : vector<1x128xbf16>, vector<128x128xbf16>, vector<1x128xf32> -> vector<1x128xf32>
    %184 = arith.addf %181, %183 : vector<1x128xf32>
    %185 = math.tanh %184 : vector<1x128xf32>
    %c4_117 = arith.constant 4 : index
    %c384_118 = arith.constant 384 : index
    %186 = vector.load %arg6[%c4_117, %c384_118] : memref<8x512xf32, #tpu.memory_space<vmem>>, vector<1x128xf32>
    %c0_119 = arith.constant 0 : index
    %c384_120 = arith.constant 384 : index
    %187 = vector.load %arg2[%c0_119, %c384_120] : memref<128x512xbf16, #tpu.memory_space<vmem>>, vector<128x128xbf16>
    %cst_121 = arith.constant dense<0.000000e+00> : vector<1x128xf32>
    %188 = tpu.matmul %162, %187, %cst_121 {dimension_numbers = #tpu.dot_dimension_numbers<[1], [0], [0], [1], [0, 0, 1, 1], [], []>} : vector<1x128xbf16>, vector<128x128xbf16>, vector<1x128xf32> -> vector<1x128xf32>
    %189 = arith.addf %186, %188 : vector<1x128xf32>
    %190 = arith.negf %189 : vector<1x128xf32>
    %191 = math.exp %190 : vector<1x128xf32>
    %cst_122 = arith.constant 1.000000e+00 : f32
    %192 = vector.broadcast %cst_122 : f32 to vector<1x128xf32>
    %193 = arith.addf %192, %191 : vector<1x128xf32>
    %194 = arith.divf %192, %193 : vector<1x128xf32>
    %195 = arith.mulf %180, %158 : vector<1x128xf32>
    %196 = arith.mulf %171, %185 : vector<1x128xf32>
    %197 = arith.addf %195, %196 : vector<1x128xf32>
    %198 = math.tanh %197 : vector<1x128xf32>
    %199 = arith.mulf %194, %198 : vector<1x128xf32>
    %c4_123 = arith.constant 4 : index
    %c0_124 = arith.constant 0 : index
    %200 = vector.load %arg7[%c4_123, %c0_124] : memref<8x128xf32, #tpu.memory_space<vmem>>, vector<1x128xf32>
    tpu.vector_store %arg7[%c4_123, %c0_124], %199 {strides = array<i32>} : memref<8x128xf32, #tpu.memory_space<vmem>>, vector<1x128xf32>,
    %201 = arith.truncf %199 : vector<1x128xf32> to vector<1x128xbf16>
    %c5 = arith.constant 5 : index
    %c0_125 = arith.constant 0 : index
    %202 = vector.load %arg6[%c5, %c0_125] : memref<8x512xf32, #tpu.memory_space<vmem>>, vector<1x128xf32>
    %c0_126 = arith.constant 0 : index
    %c0_127 = arith.constant 0 : index
    %203 = vector.load %arg2[%c0_126, %c0_127] : memref<128x512xbf16, #tpu.memory_space<vmem>>, vector<128x128xbf16>
    %cst_128 = arith.constant dense<0.000000e+00> : vector<1x128xf32>
    %204 = tpu.matmul %201, %203, %cst_128 {dimension_numbers = #tpu.dot_dimension_numbers<[1], [0], [0], [1], [0, 0, 1, 1], [], []>} : vector<1x128xbf16>, vector<128x128xbf16>, vector<1x128xf32> -> vector<1x128xf32>
    %205 = arith.addf %202, %204 : vector<1x128xf32>
    %206 = arith.negf %205 : vector<1x128xf32>
    %207 = math.exp %206 : vector<1x128xf32>
    %cst_129 = arith.constant 1.000000e+00 : f32
    %208 = vector.broadcast %cst_129 : f32 to vector<1x128xf32>
    %209 = arith.addf %208, %207 : vector<1x128xf32>
    %210 = arith.divf %208, %209 : vector<1x128xf32>
    %c5_130 = arith.constant 5 : index
    %c128_131 = arith.constant 128 : index
    %211 = vector.load %arg6[%c5_130, %c128_131] : memref<8x512xf32, #tpu.memory_space<vmem>>, vector<1x128xf32>
    %c0_132 = arith.constant 0 : index
    %c128_133 = arith.constant 128 : index
    %212 = vector.load %arg2[%c0_132, %c128_133] : memref<128x512xbf16, #tpu.memory_space<vmem>>, vector<128x128xbf16>
    %cst_134 = arith.constant dense<0.000000e+00> : vector<1x128xf32>
    %213 = tpu.matmul %201, %212, %cst_134 {dimension_numbers = #tpu.dot_dimension_numbers<[1], [0], [0], [1], [0, 0, 1, 1], [], []>} : vector<1x128xbf16>, vector<128x128xbf16>, vector<1x128xf32> -> vector<1x128xf32>
    %214 = arith.addf %211, %213 : vector<1x128xf32>
    %215 = arith.negf %214 : vector<1x128xf32>
    %216 = math.exp %215 : vector<1x128xf32>
    %cst_135 = arith.constant 1.000000e+00 : f32
    %217 = vector.broadcast %cst_135 : f32 to vector<1x128xf32>
    %218 = arith.addf %217, %216 : vector<1x128xf32>
    %219 = arith.divf %217, %218 : vector<1x128xf32>
    %c5_136 = arith.constant 5 : index
    %c256_137 = arith.constant 256 : index
    %220 = vector.load %arg6[%c5_136, %c256_137] : memref<8x512xf32, #tpu.memory_space<vmem>>, vector<1x128xf32>
    %c0_138 = arith.constant 0 : index
    %c256_139 = arith.constant 256 : index
    %221 = vector.load %arg2[%c0_138, %c256_139] : memref<128x512xbf16, #tpu.memory_space<vmem>>, vector<128x128xbf16>
    %cst_140 = arith.constant dense<0.000000e+00> : vector<1x128xf32>
    %222 = tpu.matmul %201, %221, %cst_140 {dimension_numbers = #tpu.dot_dimension_numbers<[1], [0], [0], [1], [0, 0, 1, 1], [], []>} : vector<1x128xbf16>, vector<128x128xbf16>, vector<1x128xf32> -> vector<1x128xf32>
    %223 = arith.addf %220, %222 : vector<1x128xf32>
    %224 = math.tanh %223 : vector<1x128xf32>
    %c5_141 = arith.constant 5 : index
    %c384_142 = arith.constant 384 : index
    %225 = vector.load %arg6[%c5_141, %c384_142] : memref<8x512xf32, #tpu.memory_space<vmem>>, vector<1x128xf32>
    %c0_143 = arith.constant 0 : index
    %c384_144 = arith.constant 384 : index
    %226 = vector.load %arg2[%c0_143, %c384_144] : memref<128x512xbf16, #tpu.memory_space<vmem>>, vector<128x128xbf16>
    %cst_145 = arith.constant dense<0.000000e+00> : vector<1x128xf32>
    %227 = tpu.matmul %201, %226, %cst_145 {dimension_numbers = #tpu.dot_dimension_numbers<[1], [0], [0], [1], [0, 0, 1, 1], [], []>} : vector<1x128xbf16>, vector<128x128xbf16>, vector<1x128xf32> -> vector<1x128xf32>
    %228 = arith.addf %225, %227 : vector<1x128xf32>
    %229 = arith.negf %228 : vector<1x128xf32>
    %230 = math.exp %229 : vector<1x128xf32>
    %cst_146 = arith.constant 1.000000e+00 : f32
    %231 = vector.broadcast %cst_146 : f32 to vector<1x128xf32>
    %232 = arith.addf %231, %230 : vector<1x128xf32>
    %233 = arith.divf %231, %232 : vector<1x128xf32>
    %234 = arith.mulf %219, %197 : vector<1x128xf32>
    %235 = arith.mulf %210, %224 : vector<1x128xf32>
    %236 = arith.addf %234, %235 : vector<1x128xf32>
    %237 = math.tanh %236 : vector<1x128xf32>
    %238 = arith.mulf %233, %237 : vector<1x128xf32>
    %c5_147 = arith.constant 5 : index
    %c0_148 = arith.constant 0 : index
    %239 = vector.load %arg7[%c5_147, %c0_148] : memref<8x128xf32, #tpu.memory_space<vmem>>, vector<1x128xf32>
    tpu.vector_store %arg7[%c5_147, %c0_148], %238 {strides = array<i32>} : memref<8x128xf32, #tpu.memory_space<vmem>>, vector<1x128xf32>,
    %240 = arith.truncf %238 : vector<1x128xf32> to vector<1x128xbf16>
    %c6 = arith.constant 6 : index
    %c0_149 = arith.constant 0 : index
    %241 = vector.load %arg6[%c6, %c0_149] : memref<8x512xf32, #tpu.memory_space<vmem>>, vector<1x128xf32>
    %c0_150 = arith.constant 0 : index
    %c0_151 = arith.constant 0 : index
    %242 = vector.load %arg2[%c0_150, %c0_151] : memref<128x512xbf16, #tpu.memory_space<vmem>>, vector<128x128xbf16>
    %cst_152 = arith.constant dense<0.000000e+00> : vector<1x128xf32>
    %243 = tpu.matmul %240, %242, %cst_152 {dimension_numbers = #tpu.dot_dimension_numbers<[1], [0], [0], [1], [0, 0, 1, 1], [], []>} : vector<1x128xbf16>, vector<128x128xbf16>, vector<1x128xf32> -> vector<1x128xf32>
    %244 = arith.addf %241, %243 : vector<1x128xf32>
    %245 = arith.negf %244 : vector<1x128xf32>
    %246 = math.exp %245 : vector<1x128xf32>
    %cst_153 = arith.constant 1.000000e+00 : f32
    %247 = vector.broadcast %cst_153 : f32 to vector<1x128xf32>
    %248 = arith.addf %247, %246 : vector<1x128xf32>
    %249 = arith.divf %247, %248 : vector<1x128xf32>
    %c6_154 = arith.constant 6 : index
    %c128_155 = arith.constant 128 : index
    %250 = vector.load %arg6[%c6_154, %c128_155] : memref<8x512xf32, #tpu.memory_space<vmem>>, vector<1x128xf32>
    %c0_156 = arith.constant 0 : index
    %c128_157 = arith.constant 128 : index
    %251 = vector.load %arg2[%c0_156, %c128_157] : memref<128x512xbf16, #tpu.memory_space<vmem>>, vector<128x128xbf16>
    %cst_158 = arith.constant dense<0.000000e+00> : vector<1x128xf32>
    %252 = tpu.matmul %240, %251, %cst_158 {dimension_numbers = #tpu.dot_dimension_numbers<[1], [0], [0], [1], [0, 0, 1, 1], [], []>} : vector<1x128xbf16>, vector<128x128xbf16>, vector<1x128xf32> -> vector<1x128xf32>
    %253 = arith.addf %250, %252 : vector<1x128xf32>
    %254 = arith.negf %253 : vector<1x128xf32>
    %255 = math.exp %254 : vector<1x128xf32>
    %cst_159 = arith.constant 1.000000e+00 : f32
    %256 = vector.broadcast %cst_159 : f32 to vector<1x128xf32>
    %257 = arith.addf %256, %255 : vector<1x128xf32>
    %258 = arith.divf %256, %257 : vector<1x128xf32>
    %c6_160 = arith.constant 6 : index
    %c256_161 = arith.constant 256 : index
    %259 = vector.load %arg6[%c6_160, %c256_161] : memref<8x512xf32, #tpu.memory_space<vmem>>, vector<1x128xf32>
    %c0_162 = arith.constant 0 : index
    %c256_163 = arith.constant 256 : index
    %260 = vector.load %arg2[%c0_162, %c256_163] : memref<128x512xbf16, #tpu.memory_space<vmem>>, vector<128x128xbf16>
    %cst_164 = arith.constant dense<0.000000e+00> : vector<1x128xf32>
    %261 = tpu.matmul %240, %260, %cst_164 {dimension_numbers = #tpu.dot_dimension_numbers<[1], [0], [0], [1], [0, 0, 1, 1], [], []>} : vector<1x128xbf16>, vector<128x128xbf16>, vector<1x128xf32> -> vector<1x128xf32>
    %262 = arith.addf %259, %261 : vector<1x128xf32>
    %263 = math.tanh %262 : vector<1x128xf32>
    %c6_165 = arith.constant 6 : index
    %c384_166 = arith.constant 384 : index
    %264 = vector.load %arg6[%c6_165, %c384_166] : memref<8x512xf32, #tpu.memory_space<vmem>>, vector<1x128xf32>
    %c0_167 = arith.constant 0 : index
    %c384_168 = arith.constant 384 : index
    %265 = vector.load %arg2[%c0_167, %c384_168] : memref<128x512xbf16, #tpu.memory_space<vmem>>, vector<128x128xbf16>
    %cst_169 = arith.constant dense<0.000000e+00> : vector<1x128xf32>
    %266 = tpu.matmul %240, %265, %cst_169 {dimension_numbers = #tpu.dot_dimension_numbers<[1], [0], [0], [1], [0, 0, 1, 1], [], []>} : vector<1x128xbf16>, vector<128x128xbf16>, vector<1x128xf32> -> vector<1x128xf32>
    %267 = arith.addf %264, %266 : vector<1x128xf32>
    %268 = arith.negf %267 : vector<1x128xf32>
    %269 = math.exp %268 : vector<1x128xf32>
    %cst_170 = arith.constant 1.000000e+00 : f32
    %270 = vector.broadcast %cst_170 : f32 to vector<1x128xf32>
    %271 = arith.addf %270, %269 : vector<1x128xf32>
    %272 = arith.divf %270, %271 : vector<1x128xf32>
    %273 = arith.mulf %258, %236 : vector<1x128xf32>
    %274 = arith.mulf %249, %263 : vector<1x128xf32>
    %275 = arith.addf %273, %274 : vector<1x128xf32>
    %276 = math.tanh %275 : vector<1x128xf32>
    %277 = arith.mulf %272, %276 : vector<1x128xf32>
    %c6_171 = arith.constant 6 : index
    %c0_172 = arith.constant 0 : index
    %278 = vector.load %arg7[%c6_171, %c0_172] : memref<8x128xf32, #tpu.memory_space<vmem>>, vector<1x128xf32>
    tpu.vector_store %arg7[%c6_171, %c0_172], %277 {strides = array<i32>} : memref<8x128xf32, #tpu.memory_space<vmem>>, vector<1x128xf32>,
    %279 = arith.truncf %277 : vector<1x128xf32> to vector<1x128xbf16>
    %c7 = arith.constant 7 : index
    %c0_173 = arith.constant 0 : index
    %280 = vector.load %arg6[%c7, %c0_173] : memref<8x512xf32, #tpu.memory_space<vmem>>, vector<1x128xf32>
    %c0_174 = arith.constant 0 : index
    %c0_175 = arith.constant 0 : index
    %281 = vector.load %arg2[%c0_174, %c0_175] : memref<128x512xbf16, #tpu.memory_space<vmem>>, vector<128x128xbf16>
    %cst_176 = arith.constant dense<0.000000e+00> : vector<1x128xf32>
    %282 = tpu.matmul %279, %281, %cst_176 {dimension_numbers = #tpu.dot_dimension_numbers<[1], [0], [0], [1], [0, 0, 1, 1], [], []>} : vector<1x128xbf16>, vector<128x128xbf16>, vector<1x128xf32> -> vector<1x128xf32>
    %283 = arith.addf %280, %282 : vector<1x128xf32>
    %284 = arith.negf %283 : vector<1x128xf32>
    %285 = math.exp %284 : vector<1x128xf32>
    %cst_177 = arith.constant 1.000000e+00 : f32
    %286 = vector.broadcast %cst_177 : f32 to vector<1x128xf32>
    %287 = arith.addf %286, %285 : vector<1x128xf32>
    %288 = arith.divf %286, %287 : vector<1x128xf32>
    %c7_178 = arith.constant 7 : index
    %c128_179 = arith.constant 128 : index
    %289 = vector.load %arg6[%c7_178, %c128_179] : memref<8x512xf32, #tpu.memory_space<vmem>>, vector<1x128xf32>
    %c0_180 = arith.constant 0 : index
    %c128_181 = arith.constant 128 : index
    %290 = vector.load %arg2[%c0_180, %c128_181] : memref<128x512xbf16, #tpu.memory_space<vmem>>, vector<128x128xbf16>
    %cst_182 = arith.constant dense<0.000000e+00> : vector<1x128xf32>
    %291 = tpu.matmul %279, %290, %cst_182 {dimension_numbers = #tpu.dot_dimension_numbers<[1], [0], [0], [1], [0, 0, 1, 1], [], []>} : vector<1x128xbf16>, vector<128x128xbf16>, vector<1x128xf32> -> vector<1x128xf32>
    %292 = arith.addf %289, %291 : vector<1x128xf32>
    %293 = arith.negf %292 : vector<1x128xf32>
    %294 = math.exp %293 : vector<1x128xf32>
    %cst_183 = arith.constant 1.000000e+00 : f32
    %295 = vector.broadcast %cst_183 : f32 to vector<1x128xf32>
    %296 = arith.addf %295, %294 : vector<1x128xf32>
    %297 = arith.divf %295, %296 : vector<1x128xf32>
    %c7_184 = arith.constant 7 : index
    %c256_185 = arith.constant 256 : index
    %298 = vector.load %arg6[%c7_184, %c256_185] : memref<8x512xf32, #tpu.memory_space<vmem>>, vector<1x128xf32>
    %c0_186 = arith.constant 0 : index
    %c256_187 = arith.constant 256 : index
    %299 = vector.load %arg2[%c0_186, %c256_187] : memref<128x512xbf16, #tpu.memory_space<vmem>>, vector<128x128xbf16>
    %cst_188 = arith.constant dense<0.000000e+00> : vector<1x128xf32>
    %300 = tpu.matmul %279, %299, %cst_188 {dimension_numbers = #tpu.dot_dimension_numbers<[1], [0], [0], [1], [0, 0, 1, 1], [], []>} : vector<1x128xbf16>, vector<128x128xbf16>, vector<1x128xf32> -> vector<1x128xf32>
    %301 = arith.addf %298, %300 : vector<1x128xf32>
    %302 = math.tanh %301 : vector<1x128xf32>
    %c7_189 = arith.constant 7 : index
    %c384_190 = arith.constant 384 : index
    %303 = vector.load %arg6[%c7_189, %c384_190] : memref<8x512xf32, #tpu.memory_space<vmem>>, vector<1x128xf32>
    %c0_191 = arith.constant 0 : index
    %c384_192 = arith.constant 384 : index
    %304 = vector.load %arg2[%c0_191, %c384_192] : memref<128x512xbf16, #tpu.memory_space<vmem>>, vector<128x128xbf16>
    %cst_193 = arith.constant dense<0.000000e+00> : vector<1x128xf32>
    %305 = tpu.matmul %279, %304, %cst_193 {dimension_numbers = #tpu.dot_dimension_numbers<[1], [0], [0], [1], [0, 0, 1, 1], [], []>} : vector<1x128xbf16>, vector<128x128xbf16>, vector<1x128xf32> -> vector<1x128xf32>
    %306 = arith.addf %303, %305 : vector<1x128xf32>
    %307 = arith.negf %306 : vector<1x128xf32>
    %308 = math.exp %307 : vector<1x128xf32>
    %cst_194 = arith.constant 1.000000e+00 : f32
    %309 = vector.broadcast %cst_194 : f32 to vector<1x128xf32>
    %310 = arith.addf %309, %308 : vector<1x128xf32>
    %311 = arith.divf %309, %310 : vector<1x128xf32>
    %312 = arith.mulf %297, %275 : vector<1x128xf32>
    %313 = arith.mulf %288, %302 : vector<1x128xf32>
    %314 = arith.addf %312, %313 : vector<1x128xf32>
    %315 = math.tanh %314 : vector<1x128xf32>
    %316 = arith.mulf %311, %315 : vector<1x128xf32>
    %c7_195 = arith.constant 7 : index
    %c0_196 = arith.constant 0 : index
    %317 = vector.load %arg7[%c7_195, %c0_196] : memref<8x128xf32, #tpu.memory_space<vmem>>, vector<1x128xf32>
    tpu.vector_store %arg7[%c7_195, %c0_196], %316 {strides = array<i32>} : memref<8x128xf32, #tpu.memory_space<vmem>>, vector<1x128xf32>,
    %c0_197 = arith.constant 0 : index
    %c0_198 = arith.constant 0 : index
    %318 = vector.load %arg7[%c0_197, %c0_198] : memref<8x128xf32, #tpu.memory_space<vmem>>, vector<8x128xf32>
    %c0_199 = arith.constant 0 : index
    %c0_200 = arith.constant 0 : index
    %319 = vector.load %arg3[%c0_199, %c0_200] : memref<128x32xf32, #tpu.memory_space<vmem>>, vector<128x32xf32>
    %cst_201 = arith.constant dense<0.000000e+00> : vector<8x32xf32>
    %320 = tpu.matmul %318, %319, %cst_201 {dimension_numbers = #tpu.dot_dimension_numbers<[1], [0], [0], [1], [0, 0, 1, 1], [], []>} : vector<8x128xf32>, vector<128x32xf32>, vector<8x32xf32> -> vector<8x32xf32>
    %c0_202 = arith.constant 0 : index
    %c0_203 = arith.constant 0 : index
    %321 = vector.load %arg4[%c0_202, %c0_203] : memref<1x32xf32, #tpu.memory_space<vmem>>, vector<1x32xf32>
    %322 = vector.broadcast %321 : vector<1x32xf32> to vector<8x32xf32>
    %323 = arith.addf %320, %322 : vector<8x32xf32>
    %c0_204 = arith.constant 0 : index
    %c0_205 = arith.constant 0 : index
    %324 = vector.load %arg5[%c0_204, %c0_205] : memref<8x32xf32, #tpu.memory_space<vmem>>, vector<8x32xf32>
    tpu.vector_store %arg5[%c0_204, %c0_205], %323 {strides = array<i32>} : memref<8x32xf32, #tpu.memory_space<vmem>>, vector<8x32xf32>,
    return
  }
}

</mosaic_0001>

<bundles_post_ra>
// kernel: lstm_aggregator.1
= control target key start
LH: loop header
LB: loop body
LE: loop exit
PB: predicated region body
PF: predicated region fallthrough
CT: control target
= control target key end

     0   :  { %10 = vsyncpa [#allocation5], 0  ;;  %s4976_s0 = inlined_call_operand.vmem [shape: bf16[8,32], index: 0, kind: input, shape index: {}]   ;;  %s4977_s1 = inlined_call_operand.vmem [shape: bf16[32,512], index: 1, kind: input, shape index: {}]   ;;  %s4978_s2 = inlined_call_operand.hbm [shape: bf16[128,512], index: 2, kind: input, shape index: {}]   ;;  %s4979_s3 = inlined_call_operand.vmem [shape: f32[128,32], index: 3, kind: input, shape index: {}]   ;;  %s4980_s4 = inlined_call_operand.vmem [shape: f32[1,32], index: 4, kind: input, shape index: {}]   ;;  %s4981_s5 = inlined_call_operand.hbm [shape: f32[8,32], index: 5, kind: output, shape index: {}]  }
   0x1   :  { %11 = vsyncpa [#allocation6], 0  ;;  %s20_s20 = sshll.u32 %s4978_s2, 4  ;;  %s4787_s21 = smov [#allocation4]   ;;  %s21_s20 = int_to_ptr.hbm [resolvable:$true] %s20_s20 }
   0x2   :  { %s22_s22 = sshll.u32 %s4787_s21, 4  ;;  %s4788_s23 = smov 256   ;;  %s23_s22 = int_to_ptr.vmem [resolvable:$true] %s22_s22 }
   0x3   :  { %s4789_s24 = smov 16  }
   0x4   :  { %28 = dma.hbm_to_vmem [thread:$0]  %s21_s20, 4096, %s23_s22, [#allocation5], %s4788_s23, %s4788_s23, %s4789_s24  }
   0x5   :  { %4783 = dma.done.wait [#allocation5], 4096  }
   0x6   :  { %4784 = vsyncadd [#allocation5], 4294963200  ;;  %vm87_vm0 = vcmask 261120   ;;  %v3271_v0 = vld [vmem:[%s4977_s1 + $0x20] sm:$0xf]  ;;  %s4791_s10 = smov [#allocation7]  }
   0x7   :  { %v4343_v1 = vld [vmem:[%s4977_s1 + $0x2c] sm:$0xf0]  ;;  %v4342_v2 = vld [vmem:[%s4977_s1 + $0x2c] sm:$0xf]  ;;  %v3281_v4 = vld [vmem:[%s4977_s1 + $0x38] sm:$0xf0] }
   0x8   :  { %v3272_v3 = vor.u32 %v4343_v1, %v3271_v0  ;;  %v3319_v5 = vld [vmem:[#allocation4 + $0xe0] sm:$0xf]  ;;  %v4352_v6 = vld [vmem:[#allocation4 + $0xec] sm:$0xf0]  ;;  %v3284_v7 = vor.u32 %v4342_v2, %v3281_v4  ;;  %v3255_v9 = vld [vmem:[%s4977_s1] sm:$0xf] }
   0x9   :  { %v3320_v8 = vor.u32 %v4352_v6, %v3319_v5  ;;  %v4339_v10 = vld [vmem:[%s4977_s1 + $0xc] sm:$0xf0]  ;;  %v4338_v11 = vld [vmem:[%s4977_s1 + $0xc] sm:$0xf]  ;;  %v3265_v13 = vld [vmem:[%s4977_s1 + $0x18] sm:$0xf0] }
   0xa   :  { %97 = vmatpush.bf16.msra.mxu1 %v3272_v3  ;;  %v3256_v12 = vor.u32 %v4339_v10, %v3255_v9  ;;  %v3315_v14 = vld [vmem:[#allocation4 + $0xc0] sm:$0xf]  ;;  %v4351_v15 = vld [vmem:[#allocation4 + $0xcc] sm:$0xf0]  ;;  %136 = vmatpush.bf16.msra.mxu3 %v3284_v7  ;;  %v3268_v16 = vor.u32 %v4338_v11, %v3265_v13  ;;  %v4341_v18 = vld [vmem:[%s4977_s1 + $0x24] sm:$0xf] }
   0xb   :  { %212 = vmatpush.bf16.msra.mxu0 %v3320_v8  ;;  %v3316_v17 = vor.u32 %v4351_v15, %v3315_v14  ;;  %v3273_v19 = vld [vmem:[%s4977_s1 + $0x30] sm:$0xf0]  ;;  %v4376_v22 = vld [vmem:[#allocation4 + $0xf8] sm:$0xf0]  ;;  %v4858_v23 = vld [vmem:[%s4976_s0] sm:$0xf] }
   0xc   :  { %v3417_v20 = vld [vmem:[#allocation4 + $0xec] sm:$0xf]  ;;  %v3276_v21 = vor.u32 %v4341_v18, %v3273_v19  ;;  %v3311_v24 = vld [vmem:[#allocation4 + $0xa0] sm:$0xf]  ;;  %v4350_v26 = vld [vmem:[#allocation4 + $0xac] sm:$0xf0] }
   0xd   :  { %v3418_v25 = vor.u32 %v4376_v22, %v3417_v20  ;;  %v4337_v27 = vld [vmem:[%s4977_s1 + $0x4] sm:$0xf]  ;;  %v3257_v28 = vld [vmem:[%s4977_s1 + $0x10] sm:$0xf0]  ;;  %v3279_v31 = vld [vmem:[%s4977_s1 + $0x28] sm:$0xf]  ;;  %v3312_v32 = vor.u32 %v4350_v26, %v3311_v24 }
   0xe   :  { %98 = vmatpush.bf16.msra.mxu1 %v3256_v12  ;;  %v3413_v29 = vld [vmem:[#allocation4 + $0xcc] sm:$0xf]  ;;  %v4375_v30 = vld [vmem:[#allocation4 + $0xd8] sm:$0xf0]  ;;  %137 = vmatpush.bf16.msra.mxu3 %v3268_v16  ;;  %v4344_v33 = vld [vmem:[%s4977_s1 + $0x34] sm:$0xf0]  ;;  %v3260_v36 = vor.u32 %v4337_v27, %v3257_v28 }
   0xf   :  { %213 = vmatpush.bf16.msra.mxu0 %v3316_v17  ;;  %v3352_v34 = vld [vmem:[#allocation4 + $0xe4] sm:$0xf]  ;;  %v4360_v35 = vld [vmem:[#allocation4 + $0xf0] sm:$0xf0]  ;;  %v3414_v37 = vor.u32 %v4375_v30, %v3413_v29  ;;  %v3280_v38 = vor.u32 %v4344_v33, %v3279_v31  ;;  %v3307_v39 = vld [vmem:[#allocation4 + $0x80] sm:$0xf] }
  0x10   :  { %v4349_v40 = vld [vmem:[#allocation4 + $0x8c] sm:$0xf0]  ;;  %v3409_v41 = vld [vmem:[#allocation4 + $0xac] sm:$0xf]  ;;  %v3353_v42 = vor.u32 %v4360_v35, %v3352_v34  ;;  %v4374_v43 = vld [vmem:[#allocation4 + $0xb8] sm:$0xf0] }
  0x11   :  { %3285 = vmatmul.msk.bf16.vlgmr.msra.gmra.mxu1 %vm87_vm0, %v4858_v23  ;;  %v3263_v44 = vld [vmem:[%s4977_s1 + $0x8] sm:$0xf]  ;;  %v4340_v45 = vld [vmem:[%s4977_s1 + $0x14] sm:$0xf0]  ;;  %123 = vmatpush.bf16.msra.mxu2 %v3280_v38  ;;  %v3348_v47 = vld [vmem:[#allocation4 + $0xc4] sm:$0xf]  ;;  %v3308_v50 = vor.u32 %v4349_v40, %v3307_v39  ;;  %v3410_v52 = vor.u32 %v4374_v43, %v3409_v41 }
  0x12   :  { %110 = vmatpush.bf16.msrb.mxu1 %v3276_v21  ;;  %488 = vmatpush.bf16.msrb.mxu3 %v3418_v25  ;;  %v3264_v46 = vor.u32 %v4340_v45, %v3263_v44  ;;  %v4359_v48 = vld [vmem:[#allocation4 + $0xd0] sm:$0xf0]  ;;  %v3385_v49 = vld [vmem:[#allocation4 + $0xe8] sm:$0xf]  ;;  %v4368_v51 = vld [vmem:[#allocation4 + $0xf4] sm:$0xf0] }
  0x13   :  { %3288 = vmatmul.msk.bf16.vlgmr.msra.gmra.mxu3 %vm87_vm0, %v4858_v23  ;;  %214 = vmatpush.bf16.msra.mxu0 %v3312_v32  ;;  %v3386_v53 = vor.u32 %v4368_v51, %v3385_v49  ;;  %v3303_v54 = vld [vmem:[#allocation4 + $0x60] sm:$0xf]  ;;  %v4348_v55 = vld [vmem:[#allocation4 + $0x6c] sm:$0xf0]  ;;  %v3405_v56 = vld [vmem:[#allocation4 + $0x8c] sm:$0xf]  ;;  %v3349_v57 = vor.u32 %v4359_v48, %v3348_v47 }
  0x14   :  { %v4373_v58 = vld [vmem:[#allocation4 + $0x98] sm:$0xf0]  ;;  %v3381_v59 = vld [vmem:[#allocation4 + $0xc8] sm:$0xf]  ;;  %v4367_v60 = vld [vmem:[#allocation4 + $0xd4] sm:$0xf0]  ;;  %v3304_v63 = vor.u32 %v4348_v55, %v3303_v54 }
  0x15   :  { %124 = vmatpush.bf16.msra.mxu2 %v3264_v46  ;;  %v3344_v61 = vld [vmem:[#allocation4 + $0xa4] sm:$0xf]  ;;  %v4358_v62 = vld [vmem:[#allocation4 + $0xb0] sm:$0xf0]  ;;  %v3382_v0 = vor.u32 %v4367_v60, %v3381_v59  ;;  %v3299_v1 = vld [vmem:[#allocation4 + $0x40] sm:$0xf]  ;;  %v3406_v2 = vor.u32 %v4373_v58, %v3405_v56 }
  0x16   :  { %111 = vmatpush.bf16.msrb.mxu1 %v3260_v36  ;;  %489 = vmatpush.bf16.msrb.mxu3 %v3414_v37  ;;  %v4347_v3 = vld [vmem:[#allocation4 + $0x4c] sm:$0xf0]  ;;  %v3377_v4 = vld [vmem:[#allocation4 + $0xa8] sm:$0xf]  ;;  %v4366_v5 = vld [vmem:[#allocation4 + $0xb4] sm:$0xf0]  ;;  %v3345_v6 = vor.u32 %v4358_v62, %v3344_v61 }
  0x17   :  { %215 = vmatpush.bf16.msra.mxu0 %v3308_v50  ;;  %v3401_v7 = vld [vmem:[#allocation4 + $0x6c] sm:$0xf]  ;;  %v4372_v8 = vld [vmem:[#allocation4 + $0x78] sm:$0xf0]  ;;  %v3340_v9 = vld [vmem:[#allocation4 + $0x84] sm:$0xf]  ;;  %v3300_v11 = vor.u32 %v4347_v3, %v3299_v1  ;;  %v3378_v12 = vor.u32 %v4366_v5, %v3377_v4 }
  0x18   :  { %3287 = vmatmul.msk.bf16.vlgmr.msra.gmra.mxu2 %vm87_vm0, %v4858_v23  ;;  %v4357_v10 = vld [vmem:[#allocation4 + $0x90] sm:$0xf0]  ;;  %v3295_v13 = vld [vmem:[#allocation4 + $0x20] sm:$0xf]  ;;  %v3402_v14 = vor.u32 %v4372_v8, %v3401_v7  ;;  %v4346_v15 = vld [vmem:[#allocation4 + $0x2c] sm:$0xf0] }
  0x19   :  { %408 = vmatpush.bf16.msrb.mxu2 %v3386_v53  ;;  %v3373_v16 = vld [vmem:[#allocation4 + $0x88] sm:$0xf]  ;;  %v4365_v17 = vld [vmem:[#allocation4 + $0x94] sm:$0xf0]  ;;  %v3341_v18 = vor.u32 %v4357_v10, %v3340_v9  ;;  %v3397_v19 = vld [vmem:[#allocation4 + $0x4c] sm:$0xf]  ;;  %v3296_v24 = vor.u32 %v4346_v15, %v3295_v13 }
  0x1a   :  { %310 = vmatpush.bf16.msra.mxu1 %v3353_v42  ;;  %490 = vmatpush.bf16.msrb.mxu3 %v3410_v52  ;;  %v4371_v20 = vld [vmem:[#allocation4 + $0x58] sm:$0xf0]  ;;  %v3336_v21 = vld [vmem:[#allocation4 + $0x64] sm:$0xf]  ;;  %v4356_v22 = vld [vmem:[#allocation4 + $0x70] sm:$0xf0]  ;;  %v3374_v25 = vor.u32 %v4365_v17, %v3373_v16 }
  0x1b   :  { %216 = vmatpush.bf16.msra.mxu0 %v3304_v63  ;;  %v3291_v26 = vld [vmem:[#allocation4] sm:$0xf]  ;;  %v3398_v27 = vor.u32 %v4371_v20, %v3397_v19  ;;  %v4345_v28 = vld [vmem:[#allocation4 + $0xc] sm:$0xf0]  ;;  %v3369_v29 = vld [vmem:[#allocation4 + $0x68] sm:$0xf]  ;;  %v3337_v31 = vor.u32 %v4356_v22, %v3336_v21 }
  0x1c   :  { %v4364_v30 = vld [vmem:[#allocation4 + $0x74] sm:$0xf0]  ;;  %v3393_v32 = vld [vmem:[#allocation4 + $0x2c] sm:$0xf]  ;;  %v4370_v33 = vld [vmem:[#allocation4 + $0x38] sm:$0xf0]  ;;  %v3292_v36 = vor.u32 %v4345_v28, %v3291_v26 }
  0x1d   :  { %409 = vmatpush.bf16.msrb.mxu2 %v3382_v0  ;;  %v3332_v34 = vld [vmem:[#allocation4 + $0x44] sm:$0xf]  ;;  %v4355_v35 = vld [vmem:[#allocation4 + $0x50] sm:$0xf0]  ;;  %v3370_v37 = vor.u32 %v4364_v30, %v3369_v29  ;;  %v3394_v38 = vor.u32 %v4370_v33, %v3393_v32  ;;  %v3365_v39 = vld [vmem:[#allocation4 + $0x48] sm:$0xf] }
  0x1e   :  { %311 = vmatpush.bf16.msra.mxu1 %v3349_v57  ;;  %491 = vmatpush.bf16.msrb.mxu3 %v3406_v2  ;;  %v4363_v40 = vld [vmem:[#allocation4 + $0x54] sm:$0xf0]  ;;  %v3333_v41 = vor.u32 %v4355_v35, %v3332_v34  ;;  %v3389_v42 = vld [vmem:[#allocation4 + $0xc] sm:$0xf]  ;;  %v4369_v43 = vld [vmem:[#allocation4 + $0x18] sm:$0xf0] }
  0x1f   :  { %217 = vmatpush.bf16.msra.mxu0 %v3300_v11  ;;  %v3328_v44 = vld [vmem:[#allocation4 + $0x24] sm:$0xf]  ;;  %v4354_v45 = vld [vmem:[#allocation4 + $0x30] sm:$0xf0]  ;;  %v3366_v46 = vor.u32 %v4363_v40, %v3365_v39  ;;  %v3361_v47 = vld [vmem:[#allocation4 + $0x28] sm:$0xf] }
  0x20   :  { %v4362_v48 = vld [vmem:[#allocation4 + $0x34] sm:$0xf0]  ;;  %v3329_v49 = vor.u32 %v4354_v45, %v3328_v44  ;;  %v4790_v50 = vmov 0   ;;  %v3324_v51 = vld [vmem:[#allocation4 + $0x4] sm:$0xf]  ;;  %s3241_s11 = sshll.u32 %s4791_s10, 4  ;;  %s3242_s11 = int_to_ptr.vmem [resolvable:$true] %s3241_s11 }
  0x21   :  { %410 = vmatpush.bf16.msrb.mxu2 %v3378_v12  ;;  %3286 = vmatmul.msk.bf16.vlgmr.msrb.gmra.mxu1 %vm87_vm0, %v4858_v23  ;;  %v3390_v23 = vor.u32 %v4369_v43, %v3389_v42  ;;  %v4353_v52 = vld [vmem:[#allocation4 + $0x10] sm:$0xf0]  ;;  %v3362_v53 = vor.u32 %v4362_v48, %v3361_v47  ;;  %v3357_v54 = vld [vmem:[#allocation4 + $0x8] sm:$0xf]  ;;  %v4361_v55 = vld [vmem:[#allocation4 + $0x14] sm:$0xf0] }
  0x22   :  { %312 = vmatpush.bf16.msra.mxu1 %v3345_v6  ;;  %492 = vmatpush.bf16.msrb.mxu3 %v3402_v14  ;;  %v3325_v56 = vor.u32 %v4353_v52, %v3324_v51  ;;  %v3358_v57 = vor.u32 %v4361_v55, %v3357_v54  ;;  %v3450_v63 = vld [vmem:[#allocation4 + $0xe0] sm:$0xf]  ;;  %v4384_v0 = vld [vmem:[#allocation4 + $0xec] sm:$0xf0]  ;;  %v3483_v1 = vld [vmem:[#allocation4 + $0xe4] sm:$0xf] }
  0x23   :  { %218 = vmatpush.bf16.msra.mxu0 %v3296_v24  ;;  %v3451_v3 = vor.u32 %v4384_v0, %v3450_v63  ;;  %v4392_v4 = vld [vmem:[#allocation4 + $0xf0] sm:$0xf0]  ;;  %v3516_v5 = vld [vmem:[#allocation4 + $0xe8] sm:$0xf]  ;;  %v4400_v6 = vld [vmem:[#allocation4 + $0xf4] sm:$0xf0] }
  0x24   :  { %v3484_v7 = vor.u32 %v4392_v4, %v3483_v1  ;;  %v3517_v8 = vor.u32 %v4400_v6, %v3516_v5  ;;  %v3548_v9 = vld [vmem:[#allocation4 + $0xec] sm:$0xf]  ;;  %v4408_v10 = vld [vmem:[#allocation4 + $0xf8] sm:$0xf0]  ;;  %v3446_v12 = vld [vmem:[#allocation4 + $0xc0] sm:$0xf] }
  0x25   :  { %411 = vmatpush.bf16.msrb.mxu2 %v3374_v25  ;;  %v3549_v11 = vor.u32 %v4408_v10, %v3548_v9  ;;  %v4383_v13 = vld [vmem:[#allocation4 + $0xcc] sm:$0xf0]  ;;  %v3479_v14 = vld [vmem:[#allocation4 + $0xc4] sm:$0xf]  ;;  %v4391_v16 = vld [vmem:[#allocation4 + $0xd0] sm:$0xf0] }
  0x26   :  { %313 = vmatpush.bf16.msra.mxu1 %v3341_v18  ;;  %493 = vmatpush.bf16.msrb.mxu3 %v3398_v27  ;;  %v3447_v15 = vor.u32 %v4383_v13, %v3446_v12  ;;  %v3512_v17 = vld [vmem:[#allocation4 + $0xc8] sm:$0xf]  ;;  %v4399_v18 = vld [vmem:[#allocation4 + $0xd4] sm:$0xf0]  ;;  %v3480_v20 = vor.u32 %v4391_v16, %v3479_v14  ;;  %v3544_v22 = vld [vmem:[#allocation4 + $0xcc] sm:$0xf] }
  0x27   :  { %219 = vmatpush.bf16.msra.mxu0 %v3292_v36  ;;  %v3513_v21 = vor.u32 %v4399_v18, %v3512_v17  ;;  %v4407_v24 = vld [vmem:[#allocation4 + $0xd8] sm:$0xf0]  ;;  %v3442_v26 = vld [vmem:[#allocation4 + $0xa0] sm:$0xf]  ;;  %v4382_v27 = vld [vmem:[#allocation4 + $0xac] sm:$0xf0] }
  0x28   :  { %v3545_v25 = vor.u32 %v4407_v24, %v3544_v22  ;;  %v3475_v28 = vld [vmem:[#allocation4 + $0xa4] sm:$0xf]  ;;  %v3443_v32 = vor.u32 %v4382_v27, %v3442_v26  ;;  %v4390_v33 = vld [vmem:[#allocation4 + $0xb0] sm:$0xf0]  ;;  %v3508_v34 = vld [vmem:[#allocation4 + $0xa8] sm:$0xf] }
  0x29   :  { %412 = vmatpush.bf16.msrb.mxu2 %v3370_v37  ;;  %v3476_v36 = vor.u32 %v4390_v33, %v3475_v28  ;;  %v4398_v37 = vld [vmem:[#allocation4 + $0xb4] sm:$0xf0]  ;;  %v4406_v39 = vld [vmem:[#allocation4 + $0xb8] sm:$0xf0]  ;;  %v3438_v43 = vld [vmem:[#allocation4 + $0x80] sm:$0xf] }
  0x2a   :  { %314 = vmatpush.bf16.msra.mxu1 %v3337_v31  ;;  %494 = vmatpush.bf16.msrb.mxu3 %v3394_v38  ;;  %v3540_v38 = vld [vmem:[#allocation4 + $0xac] sm:$0xf]  ;;  %v3509_v40 = vor.u32 %v4398_v37, %v3508_v34  ;;  %v4381_v44 = vld [vmem:[#allocation4 + $0x8c] sm:$0xf0]  ;;  %v3504_v47 = vld [vmem:[#allocation4 + $0x88] sm:$0xf] }
  0x2b   :  { %220 = vmatmul.bf16.vlgmr.msra.gmra.mxu0 %v4790_v50  ;;  %v3439_v45 = vor.u32 %v4381_v44, %v3438_v43  ;;  %v4405_v51 = vld [vmem:[#allocation4 + $0x98] sm:$0xf0]  ;;  %v3434_v54 = vld [vmem:[#allocation4 + $0x60] sm:$0xf]  ;;  %v4380_v55 = vld [vmem:[#allocation4 + $0x6c] sm:$0xf0] }
  0x2c   :  { %593 = vmatpush.bf16.msrb.mxu0 %v3451_v3  ;;  %v3532_v1 = vld [vmem:[#allocation4 + $0x6c] sm:$0xf]  ;;  %v3430_v9 = vld [vmem:[#allocation4 + $0x40] sm:$0xf]  ;;  %v4379_v10 = vld [vmem:[#allocation4 + $0x4c] sm:$0xf0] }
  0x2d   :  { %413 = vmatpush.bf16.msrb.mxu2 %v3366_v46  ;;  %v3471_v46 = vld [vmem:[#allocation4 + $0x84] sm:$0xf]  ;;  %v3431_v14 = vor.u32 %v4379_v10, %v3430_v9  ;;  %v3496_v16 = vld [vmem:[#allocation4 + $0x48] sm:$0xf]  ;;  %v4403_v22 = vld [vmem:[#allocation4 + $0x58] sm:$0xf0] }
  0x2e   :  { %315 = vmatpush.bf16.msra.mxu1 %v3333_v41  ;;  %495 = vmatpush.bf16.msrb.mxu3 %v3390_v23  ;;  %v3541_v41 = vor.u32 %v4406_v39, %v3540_v38  ;;  %v4389_v23 = vld [vmem:[#allocation4 + $0x90] sm:$0xf0]  ;;  %v3426_v26 = vld [vmem:[#allocation4 + $0x20] sm:$0xf]  ;;  %v4378_v27 = vld [vmem:[#allocation4 + $0x2c] sm:$0xf0] }
  0x2f   :  { %v3472_v48 = vor.u32 %v4389_v23, %v3471_v46  ;;  %v3427_v28 = vor.u32 %v4378_v27, %v3426_v26  ;;  %v4394_v33 = vld [vmem:[#allocation4 + $0x34] sm:$0xf0]  ;;  %v3524_v37 = vld [vmem:[#allocation4 + $0x2c] sm:$0xf]  ;;  %v4402_v38 = vld [vmem:[#allocation4 + $0x38] sm:$0xf0] }
  0x30   :  { %594 = vmatpush.bf16.msrb.mxu0 %v3447_v15  ;;  %v4387_v15 = vld [vmem:[#allocation4 + $0x50] sm:$0xf0]  ;;  %v3422_v39 = vld [vmem:[#allocation4] sm:$0xf]  ;;  %v3455_v43 = vld [vmem:[#allocation4 + $0x4] sm:$0xf] }
  0x31   :  { %496 = vmatmul.bf16.vlgmr.msrb.gmra.mxu3 %v4790_v50  ;;  %414 = vmatpush.bf16.msrb.mxu2 %v3362_v53  ;;  %v4385_v44 = vld [vmem:[#allocation4 + $0x10] sm:$0xf0]  ;;  %s3243_s14 = sshll.u32 %s4981_s5, 4  ;;  %s3244_s14 = int_to_ptr.hbm [resolvable:$true] %s3243_s14 }
  0x32   :  { %316 = vmatpush.bf16.msra.mxu1 %v3329_v49  ;;  %869 = vmatpush.bf16.msra.mxu3 %v3549_v11  ;;  %v4397_v49 = vld [vmem:[#allocation4 + $0x94] sm:$0xf0]  ;;  %v3463_v11 = vld [vmem:[#allocation4 + $0x44] sm:$0xf]  ;;  %v3456_v23 = vor.u32 %v4385_v44, %v3455_v43  ;;  %v4440_v43 = vld [vmem:[#allocation4 + $0xf8] sm:$0xf0] }
  0x33   :  { %v3505_v52 = vor.u32 %v4397_v49, %v3504_v47  ;;  %v3464_v18 = vor.u32 %v4387_v15, %v3463_v11  ;;  %v3488_v47 = vld [vmem:[#allocation4 + $0x8] sm:$0xf]  ;;  %v3520_v49 = vld [vmem:[#allocation4 + $0xc] sm:$0xf] }
  0x34   :  { %595 = vmatpush.bf16.msrb.mxu0 %v3443_v32  ;;  %v3492_v32 = vld [vmem:[#allocation4 + $0x28] sm:$0xf] }
  0x35   :  { %415 = vmatpush.bf16.msrb.mxu2 %v3358_v57 }
  0x36   :  { %317 = vmatpush.bf16.msra.mxu1 %v3325_v56  ;;  %870 = vmatpush.bf16.msra.mxu3 %v3545_v25  ;;  %v3467_v56 = vld [vmem:[#allocation4 + $0x64] sm:$0xf] }
  0x38   :  { %416 = vmatmul.bf16.vlgmr.msrb.gmra.mxu2 %v4790_v50  ;;  %596 = vmatpush.bf16.msrb.mxu0 %v3439_v45 }
  0x39   :  { %318 = vmatmul.bf16.vlgmr.msra.gmra.mxu1 %v4790_v50  ;;  %789 = vmatpush.bf16.msra.mxu2 %v3517_v8  ;;  %v3536_v50 = vld [vmem:[#allocation4 + $0x8c] sm:$0xf] }
  0x3a   :  { %691 = vmatpush.bf16.msrb.mxu1 %v3484_v7  ;;  %871 = vmatpush.bf16.msra.mxu3 %v3541_v41  ;;  %v3537_v53 = vor.u32 %v4405_v51, %v3536_v50  ;;  %v3525_v41 = vor.u32 %v4402_v38, %v3524_v37  ;;  %v4424_v37 = vld [vmem:[#allocation4 + $0xf0] sm:$0xf0]  ;;  %v3647_v38 = vld [vmem:[#allocation4 + $0xe8] sm:$0xf] }
  0x3d   :  { %790 = vmatpush.bf16.msra.mxu2 %v3513_v21 }
  0x3e   :  { %692 = vmatpush.bf16.msrb.mxu1 %v3480_v20  ;;  %872 = vmatpush.bf16.msra.mxu3 %v3537_v53  ;;  %v3528_v20 = vld [vmem:[#allocation4 + $0x4c] sm:$0xf]  ;;  %v4401_v53 = vld [vmem:[#allocation4 + $0x18] sm:$0xf0] }
  0x3f   :  { %v3529_v25 = vor.u32 %v4403_v22, %v3528_v20 }
  0x41   :  { %791 = vmatpush.bf16.msra.mxu2 %v3509_v40 }
  0x42   :  { %693 = vmatpush.bf16.msrb.mxu1 %v3476_v36  ;;  %v3493_v36 = vor.u32 %v4394_v33, %v3492_v32  ;;  %v3581_v33 = vld [vmem:[#allocation4 + $0xe0] sm:$0xf] }
  0x45   :  { %792 = vmatpush.bf16.msra.mxu2 %v3505_v52 }
  0x46   :  { %694 = vmatpush.bf16.msrb.mxu1 %v3472_v48  ;;  %v4393_v48 = vld [vmem:[#allocation4 + $0x14] sm:$0xf0] }
  0x47   :  { %v3489_v52 = vor.u32 %v4393_v48, %v3488_v47  ;;  %v4423_v48 = vld [vmem:[#allocation4 + $0xd0] sm:$0xf0] }
  0x8e   :  { %v100_v58 = vpop.f32.mrf.mxu1 }
  0x8f   :  { %143 = vst [vmem:[#allocation2] sm:$0xff] %v100_v58  ;;  %v3435_v58 = vor.u32 %v4380_v55, %v3434_v54 }
  0x91   :  { %597 = vmatpush.bf16.msrb.mxu0 %v3435_v58 }
  0x95   :  { %598 = vmatpush.bf16.msrb.mxu0 %v3431_v14 }
  0x96   :  { %v139_v59 = vpop.f32.mrf.mxu3  ;;  %v102_v60 = vpop.f32.mrf.mxu1  ;;  %v147_v30 = vld [vmem:[#allocation2] ss:$0 sm:$0xff] }
  0x97   :  { %146 = vst [vmem:[#allocation2 + $0x18] sm:$0xff] %v139_v59  ;;  %v4388_v59 = vld [vmem:[#allocation4 + $0x70] sm:$0xf0]  ;;  %v3500_v60 = vld [vmem:[#allocation4 + $0x68] sm:$0xf] }
  0x98   :  { %v3468_v63 = vor.u32 %v4388_v59, %v3467_v56  ;;  %v3521_v56 = vor.u32 %v4401_v53, %v3520_v49  ;;  %v3643_v49 = vld [vmem:[#allocation4 + $0xc8] sm:$0xf]  ;;  %v3675_v53 = vld [vmem:[#allocation4 + $0xcc] sm:$0xf] }
  0x99   :  { %599 = vmatpush.bf16.msrb.mxu0 %v3427_v28 }
  0x9a   :  { %695 = vmatpush.bf16.msrb.mxu1 %v3468_v63 }
  0x9b   :  { %v126_v61 = vpop.f32.mrf.mxu2 }
  0x9c   :  { %145 = vst [vmem:[#allocation2 + $0x10] sm:$0xff] %v126_v61  ;;  %v4396_v61 = vld [vmem:[#allocation4 + $0x74] sm:$0xf0] }
  0x9d   :  { %v3501_v0 = vor.u32 %v4396_v61, %v3500_v60 }
  0x9e   :  { %v141_v62 = vpop.f32.mrf.mxu3  ;;  %v113_v2 = vpop.f32.mrf.mxu1  ;;  %696 = vmatpush.bf16.msrb.mxu1 %v3464_v18 }
  0x9f   :  { %144 = vst [vmem:[#allocation2 + $0x8] sm:$0xff] %v113_v2  ;;  %v423_v62 = vld [vmem:[#allocation2 + $0x18] ss:$0 sm:$0xff]  ;;  %v4404_v2 = vld [vmem:[#allocation4 + $0x78] sm:$0xf0]  ;;  %793 = vmatpush.bf16.msra.mxu2 %v3501_v0 }
  0xa0   :  { %v3533_v5 = vor.u32 %v4404_v2, %v3532_v1 }
  0xa2   :  { %873 = vmatpush.bf16.msra.mxu3 %v3533_v5 }
  0xa3   :  { %v128_v19 = vpop.f32.mrf.mxu2  ;;  %v343_v59 = vld [vmem:[#allocation2 + $0x10] ss:$0 sm:$0xff] }
  0xa4   :  { %v4395_v19 = vld [vmem:[#allocation4 + $0x54] sm:$0xf0] }
  0xa5   :  { %v3497_v24 = vor.u32 %v4395_v19, %v3496_v16 }
  0xa6   :  { %v115_v29 = vpop.f32.mrf.mxu1  ;;  %v245_v3 = vld [vmem:[#allocation2 + $0x8] ss:$0 sm:$0xff]  ;;  %874 = vmatpush.bf16.msra.mxu3 %v3529_v25 }
  0xa7   :  { %v3459_v29 = vld [vmem:[#allocation4 + $0x24] sm:$0xf]  ;;  %794 = vmatpush.bf16.msra.mxu2 %v3497_v24 }
  0xa8   :  { %v221_v31 = vpop.f32.mrf.mxu0 }
  0xa9   :  { %v225_v35 = vadd.f32 %v221_v31, %v147_v30  ;;  %v4386_v30 = vld [vmem:[#allocation4 + $0x30] sm:$0xf0] }
  0xaa   :  { %v3460_v31 = vor.u32 %v4386_v30, %v3459_v29  ;;  %875 = vmatpush.bf16.msra.mxu3 %v3525_v41 }
  0xab   :  { %v3321_v42 = vmul.f32 -1.442695, %v225_v35  ;;  %795 = vmatpush.bf16.msra.mxu2 %v3493_v36 }
  0xac   :  { %697 = vmatpush.bf16.msrb.mxu1 %v3460_v31 }
  0xad   :  { %4607 = vpow2.f32 %v3321_v42  ;;  %v4377_v42 = vld [vmem:[#allocation4 + $0xc] sm:$0xf0] }
  0xae   :  { %v3423_v46 = vor.u32 %v4377_v42, %v3422_v39  ;;  %876 = vmatpush.bf16.msra.mxu3 %v3521_v56  ;;  %v4432_v39 = vld [vmem:[#allocation4 + $0xf4] sm:$0xf0]  ;;  %v3679_v42 = vld [vmem:[#allocation4 + $0xec] sm:$0xf]  ;;  %v3573_v56 = vld [vmem:[#allocation4 + $0xa0] sm:$0xf] }
  0xaf   :  { %796 = vmatpush.bf16.msra.mxu2 %v3489_v52  ;;  %v3648_v41 = vor.u32 %v4432_v39, %v3647_v38  ;;  %v3680_v44 = vor.u32 %v4440_v43, %v3679_v42  ;;  %v3594_v38 = vld [vmem:[#allocation4 + $0x44] sm:$0xf]  ;;  %v4427_v42 = vld [vmem:[#allocation4 + $0x54] sm:$0xf0] }
  0xb0   :  { %v223_v57 = vpop.f32.mrf.mxu0  ;;  %600 = vmatpush.bf16.msrb.mxu0 %v3423_v46  ;;  %698 = vmatpush.bf16.msrb.mxu1 %v3456_v23  ;;  %v4415_v46 = vld [vmem:[#allocation4 + $0xcc] sm:$0xf0]  ;;  %v3610_v23 = vld [vmem:[#allocation4 + $0xc4] sm:$0xf] }
  0xb2   :  { %1250 = vmatpush.bf16.msrb.mxu3 %v3680_v44 }
  0xb3   :  { %v4608_v6 = vpop.eup %4607  ;;  %1170 = vmatpush.bf16.msrb.mxu2 %v3648_v41  ;;  %v3627_v41 = vld [vmem:[#allocation4 + $0x48] sm:$0xf] }
  0xb4   :  { %v497_v8 = vpop.f32.mrf.mxu3  ;;  %v4886_v12 = vadd.f32 1.0, %v4608_v6 }
  0xb5   :  { %v501_v13 = vadd.f32 %v497_v8, %v423_v62 }
  0xb6   :  { %v319_v4 = vpop.f32.mrf.mxu1  ;;  %4609 = vrcp.f32 %v4886_v12  ;;  %vm235_vm2 = vweird.f32 %v4886_v12  ;;  %v239_v6 = vand.u32 2147483647, %v4886_v12 }
  0xb7   :  { %v323_v7 = vadd.f32 %v319_v4, %v245_v3  ;;  %v3419_v21 = vmul.f32 -1.442695, %v501_v13  ;;  %v241_v4 = vand.u32 2147483648, %v4886_v12 }
  0xb8   :  { %vm240_vm6 = vcmp.eq.f32.partialorder %v239_v6, 8.507059e+37  ;;  %v3602_v6 = vld [vmem:[#allocation4 + $0x84] sm:$0xf] }
  0xb9   :  { %v3354_v17 = vmul.f32 -1.442695, %v323_v7  ;;  %v242_v13 = vor.u32 1.1754944e-38, %v241_v4  ;;  %v3569_v4 = vld [vmem:[#allocation4 + $0x80] sm:$0xf] }
  0xbb   :  { %4611 = vpow2.f32 %v3354_v17  ;;  %v417_v35 = vpop.f32.mrf.mxu2 }
  0xbc   :  { %4613 = vpow2.f32 %v3419_v21  ;;  %v499_v40 = vpop.f32.mrf.mxu3  ;;  %v4610_v45 = vpop.eup %4609  ;;  %v421_v62 = vadd.f32 %v417_v35, %v343_v59  ;;  %v3614_v35 = vld [vmem:[#allocation4 + $0xe4] sm:$0xf] }
  0xbd   :  { %v231_v51 = vmul.f32 %v4610_v45, %v4886_v12  ;;  %vm236_vm1 = vweird.f32 %v4610_v45  ;;  %v3615_v40 = vor.u32 %v4424_v37, %v3614_v35  ;;  %v4411_v37 = vld [vmem:[#allocation4 + $0x4c] sm:$0xf0] }
  0xbe   :  { %v321_v34 = vpop.f32.mrf.mxu1  ;;  %vm237_vm3 = vmor %vm235_vm2, %vm236_vm1 }
  0xbf   :  { %v232_v57 = vsub.f32 1.0, %v231_v51  ;;  %v4416_v34 = vld [vmem:[#allocation4 + $0xec] sm:$0xf0]  ;;  %1072 = vmatpush.bf16.msra.mxu1 %v3615_v40  ;;  %v3611_v51 = vor.u32 %v4423_v48, %v3610_v23  ;;  %v4419_v40 = vld [vmem:[#allocation4 + $0x50] sm:$0xf0] }
  0xc0   :  { %v3582_v36 = vor.u32 %v4416_v34, %v3581_v33  ;;  %v3659_v23 = vld [vmem:[#allocation4 + $0x4c] sm:$0xf]  ;;  %v3557_v48 = vld [vmem:[#allocation4 + $0x20] sm:$0xf] }
  0xc1   :  { %v4612_v50 = vpop.eup %4611  ;;  %v233_v61 = vmul.f32 %v4610_v45, %v232_v57  ;;  %v4414_v57 = vld [vmem:[#allocation4 + $0xac] sm:$0xf0] }
  0xc2   :  { %v4614_v54 = vpop.eup %4613  ;;  %v327_v55 = vadd.f32 1.0, %v4612_v50  ;;  %974 = vmatpush.bf16.msra.mxu0 %v3582_v36  ;;  %v4431_v50 = vld [vmem:[#allocation4 + $0xd4] sm:$0xf0]  ;;  %v3574_v59 = vor.u32 %v4414_v57, %v3573_v56  ;;  %v3561_v36 = vld [vmem:[#allocation4 + $0x40] sm:$0xf] }
  0xc3   :  { %v505_v58 = vadd.f32 1.0, %v4614_v54  ;;  %v419_v60 = vpop.f32.mrf.mxu2  ;;  %v234_v2 = vadd.f32 %v4610_v45, %v233_v61  ;;  %v3644_v52 = vor.u32 %v4431_v50, %v3643_v49  ;;  %v4439_v54 = vld [vmem:[#allocation4 + $0xd8] sm:$0xf0]  ;;  %1073 = vmatpush.bf16.msra.mxu1 %v3611_v51  ;;  %v3639_v61 = vld [vmem:[#allocation4 + $0xa8] sm:$0xf]  ;;  %v3562_v39 = vor.u32 %v4411_v37, %v3561_v36 }
  0xc4   :  { %4615 = vrcp.f32 %v327_v55  ;;  %v339_v7 = vand.u32 2147483648, %v327_v55  ;;  %v337_v10 = vand.u32 2147483647, %v327_v55  ;;  %vm333_vm5 = vweird.f32 %v327_v55  ;;  %v4422_v60 = vld [vmem:[#allocation4 + $0xb0] sm:$0xf0] }
  0xc5   :  { %4617 = vrcp.f32 %v505_v58  ;;  %v238_v9 = vsel %vm237_vm3, %v4610_v45, %v234_v2  ;;  %v517_v25 = vand.u32 2147483648, %v505_v58  ;;  %vm511_vm10 = vweird.f32 %v505_v58  ;;  %v3577_v45 = vld [vmem:[#allocation4 + $0xc0] sm:$0xf]  ;;  %1171 = vmatpush.bf16.msrb.mxu2 %v3644_v52  ;;  %v4438_v2 = vld [vmem:[#allocation4 + $0xb8] sm:$0xf0] }
  0xc6   :  { %4619 = vtanh.f32 %v421_v62  ;;  %v340_v16 = vor.u32 1.1754944e-38, %v339_v7  ;;  %v243_v17 = vsel %vm240_vm6, %v242_v13, %v238_v9  ;;  %vm338_vm8 = vcmp.eq.f32.partialorder %v337_v10, 8.507059e+37  ;;  %v4430_v62 = vld [vmem:[#allocation4 + $0xb4] sm:$0xf0]  ;;  %v3635_v9 = vld [vmem:[#allocation4 + $0x88] sm:$0xf] }
  0xc7   :  { %v515_v26 = vand.u32 2147483647, %v505_v58  ;;  %v518_v28 = vor.u32 1.1754944e-38, %v517_v25  ;;  %v3578_v47 = vor.u32 %v4415_v46, %v3577_v45  ;;  %v4429_v10 = vld [vmem:[#allocation4 + $0x94] sm:$0xf0]  ;;  %v3595_v45 = vor.u32 %v4419_v40, %v3594_v38 }
  0xc8   :  { %v3636_v13 = vor.u32 %v4429_v10, %v3635_v9  ;;  %v3628_v46 = vor.u32 %v4427_v42, %v3627_v41  ;;  %v4410_v49 = vld [vmem:[#allocation4 + $0x2c] sm:$0xf0]  ;;  %v4426_v57 = vld [vmem:[#allocation4 + $0x34] sm:$0xf0] }
  0xc9   :  { %vm516_vm12 = vcmp.eq.f32.partialorder %v515_v26, 8.507059e+37  ;;  %975 = vmatpush.bf16.msra.mxu0 %v3578_v47  ;;  %v4435_v47 = vld [vmem:[#allocation4 + $0x58] sm:$0xf0]  ;;  %v804_v50 = vld [vmem:[#allocation2 + $0x19] ss:$0 sm:$0xff]  ;;  %v3558_v52 = vor.u32 %v4410_v49, %v3557_v48 }
  0xca   :  { %v4616_v63 = vpop.eup %4615  ;;  %v3660_v51 = vor.u32 %v4435_v47, %v3659_v23  ;;  %v4425_v9 = vld [vmem:[#allocation4 + $0x14] sm:$0xf0] }
  0xcb   :  { %v4618_v0 = vpop.eup %4617  ;;  %v329_v1 = vmul.f32 %v4616_v63, %v327_v55  ;;  %vm334_vm4 = vweird.f32 %v4616_v63  ;;  %v3676_v55 = vor.u32 %v4439_v54, %v3675_v53  ;;  %v3590_v53 = vld [vmem:[#allocation4 + $0x24] sm:$0xf]  ;;  %v4418_v54 = vld [vmem:[#allocation4 + $0x30] sm:$0xf0] }
  0xcc   :  { %v507_v3 = vmul.f32 %v4618_v0, %v505_v58  ;;  %v4620_v15 = vpop.eup %4619  ;;  %vm335_vm7 = vmor %vm333_vm5, %vm334_vm4  ;;  %vm512_vm9 = vweird.f32 %v4618_v0  ;;  %v3606_v58 = vld [vmem:[#allocation4 + $0xa4] sm:$0xf]  ;;  %v3591_v56 = vor.u32 %v4418_v54, %v3590_v53 }
  0xcd   :  { %v330_v5 = vsub.f32 1.0, %v329_v1  ;;  %v522_v21 = vmul.f32 %v4620_v15, %v243_v17  ;;  %vm513_vm11 = vmor %vm511_vm10, %vm512_vm9  ;;  %1251 = vmatpush.bf16.msrb.mxu3 %v3676_v55  ;;  %v3671_v1 = vld [vmem:[#allocation4 + $0xac] sm:$0xf]  ;;  %976 = vmatpush.bf16.msra.mxu0 %v3574_v59  ;;  %v4437_v15 = vld [vmem:[#allocation4 + $0x98] sm:$0xf0] }
  0xce   :  { %v508_v11 = vsub.f32 1.0, %v507_v3  ;;  %v3672_v3 = vor.u32 %v4438_v2, %v3671_v1  ;;  %v3565_v17 = vld [vmem:[#allocation4 + $0x60] sm:$0xf]  ;;  %v3623_v55 = vld [vmem:[#allocation4 + $0x28] sm:$0xf] }
  0xcf   :  { %v331_v8 = vmul.f32 %v4616_v63, %v330_v5  ;;  %v4413_v5 = vld [vmem:[#allocation4 + $0x8c] sm:$0xf0]  ;;  %v4434_v59 = vld [vmem:[#allocation4 + $0x38] sm:$0xf0]  ;;  %v3586_v2 = vld [vmem:[#allocation4 + $0x4] sm:$0xf] }
  0xd0   :  { %v509_v19 = vmul.f32 %v4618_v0, %v508_v11  ;;  %v3570_v7 = vor.u32 %v4413_v5, %v3569_v4  ;;  %v4409_v1 = vld [vmem:[#allocation4 + $0xc] sm:$0xf0] }
  0xd1   :  { %v332_v14 = vadd.f32 %v4616_v63, %v331_v8  ;;  %1252 = vmatpush.bf16.msrb.mxu3 %v3672_v3  ;;  %v4421_v8 = vld [vmem:[#allocation4 + $0x90] sm:$0xf0] }
  0xd2   :  { %v510_v24 = vadd.f32 %v4618_v0, %v509_v19  ;;  %v3603_v11 = vor.u32 %v4421_v8, %v3602_v6  ;;  %977 = vmatpush.bf16.msra.mxu0 %v3570_v7  ;;  %v3598_v19 = vld [vmem:[#allocation4 + $0x64] sm:$0xf]  ;;  %v4417_v7 = vld [vmem:[#allocation4 + $0x10] sm:$0xf0]  ;;  %v3619_v8 = vld [vmem:[#allocation4 + $0x8] sm:$0xf] }
  0xd3   :  { %v336_v18 = vsel %vm335_vm7, %v4616_v63, %v332_v14  ;;  %v3607_v63 = vor.u32 %v4422_v60, %v3606_v58  ;;  %v3667_v14 = vld [vmem:[#allocation4 + $0x8c] sm:$0xf]  ;;  %v3587_v10 = vor.u32 %v4417_v7, %v3586_v2 }
  0xd4   :  { %v341_v20 = vsel %vm338_vm8, %v340_v16, %v336_v18  ;;  %v514_v27 = vsel %vm513_vm11, %v4618_v0, %v510_v24  ;;  %v3640_v0 = vor.u32 %v4430_v62, %v3639_v61  ;;  %v3668_v16 = vor.u32 %v4437_v15, %v3667_v14  ;;  %v4412_v18 = vld [vmem:[#allocation4 + $0x6c] sm:$0xf0]  ;;  %v4428_v24 = vld [vmem:[#allocation4 + $0x74] sm:$0xf0]  ;;  %v3655_v58 = vld [vmem:[#allocation4 + $0x2c] sm:$0xf] }
  0xd5   :  { %v521_v12 = vmul.f32 0.0, %v341_v20  ;;  %v519_v30 = vsel %vm516_vm12, %v518_v28, %v514_v27  ;;  %1074 = vmatpush.bf16.msra.mxu1 %v3607_v63  ;;  %v3566_v20 = vor.u32 %v4412_v18, %v3565_v17  ;;  %v3663_v27 = vld [vmem:[#allocation4 + $0x6c] sm:$0xf]  ;;  %v4436_v28 = vld [vmem:[#allocation4 + $0x78] sm:$0xf0]  ;;  %v3624_v62 = vor.u32 %v4426_v57, %v3623_v55 }
  0xd6   :  { %1172 = vmatpush.bf16.msrb.mxu2 %v3640_v0  ;;  %1253 = vmatpush.bf16.msrb.mxu3 %v3668_v16  ;;  %v3664_v33 = vor.u32 %v4436_v28, %v3663_v27  ;;  %v3656_v63 = vor.u32 %v4434_v59, %v3655_v58  ;;  %v3553_v0 = vld [vmem:[#allocation4] sm:$0xf]  ;;  %v4433_v14 = vld [vmem:[#allocation4 + $0x18] sm:$0xf0] }
  0xd7   :  { %v4893_v22 = vadd.f32 %v522_v21, %v521_v12  ;;  %v4420_v12 = vld [vmem:[#allocation4 + $0x70] sm:$0xf0]  ;;  %v3631_v21 = vld [vmem:[#allocation4 + $0x68] sm:$0xf]  ;;  %978 = vmatpush.bf16.msra.mxu0 %v3566_v20  ;;  %v3554_v6 = vor.u32 %v4409_v1, %v3553_v0  ;;  %v4448_v0 = vld [vmem:[#allocation4 + $0xec] sm:$0xf0] }
  0xd8   :  { %v3599_v25 = vor.u32 %v4420_v12, %v3598_v19  ;;  %v3632_v26 = vor.u32 %v4428_v24, %v3631_v21  ;;  %v3745_v1 = vld [vmem:[#allocation4 + $0xe4] sm:$0xf] }
  0xd9   :  { %4621 = vtanh.f32 %v4893_v22  ;;  %1075 = vmatpush.bf16.msra.mxu1 %v3603_v11  ;;  %v3620_v11 = vor.u32 %v4425_v9, %v3619_v8  ;;  %v3810_v8 = vld [vmem:[#allocation4 + $0xec] sm:$0xf]  ;;  %v4472_v9 = vld [vmem:[#allocation4 + $0xf8] sm:$0xf0] }
  0xda   :  { %1173 = vmatpush.bf16.msrb.mxu2 %v3636_v13  ;;  %1254 = vmatpush.bf16.msrb.mxu3 %v3664_v33  ;;  %v3651_v13 = vld [vmem:[#allocation4 + $0xc] sm:$0xf] }
  0xdb   :  { %979 = vmatpush.bf16.msra.mxu0 %v3562_v39  ;;  %v3652_v17 = vor.u32 %v4433_v14, %v3651_v13  ;;  %v4447_v13 = vld [vmem:[#allocation4 + $0xcc] sm:$0xf0]  ;;  %v3741_v14 = vld [vmem:[#allocation4 + $0xc4] sm:$0xf] }
  0xdd   :  { %1076 = vmatpush.bf16.msra.mxu1 %v3599_v25  ;;  %v724_v25 = vld [vmem:[#allocation2 + $0x11] ss:$0 sm:$0xff] }
  0xde   :  { %1174 = vmatpush.bf16.msrb.mxu2 %v3632_v26  ;;  %1255 = vmatpush.bf16.msrb.mxu3 %v3660_v51 }
  0xdf   :  { %v4622_v29 = vpop.eup %4621  ;;  %980 = vmatpush.bf16.msra.mxu0 %v3558_v52 }
  0xe0   :  { %v525_v31 = vmul.f32 %v4622_v29, %v519_v30  ;;  %v528_v29 = vld [vmem:[#allocation2 + $0x1] ss:$0 sm:$0xff] }
  0xe1   :  { %1077 = vmatpush.bf16.msra.mxu1 %v3595_v45 }
  0xe2   :  { %526 = vst [vmem:[#allocation3] sm:$0x1] %v525_v31  ;;  %v527_v32 = vpack.c.bf16 %v525_v31, %v525_v31  ;;  %v626_v31 = vld [vmem:[#allocation2 + $0x9] ss:$0 sm:$0xff]  ;;  %1175 = vmatpush.bf16.msrb.mxu2 %v3628_v46  ;;  %1256 = vmatpush.bf16.msrb.mxu3 %v3656_v63 }
  0xe3   :  { %981 = vmatpush.bf16.msra.mxu0 %v3554_v6 }
  0xe4   :  { %601 = vmatmul.bf16.vlgmr.msrb.gmra.mxu0 %v527_v32  ;;  %699 = vmatmul.bf16.vlgmr.msrb.gmra.mxu1 %v527_v32 }
  0xe5   :  { %797 = vmatmul.bf16.vlgmr.msra.gmra.mxu2 %v527_v32  ;;  %877 = vmatmul.bf16.vlgmr.msra.gmra.mxu3 %v527_v32 }
  0xe6   :  { %1078 = vmatpush.bf16.msra.mxu1 %v3591_v56  ;;  %1176 = vmatpush.bf16.msrb.mxu2 %v3624_v62 }
  0xe7   :  { %1257 = vmatpush.bf16.msrb.mxu3 %v3652_v17  ;;  %v3774_v17 = vld [vmem:[#allocation4 + $0xc8] sm:$0xf] }
  0xea   :  { %1079 = vmatpush.bf16.msra.mxu1 %v3587_v10  ;;  %1177 = vmatpush.bf16.msrb.mxu2 %v3620_v11  ;;  %v3811_v10 = vor.u32 %v4472_v9, %v3810_v8  ;;  %v3708_v11 = vld [vmem:[#allocation4 + $0xc0] sm:$0xf]  ;;  %v4459_v8 = vld [vmem:[#allocation4 + $0x54] sm:$0xf0] }
  0xec   :  { %1631 = vmatpush.bf16.msra.mxu3 %v3811_v10 }
 0x161   :  { %v602_v30 = vpop.f32.mrf.mxu0  ;;  %v700_v32 = vpop.f32.mrf.mxu1 }
 0x162   :  { %v606_v34 = vadd.f32 %v602_v30, %v528_v29  ;;  %v704_v35 = vadd.f32 %v700_v32, %v626_v31 }
 0x164   :  { %v3452_v43 = vmul.f32 -1.442695, %v606_v34  ;;  %v3485_v44 = vmul.f32 -1.442695, %v704_v35 }
 0x166   :  { %4623 = vpow2.f32 %v3452_v43 }
 0x167   :  { %4625 = vpow2.f32 %v3485_v44 }
 0x168   :  { %v798_v60 = vpop.f32.mrf.mxu2  ;;  %v878_v61 = vpop.f32.mrf.mxu3 }
 0x169   :  { %v882_v3 = vadd.f32 %v878_v61, %v804_v50  ;;  %v604_v4 = vpop.f32.mrf.mxu0  ;;  %v702_v5 = vpop.f32.mrf.mxu1  ;;  %v802_v28 = vadd.f32 %v798_v60, %v724_v25  ;;  %v3704_v25 = vld [vmem:[#allocation4 + $0xa0] sm:$0xf] }
 0x16a   :  { %v3778_v4 = vld [vmem:[#allocation4 + $0xe8] sm:$0xf]  ;;  %v4464_v5 = vld [vmem:[#allocation4 + $0xf4] sm:$0xf0] }
 0x16b   :  { %v3550_v15 = vmul.f32 -1.442695, %v882_v3  ;;  %v4456_v3 = vld [vmem:[#allocation4 + $0xf0] sm:$0xf0]  ;;  %v3779_v7 = vor.u32 %v4464_v5, %v3778_v4  ;;  %v3725_v4 = vld [vmem:[#allocation4 + $0x44] sm:$0xf] }
 0x16c   :  { %v4624_v16 = vpop.eup %4623  ;;  %v3746_v6 = vor.u32 %v4456_v3, %v3745_v1  ;;  %v4443_v3 = vld [vmem:[#allocation4 + $0x4c] sm:$0xf0] }
 0x16d   :  { %v4626_v18 = vpop.eup %4625  ;;  %v610_v19 = vadd.f32 1.0, %v4624_v16  ;;  %4627 = vpow2.f32 %v3550_v15  ;;  %1551 = vmatpush.bf16.msra.mxu2 %v3779_v7  ;;  %v3709_v15 = vor.u32 %v4447_v13, %v3708_v11  ;;  %v4455_v16 = vld [vmem:[#allocation4 + $0xd0] sm:$0xf0]  ;;  %v3758_v7 = vld [vmem:[#allocation4 + $0x48] sm:$0xf] }
 0x16e   :  { %v708_v20 = vadd.f32 1.0, %v4626_v18  ;;  %1453 = vmatpush.bf16.msrb.mxu1 %v3746_v6  ;;  %v4463_v18 = vld [vmem:[#allocation4 + $0xd4] sm:$0xf0]  ;;  %v4451_v6 = vld [vmem:[#allocation4 + $0x50] sm:$0xf0]  ;;  %v3759_v13 = vor.u32 %v4459_v8, %v3758_v7 }
 0x16f   :  { %4629 = vrcp.f32 %v610_v19  ;;  %v622_v34 = vand.u32 2147483648, %v610_v19  ;;  %v620_v37 = vand.u32 2147483647, %v610_v19  ;;  %vm616_vm15 = vweird.f32 %v610_v19 }
 0x170   :  { %4631 = vrcp.f32 %v708_v20  ;;  %v800_v12 = vpop.f32.mrf.mxu2  ;;  %v880_v21 = vpop.f32.mrf.mxu3  ;;  %v720_v35 = vand.u32 2147483648, %v708_v20  ;;  %v718_v39 = vand.u32 2147483647, %v708_v20  ;;  %vm714_vm1 = vweird.f32 %v708_v20 }
 0x171   :  { %v623_v42 = vor.u32 1.1754944e-38, %v622_v34  ;;  %vm621_vm4 = vcmp.eq.f32.partialorder %v620_v37, 8.507059e+37  ;;  %v3806_v12 = vld [vmem:[#allocation4 + $0xcc] sm:$0xf]  ;;  %v4471_v21 = vld [vmem:[#allocation4 + $0xd8] sm:$0xf0]  ;;  %v3726_v11 = vor.u32 %v4451_v6, %v3725_v4 }
 0x172   :  { %v721_v45 = vor.u32 1.1754944e-38, %v720_v35  ;;  %vm719_vm5 = vcmp.eq.f32.partialorder %v718_v39, 8.507059e+37  ;;  %v3802_v34 = vld [vmem:[#allocation4 + $0xac] sm:$0xf]  ;;  %v4470_v35 = vld [vmem:[#allocation4 + $0xb8] sm:$0xf0] }
 0x173   :  { %v4628_v24 = vpop.eup %4627  ;;  %v3700_v37 = vld [vmem:[#allocation4 + $0x80] sm:$0xf]  ;;  %v3733_v39 = vld [vmem:[#allocation4 + $0x84] sm:$0xf] }
 0x174   :  { %v886_v26 = vadd.f32 1.0, %v4628_v24  ;;  %v3807_v24 = vor.u32 %v4471_v21, %v3806_v12  ;;  %v3721_v12 = vld [vmem:[#allocation4 + $0x24] sm:$0xf]  ;;  %v4450_v21 = vld [vmem:[#allocation4 + $0x30] sm:$0xf0] }
 0x175   :  { %v4630_v27 = vpop.eup %4629 }
 0x176   :  { %v4632_v29 = vpop.eup %4631  ;;  %v612_v30 = vmul.f32 %v4630_v27, %v610_v19  ;;  %4633 = vrcp.f32 %v886_v26  ;;  %vm617_vm13 = vweird.f32 %v4630_v27  ;;  %v898_v56 = vand.u32 2147483648, %v886_v26  ;;  %1632 = vmatpush.bf16.msra.mxu3 %v3807_v24  ;;  %v3754_v24 = vld [vmem:[#allocation4 + $0x28] sm:$0xf] }
 0x177   :  { %v710_v31 = vmul.f32 %v4632_v29, %v708_v20  ;;  %4635 = vtanh.f32 %v802_v28  ;;  %vm715_vm14 = vweird.f32 %v4632_v29  ;;  %vm618_vm2 = vmor %vm616_vm15, %vm617_vm13  ;;  %vm892_vm7 = vweird.f32 %v886_v26 }
 0x178   :  { %v613_v32 = vsub.f32 1.0, %v612_v30  ;;  %vm716_vm3 = vmor %vm714_vm1, %vm715_vm14  ;;  %v896_v57 = vand.u32 2147483647, %v886_v26  ;;  %v899_v59 = vor.u32 1.1754944e-38, %v898_v56  ;;  %v3742_v19 = vor.u32 %v4455_v16, %v3741_v14  ;;  %v3770_v30 = vld [vmem:[#allocation4 + $0xa8] sm:$0xf] }
 0x179   :  { %v711_v33 = vsub.f32 1.0, %v710_v31  ;;  %v3775_v20 = vor.u32 %v4463_v18, %v3774_v17  ;;  %v4462_v31 = vld [vmem:[#allocation4 + $0xb4] sm:$0xf0]  ;;  %v3790_v14 = vld [vmem:[#allocation4 + $0x4c] sm:$0xf] }
 0x17a   :  { %v614_v36 = vmul.f32 %v4630_v27, %v613_v32  ;;  %vm897_vm9 = vcmp.eq.f32.partialorder %v896_v57, 8.507059e+37  ;;  %1454 = vmatpush.bf16.msrb.mxu1 %v3742_v19  ;;  %v3688_v16 = vld [vmem:[#allocation4 + $0x20] sm:$0xf]  ;;  %v4442_v17 = vld [vmem:[#allocation4 + $0x2c] sm:$0xf0] }
 0x17b   :  { %v712_v38 = vmul.f32 %v4632_v29, %v711_v33  ;;  %1552 = vmatpush.bf16.msra.mxu2 %v3775_v20  ;;  %v3771_v33 = vor.u32 %v4462_v31, %v3770_v30  ;;  %v1185_v18 = vld [vmem:[#allocation2 + $0x1a] ss:$0 sm:$0xff]  ;;  %v3689_v20 = vor.u32 %v4442_v17, %v3688_v16 }
 0x17c   :  { %v4634_v40 = vpop.eup %4633  ;;  %v615_v41 = vadd.f32 %v4630_v27, %v614_v36  ;;  %v3803_v36 = vor.u32 %v4470_v35, %v3802_v34  ;;  %v4441_v34 = vld [vmem:[#allocation4 + $0xc] sm:$0xf0]  ;;  %v3717_v35 = vld [vmem:[#allocation4 + $0x4] sm:$0xf] }
 0x17d   :  { %v713_v43 = vadd.f32 %v4632_v29, %v712_v38  ;;  %v888_v44 = vmul.f32 %v4634_v40, %v886_v26  ;;  %v4636_v23 = vpop.eup %4635  ;;  %vm893_vm6 = vweird.f32 %v4634_v40  ;;  %v4446_v26 = vld [vmem:[#allocation4 + $0xac] sm:$0xf0] }
 0x17e   :  { %v619_v46 = vsel %vm618_vm2, %v4630_v27, %v615_v41  ;;  %vm894_vm8 = vmor %vm892_vm7, %vm893_vm6  ;;  %v3737_v27 = vld [vmem:[#allocation4 + $0xa4] sm:$0xf]  ;;  %v3705_v28 = vor.u32 %v4446_v26, %v3704_v25  ;;  %v4445_v38 = vld [vmem:[#allocation4 + $0x8c] sm:$0xf0]  ;;  %1633 = vmatpush.bf16.msra.mxu3 %v3803_v36  ;;  %v3722_v25 = vor.u32 %v4450_v21, %v3721_v12 }
 0x17f   :  { %v624_v47 = vsel %vm621_vm4, %v623_v42, %v619_v46  ;;  %v717_v48 = vsel %vm716_vm3, %v4632_v29, %v713_v43  ;;  %v889_v49 = vsub.f32 1.0, %v888_v44  ;;  %v4454_v29 = vld [vmem:[#allocation4 + $0xb0] sm:$0xf0]  ;;  %1553 = vmatpush.bf16.msra.mxu2 %v3771_v33  ;;  %v3766_v42 = vld [vmem:[#allocation4 + $0x88] sm:$0xf] }
 0x180   :  { %v722_v50 = vsel %vm719_vm5, %v721_v45, %v717_v48  ;;  %v903_v51 = vmul.f32 %v4636_v23, %v624_v47  ;;  %v3738_v32 = vor.u32 %v4454_v29, %v3737_v27  ;;  %v4453_v41 = vld [vmem:[#allocation4 + $0x90] sm:$0xf0]  ;;  %v4461_v43 = vld [vmem:[#allocation4 + $0x94] sm:$0xf0]  ;;  %v3798_v46 = vld [vmem:[#allocation4 + $0x8c] sm:$0xf] }
 0x181   :  { %v902_v52 = vmul.f32 %v722_v50, %v4893_v22  ;;  %v890_v53 = vmul.f32 %v4634_v40, %v889_v49  ;;  %v3712_v22 = vld [vmem:[#allocation4 + $0xe0] sm:$0xf]  ;;  %v3734_v44 = vor.u32 %v4453_v41, %v3733_v39  ;;  %v3767_v45 = vor.u32 %v4461_v43, %v3766_v42  ;;  %v4469_v23 = vld [vmem:[#allocation4 + $0x98] sm:$0xf0]  ;;  %v4444_v49 = vld [vmem:[#allocation4 + $0x6c] sm:$0xf0] }
 0x182   :  { %v3713_v2 = vor.u32 %v4448_v0, %v3712_v22  ;;  %1455 = vmatpush.bf16.msrb.mxu1 %v3738_v32  ;;  %v3799_v47 = vor.u32 %v4469_v23, %v3798_v46  ;;  %v3696_v48 = vld [vmem:[#allocation4 + $0x60] sm:$0xf]  ;;  %v3729_v50 = vld [vmem:[#allocation4 + $0x64] sm:$0xf]  ;;  %v4458_v26 = vld [vmem:[#allocation4 + $0x34] sm:$0xf0] }
 0x183   :  { %v4897_v54 = vadd.f32 %v903_v51, %v902_v52  ;;  %v891_v55 = vadd.f32 %v4634_v40, %v890_v53  ;;  %1554 = vmatpush.bf16.msra.mxu2 %v3767_v45  ;;  %v3697_v51 = vor.u32 %v4444_v49, %v3696_v48  ;;  %v4452_v52 = vld [vmem:[#allocation4 + $0x70] sm:$0xf0]  ;;  %v3762_v53 = vld [vmem:[#allocation4 + $0x68] sm:$0xf]  ;;  %v3786_v27 = vld [vmem:[#allocation4 + $0x2c] sm:$0xf]  ;;  %v3755_v31 = vor.u32 %v4458_v26, %v3754_v24 }
 0x184   :  { %1355 = vmatpush.bf16.msrb.mxu0 %v3713_v2  ;;  %1634 = vmatpush.bf16.msra.mxu3 %v3799_v47  ;;  %v3730_v56 = vor.u32 %v4452_v52, %v3729_v50  ;;  %v3692_v2 = vld [vmem:[#allocation4 + $0x40] sm:$0xf]  ;;  %v3750_v41 = vld [vmem:[#allocation4 + $0x8] sm:$0xf]  ;;  %v4457_v42 = vld [vmem:[#allocation4 + $0x14] sm:$0xf0] }
 0x185   :  { %4637 = vtanh.f32 %v4897_v54  ;;  %v895_v58 = vsel %vm894_vm8, %v4634_v40, %v891_v55  ;;  %v3701_v40 = vor.u32 %v4445_v38, %v3700_v37  ;;  %v4460_v55 = vld [vmem:[#allocation4 + $0x74] sm:$0xf0]  ;;  %v3693_v5 = vor.u32 %v4443_v3, %v3692_v2  ;;  %v3684_v33 = vld [vmem:[#allocation4] sm:$0xf]  ;;  %v3782_v45 = vld [vmem:[#allocation4 + $0xc] sm:$0xf] }
 0x186   :  { %v900_v61 = vsel %vm897_vm9, %v899_v59, %v895_v58  ;;  %1456 = vmatpush.bf16.msrb.mxu1 %v3734_v44  ;;  %v3763_v57 = vor.u32 %v4460_v55, %v3762_v53  ;;  %v3794_v58 = vld [vmem:[#allocation4 + $0x6c] sm:$0xf]  ;;  %v4468_v59 = vld [vmem:[#allocation4 + $0x78] sm:$0xf0]  ;;  %v3685_v39 = vor.u32 %v4441_v34, %v3684_v33  ;;  %v3751_v44 = vor.u32 %v4457_v42, %v3750_v41  ;;  %v4480_v33 = vld [vmem:[#allocation4 + $0xec] sm:$0xf0] }
 0x187   :  { %v3795_v22 = vor.u32 %v4468_v59, %v3794_v58  ;;  %v4465_v46 = vld [vmem:[#allocation4 + $0x18] sm:$0xf0]  ;;  %v3876_v34 = vld [vmem:[#allocation4 + $0xe4] sm:$0xf]  ;;  %v3941_v41 = vld [vmem:[#allocation4 + $0xec] sm:$0xf] }
 0x188   :  { %1356 = vmatpush.bf16.msrb.mxu0 %v3709_v15  ;;  %1555 = vmatpush.bf16.msra.mxu2 %v3763_v57  ;;  %v4467_v15 = vld [vmem:[#allocation4 + $0x58] sm:$0xf0]  ;;  %v3783_v48 = vor.u32 %v4465_v46, %v3782_v45  ;;  %v4479_v45 = vld [vmem:[#allocation4 + $0xcc] sm:$0xf0]  ;;  %v3872_v46 = vld [vmem:[#allocation4 + $0xc4] sm:$0xf] }
 0x189   :  { %1635 = vmatpush.bf16.msra.mxu3 %v3795_v22  ;;  %v3791_v19 = vor.u32 %v4467_v15, %v3790_v14  ;;  %v4504_v42 = vld [vmem:[#allocation4 + $0xf8] sm:$0xf0] }
 0x18a   :  { %1457 = vmatpush.bf16.msrb.mxu1 %v3730_v56  ;;  %v1105_v56 = vld [vmem:[#allocation2 + $0x12] ss:$0 sm:$0xff] }
 0x18b   :  { %v4638_v60 = vpop.eup %4637 }
 0x18c   :  { %v906_v62 = vmul.f32 %v4638_v60, %v900_v61  ;;  %1357 = vmatpush.bf16.msrb.mxu0 %v3705_v28  ;;  %v909_v60 = vld [vmem:[#allocation2 + $0x2] ss:$0 sm:$0xff]  ;;  %1556 = vmatpush.bf16.msra.mxu2 %v3759_v13  ;;  %v4466_v28 = vld [vmem:[#allocation4 + $0x38] sm:$0xf0] }
 0x18d   :  { %1636 = vmatpush.bf16.msra.mxu3 %v3791_v19  ;;  %v3787_v32 = vor.u32 %v4466_v28, %v3786_v27 }
 0x18e   :  { %907 = vst [vmem:[#allocation3 + $0x1] sm:$0x1] %v906_v62  ;;  %v908_v63 = vpack.c.bf16 %v906_v62, %v906_v62  ;;  %v1007_v62 = vld [vmem:[#allocation2 + $0xa] ss:$0 sm:$0xff]  ;;  %1458 = vmatpush.bf16.msrb.mxu1 %v3726_v11 }
 0x190   :  { %982 = vmatmul.bf16.vlgmr.msra.gmra.mxu0 %v908_v63  ;;  %1080 = vmatmul.bf16.vlgmr.msra.gmra.mxu1 %v908_v63 }
 0x191   :  { %1178 = vmatmul.bf16.vlgmr.msrb.gmra.mxu2 %v908_v63  ;;  %1258 = vmatmul.bf16.vlgmr.msrb.gmra.mxu3 %v908_v63 }
 0x192   :  { %1358 = vmatpush.bf16.msrb.mxu0 %v3701_v40  ;;  %v4449_v40 = vld [vmem:[#allocation4 + $0x10] sm:$0xf0]  ;;  %1459 = vmatpush.bf16.msrb.mxu1 %v3722_v25 }
 0x193   :  { %1557 = vmatpush.bf16.msra.mxu2 %v3755_v31  ;;  %v3718_v43 = vor.u32 %v4449_v40, %v3717_v35  ;;  %1637 = vmatpush.bf16.msra.mxu3 %v3787_v32 }
 0x196   :  { %1359 = vmatpush.bf16.msrb.mxu0 %v3697_v51  ;;  %1460 = vmatpush.bf16.msrb.mxu1 %v3718_v43  ;;  %v3942_v43 = vor.u32 %v4504_v42, %v3941_v41  ;;  %v4491_v41 = vld [vmem:[#allocation4 + $0x54] sm:$0xf0] }
 0x197   :  { %1558 = vmatpush.bf16.msra.mxu2 %v3751_v44  ;;  %1638 = vmatpush.bf16.msra.mxu3 %v3783_v48  ;;  %v3839_v44 = vld [vmem:[#allocation4 + $0xc0] sm:$0xf]  ;;  %v3905_v48 = vld [vmem:[#allocation4 + $0xc8] sm:$0xf] }
 0x19a   :  { %1360 = vmatpush.bf16.msrb.mxu0 %v3693_v5 }
 0x19b   :  { %2012 = vmatpush.bf16.msrb.mxu3 %v3942_v43 }
 0x19e   :  { %1361 = vmatpush.bf16.msrb.mxu0 %v3689_v20 }
 0x1a2   :  { %1362 = vmatpush.bf16.msrb.mxu0 %v3685_v39 }
 0x20d   :  { %v983_v61 = vpop.f32.mrf.mxu0  ;;  %v1081_v63 = vpop.f32.mrf.mxu1 }
 0x20e   :  { %v987_v0 = vadd.f32 %v983_v61, %v909_v60  ;;  %v1085_v1 = vadd.f32 %v1081_v63, %v1007_v62 }
 0x210   :  { %v3583_v9 = vmul.f32 -1.442695, %v987_v0  ;;  %v3616_v10 = vmul.f32 -1.442695, %v1085_v1 }
 0x212   :  { %4639 = vpow2.f32 %v3583_v9 }
 0x213   :  { %4641 = vpow2.f32 %v3616_v10 }
 0x214   :  { %v1179_v29 = vpop.f32.mrf.mxu2  ;;  %v1259_v30 = vpop.f32.mrf.mxu3 }
 0x215   :  { %v1263_v36 = vadd.f32 %v1259_v30, %v1185_v18  ;;  %v985_v37 = vpop.f32.mrf.mxu0  ;;  %v1083_v38 = vpop.f32.mrf.mxu1  ;;  %v1183_v59 = vadd.f32 %v1179_v29, %v1105_v56  ;;  %v3835_v56 = vld [vmem:[#allocation4 + $0xa0] sm:$0xf] }
 0x216   :  { %v3909_v37 = vld [vmem:[#allocation4 + $0xe8] sm:$0xf]  ;;  %v4496_v38 = vld [vmem:[#allocation4 + $0xf4] sm:$0xf0] }
 0x217   :  { %v3681_v23 = vmul.f32 -1.442695, %v1263_v36  ;;  %v4488_v36 = vld [vmem:[#allocation4 + $0xf0] sm:$0xf0]  ;;  %v3910_v40 = vor.u32 %v4496_v38, %v3909_v37  ;;  %v3856_v37 = vld [vmem:[#allocation4 + $0x44] sm:$0xf] }
 0x218   :  { %v4640_v47 = vpop.eup %4639  ;;  %v3877_v39 = vor.u32 %v4488_v36, %v3876_v34  ;;  %v4475_v36 = vld [vmem:[#allocation4 + $0x4c] sm:$0xf0] }
 0x219   :  { %v4642_v49 = vpop.eup %4641  ;;  %v991_v50 = vadd.f32 1.0, %v4640_v47  ;;  %4643 = vpow2.f32 %v3681_v23  ;;  %1932 = vmatpush.bf16.msrb.mxu2 %v3910_v40  ;;  %v3840_v23 = vor.u32 %v4479_v45, %v3839_v44  ;;  %v4487_v47 = vld [vmem:[#allocation4 + $0xd0] sm:$0xf0]  ;;  %v3889_v40 = vld [vmem:[#allocation4 + $0x48] sm:$0xf] }
 0x21a   :  { %v1089_v51 = vadd.f32 1.0, %v4642_v49  ;;  %1834 = vmatpush.bf16.msra.mxu1 %v3877_v39  ;;  %v4495_v49 = vld [vmem:[#allocation4 + $0xd4] sm:$0xf0]  ;;  %v4483_v39 = vld [vmem:[#allocation4 + $0x50] sm:$0xf0]  ;;  %v3890_v45 = vor.u32 %v4491_v41, %v3889_v40 }
 0x21b   :  { %4645 = vrcp.f32 %v991_v50  ;;  %v1003_v0 = vand.u32 2147483648, %v991_v50  ;;  %v1001_v3 = vand.u32 2147483647, %v991_v50  ;;  %vm997_vm12 = vweird.f32 %v991_v50 }
 0x21c   :  { %4647 = vrcp.f32 %v1089_v51  ;;  %v1181_v52 = vpop.f32.mrf.mxu2  ;;  %v1261_v53 = vpop.f32.mrf.mxu3  ;;  %v1101_v1 = vand.u32 2147483648, %v1089_v51  ;;  %v1099_v5 = vand.u32 2147483647, %v1089_v51  ;;  %vm1095_vm13 = vweird.f32 %v1089_v51 }
 0x21d   :  { %v1004_v8 = vor.u32 1.1754944e-38, %v1003_v0  ;;  %vm1002_vm1 = vcmp.eq.f32.partialorder %v1001_v3, 8.507059e+37  ;;  %v3937_v52 = vld [vmem:[#allocation4 + $0xcc] sm:$0xf]  ;;  %v4503_v53 = vld [vmem:[#allocation4 + $0xd8] sm:$0xf0]  ;;  %v3857_v44 = vor.u32 %v4483_v39, %v3856_v37 }
 0x21e   :  { %v1102_v11 = vor.u32 1.1754944e-38, %v1101_v1  ;;  %vm1100_vm2 = vcmp.eq.f32.partialorder %v1099_v5, 8.507059e+37  ;;  %v3933_v0 = vld [vmem:[#allocation4 + $0xac] sm:$0xf]  ;;  %v4502_v1 = vld [vmem:[#allocation4 + $0xb8] sm:$0xf0] }
 0x21f   :  { %v4644_v55 = vpop.eup %4643  ;;  %v3831_v3 = vld [vmem:[#allocation4 + $0x80] sm:$0xf]  ;;  %v3864_v5 = vld [vmem:[#allocation4 + $0x84] sm:$0xf] }
 0x220   :  { %v1267_v57 = vadd.f32 1.0, %v4644_v55  ;;  %v3938_v55 = vor.u32 %v4503_v53, %v3937_v52  ;;  %v3852_v52 = vld [vmem:[#allocation4 + $0x24] sm:$0xf]  ;;  %v4482_v53 = vld [vmem:[#allocation4 + $0x30] sm:$0xf0] }
 0x221   :  { %v4646_v58 = vpop.eup %4645 }
 0x222   :  { %v4648_v60 = vpop.eup %4647  ;;  %v993_v61 = vmul.f32 %v4646_v58, %v991_v50  ;;  %4649 = vrcp.f32 %v1267_v57  ;;  %vm998_vm10 = vweird.f32 %v4646_v58  ;;  %v1279_v25 = vand.u32 2147483648, %v1267_v57  ;;  %2013 = vmatpush.bf16.msrb.mxu3 %v3938_v55  ;;  %v3885_v55 = vld [vmem:[#allocation4 + $0x28] sm:$0xf] }
 0x223   :  { %v1091_v62 = vmul.f32 %v4648_v60, %v1089_v51  ;;  %4651 = vtanh.f32 %v1183_v59  ;;  %vm1096_vm11 = vweird.f32 %v4648_v60  ;;  %vm999_vm14 = vmor %vm997_vm12, %vm998_vm10  ;;  %vm1273_vm4 = vweird.f32 %v1267_v57 }
 0x224   :  { %v994_v63 = vsub.f32 1.0, %v993_v61  ;;  %vm1097_vm15 = vmor %vm1095_vm13, %vm1096_vm11  ;;  %v1277_v26 = vand.u32 2147483647, %v1267_v57  ;;  %v1280_v28 = vor.u32 1.1754944e-38, %v1279_v25  ;;  %v3873_v50 = vor.u32 %v4487_v47, %v3872_v46  ;;  %v3901_v61 = vld [vmem:[#allocation4 + $0xa8] sm:$0xf] }
 0x225   :  { %v1092_v22 = vsub.f32 1.0, %v1091_v62  ;;  %v3906_v51 = vor.u32 %v4495_v49, %v3905_v48  ;;  %v4494_v62 = vld [vmem:[#allocation4 + $0xb4] sm:$0xf0]  ;;  %v3921_v46 = vld [vmem:[#allocation4 + $0x4c] sm:$0xf] }
 0x226   :  { %v995_v2 = vmul.f32 %v4646_v58, %v994_v63  ;;  %vm1278_vm6 = vcmp.eq.f32.partialorder %v1277_v26, 8.507059e+37  ;;  %1835 = vmatpush.bf16.msra.mxu1 %v3873_v50  ;;  %v3819_v47 = vld [vmem:[#allocation4 + $0x20] sm:$0xf]  ;;  %v4474_v48 = vld [vmem:[#allocation4 + $0x2c] sm:$0xf0] }
 0x227   :  { %v1093_v4 = vmul.f32 %v4648_v60, %v1092_v22  ;;  %1933 = vmatpush.bf16.msrb.mxu2 %v3906_v51  ;;  %v3902_v22 = vor.u32 %v4494_v62, %v3901_v61  ;;  %v1566_v49 = vld [vmem:[#allocation2 + $0x1b] ss:$0 sm:$0xff]  ;;  %v3820_v51 = vor.u32 %v4474_v48, %v3819_v47 }
 0x228   :  { %v4650_v6 = vpop.eup %4649  ;;  %v996_v7 = vadd.f32 %v4646_v58, %v995_v2  ;;  %v3934_v2 = vor.u32 %v4502_v1, %v3933_v0  ;;  %v4473_v0 = vld [vmem:[#allocation4 + $0xc] sm:$0xf0]  ;;  %v3848_v1 = vld [vmem:[#allocation4 + $0x4] sm:$0xf] }
 0x229   :  { %v1094_v9 = vadd.f32 %v4648_v60, %v1093_v4  ;;  %v1269_v10 = vmul.f32 %v4650_v6, %v1267_v57  ;;  %v4652_v14 = vpop.eup %4651  ;;  %vm1274_vm3 = vweird.f32 %v4650_v6  ;;  %v4478_v57 = vld [vmem:[#allocation4 + $0xac] sm:$0xf0] }
 0x22a   :  { %v1000_v13 = vsel %vm999_vm14, %v4646_v58, %v996_v7  ;;  %vm1275_vm5 = vmor %vm1273_vm4, %vm1274_vm3  ;;  %v3868_v58 = vld [vmem:[#allocation4 + $0xa4] sm:$0xf]  ;;  %v3836_v59 = vor.u32 %v4478_v57, %v3835_v56  ;;  %v4477_v4 = vld [vmem:[#allocation4 + $0x8c] sm:$0xf0]  ;;  %2014 = vmatpush.bf16.msrb.mxu3 %v3934_v2  ;;  %v3853_v56 = vor.u32 %v4482_v53, %v3852_v52 }
 0x22b   :  { %v1005_v15 = vsel %vm1002_vm1, %v1004_v8, %v1000_v13  ;;  %v1098_v16 = vsel %vm1097_vm15, %v4648_v60, %v1094_v9  ;;  %v1270_v17 = vsub.f32 1.0, %v1269_v10  ;;  %v4486_v60 = vld [vmem:[#allocation4 + $0xb0] sm:$0xf0]  ;;  %1934 = vmatpush.bf16.msrb.mxu2 %v3902_v22  ;;  %v3897_v8 = vld [vmem:[#allocation4 + $0x88] sm:$0xf] }
 0x22c   :  { %v1103_v18 = vsel %vm1100_vm2, %v1102_v11, %v1098_v16  ;;  %v1284_v19 = vmul.f32 %v4652_v14, %v1005_v15  ;;  %v3869_v63 = vor.u32 %v4486_v60, %v3868_v58  ;;  %v4485_v7 = vld [vmem:[#allocation4 + $0x90] sm:$0xf0]  ;;  %v4493_v9 = vld [vmem:[#allocation4 + $0x94] sm:$0xf0]  ;;  %v3929_v13 = vld [vmem:[#allocation4 + $0x8c] sm:$0xf] }
 0x22d   :  { %v1283_v20 = vmul.f32 %v1103_v18, %v4897_v54  ;;  %v1271_v12 = vmul.f32 %v4650_v6, %v1270_v17  ;;  %v3843_v54 = vld [vmem:[#allocation4 + $0xe0] sm:$0xf]  ;;  %v3865_v10 = vor.u32 %v4485_v7, %v3864_v5  ;;  %v3898_v11 = vor.u32 %v4493_v9, %v3897_v8  ;;  %v4501_v14 = vld [vmem:[#allocation4 + $0x98] sm:$0xf0]  ;;  %v4476_v17 = vld [vmem:[#allocation4 + $0x6c] sm:$0xf0] }
 0x22e   :  { %v3844_v35 = vor.u32 %v4480_v33, %v3843_v54  ;;  %1836 = vmatpush.bf16.msra.mxu1 %v3869_v63  ;;  %v3930_v15 = vor.u32 %v4501_v14, %v3929_v13  ;;  %v3827_v16 = vld [vmem:[#allocation4 + $0x60] sm:$0xf]  ;;  %v3860_v18 = vld [vmem:[#allocation4 + $0x64] sm:$0xf]  ;;  %v4490_v57 = vld [vmem:[#allocation4 + $0x34] sm:$0xf0] }
 0x22f   :  { %v4901_v21 = vadd.f32 %v1284_v19, %v1283_v20  ;;  %v1272_v24 = vadd.f32 %v4650_v6, %v1271_v12  ;;  %1935 = vmatpush.bf16.msrb.mxu2 %v3898_v11  ;;  %v3828_v19 = vor.u32 %v4476_v17, %v3827_v16  ;;  %v4484_v20 = vld [vmem:[#allocation4 + $0x70] sm:$0xf0]  ;;  %v3893_v12 = vld [vmem:[#allocation4 + $0x68] sm:$0xf]  ;;  %v3917_v58 = vld [vmem:[#allocation4 + $0x2c] sm:$0xf]  ;;  %v3886_v62 = vor.u32 %v4490_v57, %v3885_v55 }
 0x230   :  { %1736 = vmatpush.bf16.msra.mxu0 %v3844_v35  ;;  %2015 = vmatpush.bf16.msrb.mxu3 %v3930_v15  ;;  %v3861_v25 = vor.u32 %v4484_v20, %v3860_v18  ;;  %v3823_v35 = vld [vmem:[#allocation4 + $0x40] sm:$0xf]  ;;  %v3881_v7 = vld [vmem:[#allocation4 + $0x8] sm:$0xf]  ;;  %v4489_v8 = vld [vmem:[#allocation4 + $0x14] sm:$0xf0] }
 0x231   :  { %4653 = vtanh.f32 %v4901_v21  ;;  %v1276_v27 = vsel %vm1275_vm5, %v4650_v6, %v1272_v24  ;;  %v3832_v6 = vor.u32 %v4477_v4, %v3831_v3  ;;  %v4492_v24 = vld [vmem:[#allocation4 + $0x74] sm:$0xf0]  ;;  %v3824_v38 = vor.u32 %v4475_v36, %v3823_v35  ;;  %v3815_v22 = vld [vmem:[#allocation4] sm:$0xf]  ;;  %v3913_v11 = vld [vmem:[#allocation4 + $0xc] sm:$0xf] }
 0x232   :  { %v1281_v30 = vsel %vm1278_vm6, %v1280_v28, %v1276_v27  ;;  %1837 = vmatpush.bf16.msra.mxu1 %v3865_v10  ;;  %v3894_v26 = vor.u32 %v4492_v24, %v3893_v12  ;;  %v3925_v27 = vld [vmem:[#allocation4 + $0x6c] sm:$0xf]  ;;  %v4500_v28 = vld [vmem:[#allocation4 + $0x78] sm:$0xf0]  ;;  %v3816_v5 = vor.u32 %v4473_v0, %v3815_v22  ;;  %v3882_v10 = vor.u32 %v4489_v8, %v3881_v7  ;;  %v4512_v22 = vld [vmem:[#allocation4 + $0xec] sm:$0xf0] }
 0x233   :  { %v3926_v54 = vor.u32 %v4500_v28, %v3925_v27  ;;  %v4497_v13 = vld [vmem:[#allocation4 + $0x18] sm:$0xf0]  ;;  %v4007_v0 = vld [vmem:[#allocation4 + $0xe4] sm:$0xf]  ;;  %v4072_v7 = vld [vmem:[#allocation4 + $0xec] sm:$0xf] }
 0x234   :  { %1737 = vmatpush.bf16.msra.mxu0 %v3840_v23  ;;  %1936 = vmatpush.bf16.msrb.mxu2 %v3894_v26  ;;  %v4499_v23 = vld [vmem:[#allocation4 + $0x58] sm:$0xf0]  ;;  %v3914_v16 = vor.u32 %v4497_v13, %v3913_v11  ;;  %v4511_v11 = vld [vmem:[#allocation4 + $0xcc] sm:$0xf0]  ;;  %v4003_v13 = vld [vmem:[#allocation4 + $0xc4] sm:$0xf] }
 0x235   :  { %2016 = vmatpush.bf16.msrb.mxu3 %v3926_v54  ;;  %v3922_v50 = vor.u32 %v4499_v23, %v3921_v46  ;;  %v4536_v8 = vld [vmem:[#allocation4 + $0xf8] sm:$0xf0] }
 0x236   :  { %1838 = vmatpush.bf16.msra.mxu1 %v3861_v25  ;;  %v1486_v25 = vld [vmem:[#allocation2 + $0x13] ss:$0 sm:$0xff] }
 0x237   :  { %v4654_v29 = vpop.eup %4653 }
 0x238   :  { %v1287_v31 = vmul.f32 %v4654_v29, %v1281_v30  ;;  %1738 = vmatpush.bf16.msra.mxu0 %v3836_v59  ;;  %v1290_v29 = vld [vmem:[#allocation2 + $0x3] ss:$0 sm:$0xff]  ;;  %1937 = vmatpush.bf16.msrb.mxu2 %v3890_v45  ;;  %v4498_v59 = vld [vmem:[#allocation4 + $0x38] sm:$0xf0] }
 0x239   :  { %2017 = vmatpush.bf16.msrb.mxu3 %v3922_v50  ;;  %v3918_v63 = vor.u32 %v4498_v59, %v3917_v58 }
 0x23a   :  { %1288 = vst [vmem:[#allocation3 + $0x2] sm:$0x1] %v1287_v31  ;;  %v1289_v32 = vpack.c.bf16 %v1287_v31, %v1287_v31  ;;  %v1388_v31 = vld [vmem:[#allocation2 + $0xb] ss:$0 sm:$0xff]  ;;  %1839 = vmatpush.bf16.msra.mxu1 %v3857_v44 }
 0x23c   :  { %1363 = vmatmul.bf16.vlgmr.msrb.gmra.mxu0 %v1289_v32  ;;  %1461 = vmatmul.bf16.vlgmr.msrb.gmra.mxu1 %v1289_v32 }
 0x23d   :  { %1559 = vmatmul.bf16.vlgmr.msra.gmra.mxu2 %v1289_v32  ;;  %1639 = vmatmul.bf16.vlgmr.msra.gmra.mxu3 %v1289_v32 }
 0x23e   :  { %1739 = vmatpush.bf16.msra.mxu0 %v3832_v6  ;;  %v4481_v6 = vld [vmem:[#allocation4 + $0x10] sm:$0xf0]  ;;  %1840 = vmatpush.bf16.msra.mxu1 %v3853_v56 }
 0x23f   :  { %1938 = vmatpush.bf16.msrb.mxu2 %v3886_v62  ;;  %v3849_v9 = vor.u32 %v4481_v6, %v3848_v1  ;;  %2018 = vmatpush.bf16.msrb.mxu3 %v3918_v63 }
 0x242   :  { %1740 = vmatpush.bf16.msra.mxu0 %v3828_v19  ;;  %1841 = vmatpush.bf16.msra.mxu1 %v3849_v9  ;;  %v4073_v9 = vor.u32 %v4536_v8, %v4072_v7  ;;  %v4523_v7 = vld [vmem:[#allocation4 + $0x54] sm:$0xf0] }
 0x243   :  { %1939 = vmatpush.bf16.msrb.mxu2 %v3882_v10  ;;  %2019 = vmatpush.bf16.msrb.mxu3 %v3914_v16  ;;  %v3970_v10 = vld [vmem:[#allocation4 + $0xc0] sm:$0xf]  ;;  %v4036_v16 = vld [vmem:[#allocation4 + $0xc8] sm:$0xf] }
 0x246   :  { %1741 = vmatpush.bf16.msra.mxu0 %v3824_v38 }
 0x247   :  { %2393 = vmatpush.bf16.msra.mxu3 %v4073_v9 }
 0x24a   :  { %1742 = vmatpush.bf16.msra.mxu0 %v3820_v51 }
 0x24e   :  { %1743 = vmatpush.bf16.msra.mxu0 %v3816_v5 }
 0x2b9   :  { %v1364_v30 = vpop.f32.mrf.mxu0  ;;  %v1462_v32 = vpop.f32.mrf.mxu1 }
 0x2ba   :  { %v1368_v33 = vadd.f32 %v1364_v30, %v1290_v29  ;;  %v1466_v34 = vadd.f32 %v1462_v32, %v1388_v31 }
 0x2bc   :  { %v3714_v42 = vmul.f32 -1.442695, %v1368_v33  ;;  %v3747_v43 = vmul.f32 -1.442695, %v1466_v34 }
 0x2be   :  { %4655 = vpow2.f32 %v3714_v42 }
 0x2bf   :  { %4657 = vpow2.f32 %v3747_v43 }
 0x2c0   :  { %v1560_v60 = vpop.f32.mrf.mxu2  ;;  %v1640_v61 = vpop.f32.mrf.mxu3 }
 0x2c1   :  { %v1644_v2 = vadd.f32 %v1640_v61, %v1566_v49  ;;  %v1366_v3 = vpop.f32.mrf.mxu0  ;;  %v1464_v4 = vpop.f32.mrf.mxu1  ;;  %v1564_v28 = vadd.f32 %v1560_v60, %v1486_v25  ;;  %v3966_v25 = vld [vmem:[#allocation4 + $0xa0] sm:$0xf] }
 0x2c2   :  { %v4040_v3 = vld [vmem:[#allocation4 + $0xe8] sm:$0xf]  ;;  %v4528_v4 = vld [vmem:[#allocation4 + $0xf4] sm:$0xf0] }
 0x2c3   :  { %v3812_v14 = vmul.f32 -1.442695, %v1644_v2  ;;  %v4520_v2 = vld [vmem:[#allocation4 + $0xf0] sm:$0xf0]  ;;  %v4041_v6 = vor.u32 %v4528_v4, %v4040_v3  ;;  %v3987_v3 = vld [vmem:[#allocation4 + $0x44] sm:$0xf] }
 0x2c4   :  { %v4656_v15 = vpop.eup %4655  ;;  %v4008_v5 = vor.u32 %v4520_v2, %v4007_v0  ;;  %v4507_v2 = vld [vmem:[#allocation4 + $0x4c] sm:$0xf0] }
 0x2c5   :  { %v4658_v17 = vpop.eup %4657  ;;  %v1372_v18 = vadd.f32 1.0, %v4656_v15  ;;  %4659 = vpow2.f32 %v3812_v14  ;;  %2313 = vmatpush.bf16.msra.mxu2 %v4041_v6  ;;  %v3971_v14 = vor.u32 %v4511_v11, %v3970_v10  ;;  %v4519_v15 = vld [vmem:[#allocation4 + $0xd0] sm:$0xf0]  ;;  %v4020_v6 = vld [vmem:[#allocation4 + $0x48] sm:$0xf] }
 0x2c6   :  { %v1470_v19 = vadd.f32 1.0, %v4658_v17  ;;  %2215 = vmatpush.bf16.msrb.mxu1 %v4008_v5  ;;  %v4527_v17 = vld [vmem:[#allocation4 + $0xd4] sm:$0xf0]  ;;  %v4515_v5 = vld [vmem:[#allocation4 + $0x50] sm:$0xf0]  ;;  %v4021_v11 = vor.u32 %v4523_v7, %v4020_v6 }
 0x2c7   :  { %4661 = vrcp.f32 %v1372_v18  ;;  %v1384_v33 = vand.u32 2147483648, %v1372_v18  ;;  %v1382_v36 = vand.u32 2147483647, %v1372_v18  ;;  %vm1378_vm9 = vweird.f32 %v1372_v18 }
 0x2c8   :  { %4663 = vrcp.f32 %v1470_v19  ;;  %v1562_v20 = vpop.f32.mrf.mxu2  ;;  %v1642_v12 = vpop.f32.mrf.mxu3  ;;  %v1482_v34 = vand.u32 2147483648, %v1470_v19  ;;  %v1480_v38 = vand.u32 2147483647, %v1470_v19  ;;  %vm1476_vm10 = vweird.f32 %v1470_v19 }
 0x2c9   :  { %v1385_v41 = vor.u32 1.1754944e-38, %v1384_v33  ;;  %vm1383_vm13 = vcmp.eq.f32.partialorder %v1382_v36, 8.507059e+37  ;;  %v4068_v20 = vld [vmem:[#allocation4 + $0xcc] sm:$0xf]  ;;  %v4535_v12 = vld [vmem:[#allocation4 + $0xd8] sm:$0xf0]  ;;  %v3988_v10 = vor.u32 %v4515_v5, %v3987_v3 }
 0x2ca   :  { %v1483_v44 = vor.u32 1.1754944e-38, %v1482_v34  ;;  %vm1481_vm14 = vcmp.eq.f32.partialorder %v1480_v38, 8.507059e+37  ;;  %v4064_v33 = vld [vmem:[#allocation4 + $0xac] sm:$0xf]  ;;  %v4534_v34 = vld [vmem:[#allocation4 + $0xb8] sm:$0xf0] }
 0x2cb   :  { %v4660_v24 = vpop.eup %4659  ;;  %v3962_v36 = vld [vmem:[#allocation4 + $0x80] sm:$0xf]  ;;  %v3995_v38 = vld [vmem:[#allocation4 + $0x84] sm:$0xf] }
 0x2cc   :  { %v1648_v26 = vadd.f32 1.0, %v4660_v24  ;;  %v4069_v24 = vor.u32 %v4535_v12, %v4068_v20  ;;  %v3983_v20 = vld [vmem:[#allocation4 + $0x24] sm:$0xf]  ;;  %v4514_v12 = vld [vmem:[#allocation4 + $0x30] sm:$0xf0] }
 0x2cd   :  { %v4662_v27 = vpop.eup %4661 }
 0x2ce   :  { %v4664_v29 = vpop.eup %4663  ;;  %v1374_v30 = vmul.f32 %v4662_v27, %v1372_v18  ;;  %4665 = vrcp.f32 %v1648_v26  ;;  %vm1379_vm7 = vweird.f32 %v4662_v27  ;;  %v1660_v56 = vand.u32 2147483648, %v1648_v26  ;;  %2394 = vmatpush.bf16.msra.mxu3 %v4069_v24  ;;  %v4016_v24 = vld [vmem:[#allocation4 + $0x28] sm:$0xf] }
 0x2cf   :  { %v1472_v31 = vmul.f32 %v4664_v29, %v1470_v19  ;;  %4667 = vtanh.f32 %v1564_v28  ;;  %vm1477_vm8 = vweird.f32 %v4664_v29  ;;  %vm1380_vm11 = vmor %vm1378_vm9, %vm1379_vm7  ;;  %vm1654_vm1 = vweird.f32 %v1648_v26 }
 0x2d0   :  { %v1375_v32 = vsub.f32 1.0, %v1374_v30  ;;  %vm1478_vm12 = vmor %vm1476_vm10, %vm1477_vm8  ;;  %v1658_v57 = vand.u32 2147483647, %v1648_v26  ;;  %v1661_v59 = vor.u32 1.1754944e-38, %v1660_v56  ;;  %v4004_v18 = vor.u32 %v4519_v15, %v4003_v13  ;;  %v4032_v30 = vld [vmem:[#allocation4 + $0xa8] sm:$0xf] }
 0x2d1   :  { %v1473_v54 = vsub.f32 1.0, %v1472_v31  ;;  %v4037_v19 = vor.u32 %v4527_v17, %v4036_v16  ;;  %v4526_v31 = vld [vmem:[#allocation4 + $0xb4] sm:$0xf0]  ;;  %v4052_v13 = vld [vmem:[#allocation4 + $0x4c] sm:$0xf] }
 0x2d2   :  { %v1376_v35 = vmul.f32 %v4662_v27, %v1375_v32  ;;  %vm1659_vm3 = vcmp.eq.f32.partialorder %v1658_v57, 8.507059e+37  ;;  %2216 = vmatpush.bf16.msrb.mxu1 %v4004_v18  ;;  %v3950_v15 = vld [vmem:[#allocation4 + $0x20] sm:$0xf]  ;;  %v4506_v16 = vld [vmem:[#allocation4 + $0x2c] sm:$0xf0] }
 0x2d3   :  { %v1474_v37 = vmul.f32 %v4664_v29, %v1473_v54  ;;  %2314 = vmatpush.bf16.msra.mxu2 %v4037_v19  ;;  %v4033_v54 = vor.u32 %v4526_v31, %v4032_v30  ;;  %v1947_v17 = vld [vmem:[#allocation2 + $0x1c] ss:$0 sm:$0xff]  ;;  %v3951_v19 = vor.u32 %v4506_v16, %v3950_v15 }
 0x2d4   :  { %v4666_v39 = vpop.eup %4665  ;;  %v1377_v40 = vadd.f32 %v4662_v27, %v1376_v35  ;;  %v4065_v35 = vor.u32 %v4534_v34, %v4064_v33  ;;  %v4505_v33 = vld [vmem:[#allocation4 + $0xc] sm:$0xf0]  ;;  %v3979_v34 = vld [vmem:[#allocation4 + $0x4] sm:$0xf] }
 0x2d5   :  { %v1475_v42 = vadd.f32 %v4664_v29, %v1474_v37  ;;  %v1650_v43 = vmul.f32 %v4666_v39, %v1648_v26  ;;  %v4668_v46 = vpop.eup %4667  ;;  %vm1655_vm15 = vweird.f32 %v4666_v39  ;;  %v4510_v26 = vld [vmem:[#allocation4 + $0xac] sm:$0xf0] }
 0x2d6   :  { %v1381_v45 = vsel %vm1380_vm11, %v4662_v27, %v1377_v40  ;;  %vm1656_vm2 = vmor %vm1654_vm1, %vm1655_vm15  ;;  %v3999_v27 = vld [vmem:[#allocation4 + $0xa4] sm:$0xf]  ;;  %v3967_v28 = vor.u32 %v4510_v26, %v3966_v25  ;;  %v4509_v37 = vld [vmem:[#allocation4 + $0x8c] sm:$0xf0]  ;;  %2395 = vmatpush.bf16.msra.mxu3 %v4065_v35  ;;  %v3984_v25 = vor.u32 %v4514_v12, %v3983_v20 }
 0x2d7   :  { %v1386_v23 = vsel %vm1383_vm13, %v1385_v41, %v1381_v45  ;;  %v1479_v47 = vsel %vm1478_vm12, %v4664_v29, %v1475_v42  ;;  %v1651_v48 = vsub.f32 1.0, %v1650_v43  ;;  %v4518_v29 = vld [vmem:[#allocation4 + $0xb0] sm:$0xf0]  ;;  %2315 = vmatpush.bf16.msra.mxu2 %v4033_v54  ;;  %v4028_v41 = vld [vmem:[#allocation4 + $0x88] sm:$0xf] }
 0x2d8   :  { %v1484_v49 = vsel %vm1481_vm14, %v1483_v44, %v1479_v47  ;;  %v1665_v50 = vmul.f32 %v4668_v46, %v1386_v23  ;;  %v4000_v32 = vor.u32 %v4518_v29, %v3999_v27  ;;  %v4517_v40 = vld [vmem:[#allocation4 + $0x90] sm:$0xf0]  ;;  %v4525_v42 = vld [vmem:[#allocation4 + $0x94] sm:$0xf0]  ;;  %v4060_v45 = vld [vmem:[#allocation4 + $0x8c] sm:$0xf] }
 0x2d9   :  { %v1664_v51 = vmul.f32 %v1484_v49, %v4901_v21  ;;  %v1652_v52 = vmul.f32 %v4666_v39, %v1651_v48  ;;  %v3974_v21 = vld [vmem:[#allocation4 + $0xe0] sm:$0xf]  ;;  %v3996_v43 = vor.u32 %v4517_v40, %v3995_v38  ;;  %v4029_v44 = vor.u32 %v4525_v42, %v4028_v41  ;;  %v4533_v46 = vld [vmem:[#allocation4 + $0x98] sm:$0xf0]  ;;  %v4508_v48 = vld [vmem:[#allocation4 + $0x6c] sm:$0xf0] }
 0x2da   :  { %v3975_v1 = vor.u32 %v4512_v22, %v3974_v21  ;;  %2217 = vmatpush.bf16.msrb.mxu1 %v4000_v32  ;;  %v4061_v23 = vor.u32 %v4533_v46, %v4060_v45  ;;  %v3958_v47 = vld [vmem:[#allocation4 + $0x60] sm:$0xf]  ;;  %v3991_v49 = vld [vmem:[#allocation4 + $0x64] sm:$0xf]  ;;  %v4522_v26 = vld [vmem:[#allocation4 + $0x34] sm:$0xf0] }
 0x2db   :  { %v4905_v53 = vadd.f32 %v1665_v50, %v1664_v51  ;;  %v1653_v55 = vadd.f32 %v4666_v39, %v1652_v52  ;;  %2316 = vmatpush.bf16.msra.mxu2 %v4029_v44  ;;  %v3959_v50 = vor.u32 %v4508_v48, %v3958_v47  ;;  %v4516_v51 = vld [vmem:[#allocation4 + $0x70] sm:$0xf0]  ;;  %v4024_v52 = vld [vmem:[#allocation4 + $0x68] sm:$0xf]  ;;  %v4048_v27 = vld [vmem:[#allocation4 + $0x2c] sm:$0xf]  ;;  %v4017_v31 = vor.u32 %v4522_v26, %v4016_v24 }
 0x2dc   :  { %2117 = vmatpush.bf16.msrb.mxu0 %v3975_v1  ;;  %2396 = vmatpush.bf16.msra.mxu3 %v4061_v23  ;;  %v3992_v56 = vor.u32 %v4516_v51, %v3991_v49  ;;  %v3954_v1 = vld [vmem:[#allocation4 + $0x40] sm:$0xf]  ;;  %v4012_v40 = vld [vmem:[#allocation4 + $0x8] sm:$0xf]  ;;  %v4521_v41 = vld [vmem:[#allocation4 + $0x14] sm:$0xf0] }
 0x2dd   :  { %4669 = vtanh.f32 %v4905_v53  ;;  %v1657_v58 = vsel %vm1656_vm2, %v4666_v39, %v1653_v55  ;;  %v3963_v39 = vor.u32 %v4509_v37, %v3962_v36  ;;  %v4524_v55 = vld [vmem:[#allocation4 + $0x74] sm:$0xf0]  ;;  %v3955_v4 = vor.u32 %v4507_v2, %v3954_v1  ;;  %v3946_v54 = vld [vmem:[#allocation4] sm:$0xf]  ;;  %v4044_v44 = vld [vmem:[#allocation4 + $0xc] sm:$0xf] }
 0x2de   :  { %v1662_v61 = vsel %vm1659_vm3, %v1661_v59, %v1657_v58  ;;  %2218 = vmatpush.bf16.msrb.mxu1 %v3996_v43  ;;  %v4025_v57 = vor.u32 %v4524_v55, %v4024_v52  ;;  %v4056_v58 = vld [vmem:[#allocation4 + $0x6c] sm:$0xf]  ;;  %v4532_v59 = vld [vmem:[#allocation4 + $0x78] sm:$0xf0]  ;;  %v3947_v38 = vor.u32 %v4505_v33, %v3946_v54  ;;  %v4013_v43 = vor.u32 %v4521_v41, %v4012_v40  ;;  %v4544_v54 = vld [vmem:[#allocation4 + $0xec] sm:$0xf0] }
 0x2df   :  { %v4057_v21 = vor.u32 %v4532_v59, %v4056_v58  ;;  %v4529_v45 = vld [vmem:[#allocation4 + $0x18] sm:$0xf0]  ;;  %v4138_v33 = vld [vmem:[#allocation4 + $0xe4] sm:$0xf]  ;;  %v4203_v40 = vld [vmem:[#allocation4 + $0xec] sm:$0xf] }
 0x2e0   :  { %2118 = vmatpush.bf16.msrb.mxu0 %v3971_v14  ;;  %2317 = vmatpush.bf16.msra.mxu2 %v4025_v57  ;;  %v4531_v14 = vld [vmem:[#allocation4 + $0x58] sm:$0xf0]  ;;  %v4045_v47 = vor.u32 %v4529_v45, %v4044_v44  ;;  %v4543_v44 = vld [vmem:[#allocation4 + $0xcc] sm:$0xf0]  ;;  %v4134_v45 = vld [vmem:[#allocation4 + $0xc4] sm:$0xf] }
 0x2e1   :  { %2397 = vmatpush.bf16.msra.mxu3 %v4057_v21  ;;  %v4053_v18 = vor.u32 %v4531_v14, %v4052_v13  ;;  %v4568_v41 = vld [vmem:[#allocation4 + $0xf8] sm:$0xf0] }
 0x2e2   :  { %2219 = vmatpush.bf16.msrb.mxu1 %v3992_v56  ;;  %v1867_v56 = vld [vmem:[#allocation2 + $0x14] ss:$0 sm:$0xff] }
 0x2e3   :  { %v4670_v60 = vpop.eup %4669 }
 0x2e4   :  { %v1668_v62 = vmul.f32 %v4670_v60, %v1662_v61  ;;  %2119 = vmatpush.bf16.msrb.mxu0 %v3967_v28  ;;  %v1671_v60 = vld [vmem:[#allocation2 + $0x4] ss:$0 sm:$0xff]  ;;  %2318 = vmatpush.bf16.msra.mxu2 %v4021_v11 }
 0x2e5   :  { %v4530_v28 = vld [vmem:[#allocation4 + $0x38] sm:$0xf0]  ;;  %2398 = vmatpush.bf16.msra.mxu3 %v4053_v18 }
 0x2e6   :  { %1669 = vst [vmem:[#allocation3 + $0x3] sm:$0x1] %v1668_v62  ;;  %v1670_v63 = vpack.c.bf16 %v1668_v62, %v1668_v62  ;;  %v1769_v62 = vld [vmem:[#allocation2 + $0xc] ss:$0 sm:$0xff]  ;;  %2220 = vmatpush.bf16.msrb.mxu1 %v3988_v10  ;;  %v4049_v32 = vor.u32 %v4530_v28, %v4048_v27 }
 0x2e8   :  { %1744 = vmatmul.bf16.vlgmr.msra.gmra.mxu0 %v1670_v63  ;;  %1842 = vmatmul.bf16.vlgmr.msra.gmra.mxu1 %v1670_v63 }
 0x2e9   :  { %1940 = vmatmul.bf16.vlgmr.msrb.gmra.mxu2 %v1670_v63  ;;  %2020 = vmatmul.bf16.vlgmr.msrb.gmra.mxu3 %v1670_v63 }
 0x2ea   :  { %2120 = vmatpush.bf16.msrb.mxu0 %v3963_v39  ;;  %v4513_v39 = vld [vmem:[#allocation4 + $0x10] sm:$0xf0]  ;;  %2221 = vmatpush.bf16.msrb.mxu1 %v3984_v25 }
 0x2eb   :  { %2319 = vmatpush.bf16.msra.mxu2 %v4017_v31  ;;  %v3980_v42 = vor.u32 %v4513_v39, %v3979_v34  ;;  %2399 = vmatpush.bf16.msra.mxu3 %v4049_v32 }
 0x2ee   :  { %2121 = vmatpush.bf16.msrb.mxu0 %v3959_v50  ;;  %2222 = vmatpush.bf16.msrb.mxu1 %v3980_v42  ;;  %v4204_v42 = vor.u32 %v4568_v41, %v4203_v40  ;;  %v4555_v40 = vld [vmem:[#allocation4 + $0x54] sm:$0xf0] }
 0x2ef   :  { %2320 = vmatpush.bf16.msra.mxu2 %v4013_v43  ;;  %2400 = vmatpush.bf16.msra.mxu3 %v4045_v47  ;;  %v4101_v43 = vld [vmem:[#allocation4 + $0xc0] sm:$0xf]  ;;  %v4167_v47 = vld [vmem:[#allocation4 + $0xc8] sm:$0xf] }
 0x2f2   :  { %2122 = vmatpush.bf16.msrb.mxu0 %v3955_v4 }
 0x2f3   :  { %2774 = vmatpush.bf16.msrb.mxu3 %v4204_v42 }
 0x2f6   :  { %2123 = vmatpush.bf16.msrb.mxu0 %v3951_v19 }
 0x2fa   :  { %2124 = vmatpush.bf16.msrb.mxu0 %v3947_v38 }
 0x365   :  { %v1745_v61 = vpop.f32.mrf.mxu0  ;;  %v1843_v63 = vpop.f32.mrf.mxu1 }
 0x366   :  { %v1749_v22 = vadd.f32 %v1745_v61, %v1671_v60  ;;  %v1847_v0 = vadd.f32 %v1843_v63, %v1769_v62 }
 0x368   :  { %v3845_v8 = vmul.f32 -1.442695, %v1749_v22  ;;  %v3878_v9 = vmul.f32 -1.442695, %v1847_v0 }
 0x36a   :  { %4671 = vpow2.f32 %v3845_v8 }
 0x36b   :  { %4673 = vpow2.f32 %v3878_v9 }
 0x36c   :  { %v1941_v29 = vpop.f32.mrf.mxu2  ;;  %v2021_v30 = vpop.f32.mrf.mxu3 }
 0x36d   :  { %v2025_v35 = vadd.f32 %v2021_v30, %v1947_v17  ;;  %v1747_v36 = vpop.f32.mrf.mxu0  ;;  %v1845_v37 = vpop.f32.mrf.mxu1  ;;  %v1945_v59 = vadd.f32 %v1941_v29, %v1867_v56  ;;  %v4097_v56 = vld [vmem:[#allocation4 + $0xa0] sm:$0xf] }
 0x36e   :  { %v4171_v36 = vld [vmem:[#allocation4 + $0xe8] sm:$0xf]  ;;  %v4560_v37 = vld [vmem:[#allocation4 + $0xf4] sm:$0xf0] }
 0x36f   :  { %v3943_v46 = vmul.f32 -1.442695, %v2025_v35  ;;  %v4552_v35 = vld [vmem:[#allocation4 + $0xf0] sm:$0xf0]  ;;  %v4172_v39 = vor.u32 %v4560_v37, %v4171_v36  ;;  %v4118_v36 = vld [vmem:[#allocation4 + $0x44] sm:$0xf] }
 0x370   :  { %v4672_v23 = vpop.eup %4671  ;;  %v4139_v38 = vor.u32 %v4552_v35, %v4138_v33  ;;  %v4539_v35 = vld [vmem:[#allocation4 + $0x4c] sm:$0xf0] }
 0x371   :  { %v4674_v48 = vpop.eup %4673  ;;  %v1753_v49 = vadd.f32 1.0, %v4672_v23  ;;  %4675 = vpow2.f32 %v3943_v46  ;;  %2694 = vmatpush.bf16.msrb.mxu2 %v4172_v39  ;;  %v4102_v46 = vor.u32 %v4543_v44, %v4101_v43  ;;  %v4551_v23 = vld [vmem:[#allocation4 + $0xd0] sm:$0xf0]  ;;  %v4151_v39 = vld [vmem:[#allocation4 + $0x48] sm:$0xf] }
 0x372   :  { %v1851_v50 = vadd.f32 1.0, %v4674_v48  ;;  %2596 = vmatpush.bf16.msra.mxu1 %v4139_v38  ;;  %v4559_v48 = vld [vmem:[#allocation4 + $0xd4] sm:$0xf0]  ;;  %v4547_v38 = vld [vmem:[#allocation4 + $0x50] sm:$0xf0]  ;;  %v4152_v44 = vor.u32 %v4555_v40, %v4151_v39 }
 0x373   :  { %4677 = vrcp.f32 %v1753_v49  ;;  %v1765_v22 = vand.u32 2147483648, %v1753_v49  ;;  %v1763_v2 = vand.u32 2147483647, %v1753_v49  ;;  %vm1759_vm6 = vweird.f32 %v1753_v49 }
 0x374   :  { %4679 = vrcp.f32 %v1851_v50  ;;  %v1943_v51 = vpop.f32.mrf.mxu2  ;;  %v2023_v52 = vpop.f32.mrf.mxu3  ;;  %v1863_v0 = vand.u32 2147483648, %v1851_v50  ;;  %v1861_v4 = vand.u32 2147483647, %v1851_v50  ;;  %vm1857_vm7 = vweird.f32 %v1851_v50 }
 0x375   :  { %v1766_v7 = vor.u32 1.1754944e-38, %v1765_v22  ;;  %vm1764_vm10 = vcmp.eq.f32.partialorder %v1763_v2, 8.507059e+37  ;;  %v4199_v51 = vld [vmem:[#allocation4 + $0xcc] sm:$0xf]  ;;  %v4567_v52 = vld [vmem:[#allocation4 + $0xd8] sm:$0xf0]  ;;  %v4119_v43 = vor.u32 %v4547_v38, %v4118_v36 }
 0x376   :  { %v1864_v10 = vor.u32 1.1754944e-38, %v1863_v0  ;;  %vm1862_vm11 = vcmp.eq.f32.partialorder %v1861_v4, 8.507059e+37  ;;  %v4195_v22 = vld [vmem:[#allocation4 + $0xac] sm:$0xf]  ;;  %v4566_v0 = vld [vmem:[#allocation4 + $0xb8] sm:$0xf0] }
 0x377   :  { %v4676_v55 = vpop.eup %4675  ;;  %v4093_v2 = vld [vmem:[#allocation4 + $0x80] sm:$0xf]  ;;  %v4126_v4 = vld [vmem:[#allocation4 + $0x84] sm:$0xf] }
 0x378   :  { %v2029_v57 = vadd.f32 1.0, %v4676_v55  ;;  %v4200_v55 = vor.u32 %v4567_v52, %v4199_v51  ;;  %v4114_v51 = vld [vmem:[#allocation4 + $0x24] sm:$0xf]  ;;  %v4546_v52 = vld [vmem:[#allocation4 + $0x30] sm:$0xf0] }
 0x379   :  { %v4678_v58 = vpop.eup %4677 }
 0x37a   :  { %v4680_v60 = vpop.eup %4679  ;;  %v1755_v61 = vmul.f32 %v4678_v58, %v1753_v49  ;;  %4681 = vrcp.f32 %v2029_v57  ;;  %vm1760_vm4 = vweird.f32 %v4678_v58  ;;  %v2041_v25 = vand.u32 2147483648, %v2029_v57  ;;  %2775 = vmatpush.bf16.msrb.mxu3 %v4200_v55  ;;  %v4147_v55 = vld [vmem:[#allocation4 + $0x28] sm:$0xf] }
 0x37b   :  { %v1853_v62 = vmul.f32 %v4680_v60, %v1851_v50  ;;  %4683 = vtanh.f32 %v1945_v59  ;;  %vm1858_vm5 = vweird.f32 %v4680_v60  ;;  %vm1761_vm8 = vmor %vm1759_vm6, %vm1760_vm4  ;;  %vm2035_vm13 = vweird.f32 %v2029_v57 }
 0x37c   :  { %v1756_v63 = vsub.f32 1.0, %v1755_v61  ;;  %vm1859_vm9 = vmor %vm1857_vm7, %vm1858_vm5  ;;  %v2039_v26 = vand.u32 2147483647, %v2029_v57  ;;  %v2042_v28 = vor.u32 1.1754944e-38, %v2041_v25  ;;  %v4135_v49 = vor.u32 %v4551_v23, %v4134_v45  ;;  %v4163_v61 = vld [vmem:[#allocation4 + $0xa8] sm:$0xf] }
 0x37d   :  { %v1854_v21 = vsub.f32 1.0, %v1853_v62  ;;  %v4168_v50 = vor.u32 %v4559_v48, %v4167_v47  ;;  %v4558_v62 = vld [vmem:[#allocation4 + $0xb4] sm:$0xf0]  ;;  %v4183_v45 = vld [vmem:[#allocation4 + $0x4c] sm:$0xf] }
 0x37e   :  { %v1757_v1 = vmul.f32 %v4678_v58, %v1756_v63  ;;  %vm2040_vm15 = vcmp.eq.f32.partialorder %v2039_v26, 8.507059e+37  ;;  %2597 = vmatpush.bf16.msra.mxu1 %v4135_v49  ;;  %v4081_v23 = vld [vmem:[#allocation4 + $0x20] sm:$0xf]  ;;  %v4538_v47 = vld [vmem:[#allocation4 + $0x2c] sm:$0xf0] }
 0x37f   :  { %v1855_v3 = vmul.f32 %v4680_v60, %v1854_v21  ;;  %2695 = vmatpush.bf16.msrb.mxu2 %v4168_v50  ;;  %v4164_v21 = vor.u32 %v4558_v62, %v4163_v61  ;;  %v2328_v48 = vld [vmem:[#allocation2 + $0x1d] ss:$0 sm:$0xff]  ;;  %v4082_v50 = vor.u32 %v4538_v47, %v4081_v23 }
 0x380   :  { %v4682_v5 = vpop.eup %4681  ;;  %v1758_v6 = vadd.f32 %v4678_v58, %v1757_v1  ;;  %v4196_v1 = vor.u32 %v4566_v0, %v4195_v22  ;;  %v4537_v22 = vld [vmem:[#allocation4 + $0xc] sm:$0xf0]  ;;  %v4110_v0 = vld [vmem:[#allocation4 + $0x4] sm:$0xf] }
 0x381   :  { %v1856_v8 = vadd.f32 %v4680_v60, %v1855_v3  ;;  %v2031_v9 = vmul.f32 %v4682_v5, %v2029_v57  ;;  %v4684_v13 = vpop.eup %4683  ;;  %vm2036_vm12 = vweird.f32 %v4682_v5  ;;  %v4542_v57 = vld [vmem:[#allocation4 + $0xac] sm:$0xf0] }
 0x382   :  { %v1762_v11 = vsel %vm1761_vm8, %v4678_v58, %v1758_v6  ;;  %vm2037_vm14 = vmor %vm2035_vm13, %vm2036_vm12  ;;  %v4130_v58 = vld [vmem:[#allocation4 + $0xa4] sm:$0xf]  ;;  %v4098_v59 = vor.u32 %v4542_v57, %v4097_v56  ;;  %v4541_v3 = vld [vmem:[#allocation4 + $0x8c] sm:$0xf0]  ;;  %2776 = vmatpush.bf16.msrb.mxu3 %v4196_v1  ;;  %v4115_v56 = vor.u32 %v4546_v52, %v4114_v51 }
 0x383   :  { %v1767_v14 = vsel %vm1764_vm10, %v1766_v7, %v1762_v11  ;;  %v1860_v15 = vsel %vm1859_vm9, %v4680_v60, %v1856_v8  ;;  %v2032_v16 = vsub.f32 1.0, %v2031_v9  ;;  %v4550_v60 = vld [vmem:[#allocation4 + $0xb0] sm:$0xf0]  ;;  %2696 = vmatpush.bf16.msrb.mxu2 %v4164_v21  ;;  %v4159_v7 = vld [vmem:[#allocation4 + $0x88] sm:$0xf] }
 0x384   :  { %v1865_v17 = vsel %vm1862_vm11, %v1864_v10, %v1860_v15  ;;  %v2046_v18 = vmul.f32 %v4684_v13, %v1767_v14  ;;  %v4131_v63 = vor.u32 %v4550_v60, %v4130_v58  ;;  %v4549_v6 = vld [vmem:[#allocation4 + $0x90] sm:$0xf0]  ;;  %v4557_v8 = vld [vmem:[#allocation4 + $0x94] sm:$0xf0]  ;;  %v4191_v11 = vld [vmem:[#allocation4 + $0x8c] sm:$0xf] }
 0x385   :  { %v2045_v19 = vmul.f32 %v1865_v17, %v4905_v53  ;;  %v2033_v20 = vmul.f32 %v4682_v5, %v2032_v16  ;;  %v4105_v53 = vld [vmem:[#allocation4 + $0xe0] sm:$0xf]  ;;  %v4127_v9 = vor.u32 %v4549_v6, %v4126_v4  ;;  %v4160_v10 = vor.u32 %v4557_v8, %v4159_v7  ;;  %v4565_v13 = vld [vmem:[#allocation4 + $0x98] sm:$0xf0]  ;;  %v4540_v16 = vld [vmem:[#allocation4 + $0x6c] sm:$0xf0] }
 0x386   :  { %v4106_v34 = vor.u32 %v4544_v54, %v4105_v53  ;;  %2598 = vmatpush.bf16.msra.mxu1 %v4131_v63  ;;  %v4192_v14 = vor.u32 %v4565_v13, %v4191_v11  ;;  %v4089_v15 = vld [vmem:[#allocation4 + $0x60] sm:$0xf]  ;;  %v4122_v17 = vld [vmem:[#allocation4 + $0x64] sm:$0xf]  ;;  %v4554_v57 = vld [vmem:[#allocation4 + $0x34] sm:$0xf0] }
 0x387   :  { %v4909_v12 = vadd.f32 %v2046_v18, %v2045_v19  ;;  %v2034_v24 = vadd.f32 %v4682_v5, %v2033_v20  ;;  %2697 = vmatpush.bf16.msrb.mxu2 %v4160_v10  ;;  %v4090_v18 = vor.u32 %v4540_v16, %v4089_v15  ;;  %v4548_v19 = vld [vmem:[#allocation4 + $0x70] sm:$0xf0]  ;;  %v4155_v20 = vld [vmem:[#allocation4 + $0x68] sm:$0xf]  ;;  %v4179_v58 = vld [vmem:[#allocation4 + $0x2c] sm:$0xf]  ;;  %v4148_v62 = vor.u32 %v4554_v57, %v4147_v55 }
 0x388   :  { %2498 = vmatpush.bf16.msra.mxu0 %v4106_v34  ;;  %2777 = vmatpush.bf16.msrb.mxu3 %v4192_v14  ;;  %v4123_v25 = vor.u32 %v4548_v19, %v4122_v17  ;;  %v4085_v34 = vld [vmem:[#allocation4 + $0x40] sm:$0xf]  ;;  %v4143_v6 = vld [vmem:[#allocation4 + $0x8] sm:$0xf]  ;;  %v4553_v7 = vld [vmem:[#allocation4 + $0x14] sm:$0xf0] }
 0x389   :  { %4685 = vtanh.f32 %v4909_v12  ;;  %v2038_v27 = vsel %vm2037_vm14, %v4682_v5, %v2034_v24  ;;  %v4094_v5 = vor.u32 %v4541_v3, %v4093_v2  ;;  %v4556_v24 = vld [vmem:[#allocation4 + $0x74] sm:$0xf0]  ;;  %v4086_v37 = vor.u32 %v4539_v35, %v4085_v34  ;;  %v4077_v21 = vld [vmem:[#allocation4] sm:$0xf]  ;;  %v4175_v10 = vld [vmem:[#allocation4 + $0xc] sm:$0xf] }
 0x38a   :  { %v2043_v30 = vsel %vm2040_vm15, %v2042_v28, %v2038_v27  ;;  %2599 = vmatpush.bf16.msra.mxu1 %v4127_v9  ;;  %v4156_v26 = vor.u32 %v4556_v24, %v4155_v20  ;;  %v4187_v27 = vld [vmem:[#allocation4 + $0x6c] sm:$0xf]  ;;  %v4564_v28 = vld [vmem:[#allocation4 + $0x78] sm:$0xf0]  ;;  %v4078_v4 = vor.u32 %v4537_v22, %v4077_v21  ;;  %v4144_v9 = vor.u32 %v4553_v7, %v4143_v6  ;;  %v4576_v21 = vld [vmem:[#allocation4 + $0xec] sm:$0xf0] }
 0x38b   :  { %v4188_v53 = vor.u32 %v4564_v28, %v4187_v27  ;;  %v4561_v11 = vld [vmem:[#allocation4 + $0x18] sm:$0xf0]  ;;  %v4269_v22 = vld [vmem:[#allocation4 + $0xe4] sm:$0xf]  ;;  %v4334_v6 = vld [vmem:[#allocation4 + $0xec] sm:$0xf] }
 0x38c   :  { %2499 = vmatpush.bf16.msra.mxu0 %v4102_v46  ;;  %2698 = vmatpush.bf16.msrb.mxu2 %v4156_v26  ;;  %v4563_v46 = vld [vmem:[#allocation4 + $0x58] sm:$0xf0]  ;;  %v4176_v15 = vor.u32 %v4561_v11, %v4175_v10  ;;  %v4575_v10 = vld [vmem:[#allocation4 + $0xcc] sm:$0xf0]  ;;  %v4265_v11 = vld [vmem:[#allocation4 + $0xc4] sm:$0xf] }
 0x38d   :  { %2778 = vmatpush.bf16.msrb.mxu3 %v4188_v53  ;;  %v4184_v49 = vor.u32 %v4563_v46, %v4183_v45  ;;  %v4600_v7 = vld [vmem:[#allocation4 + $0xf8] sm:$0xf0] }
 0x38e   :  { %2600 = vmatpush.bf16.msra.mxu1 %v4123_v25  ;;  %v2248_v25 = vld [vmem:[#allocation2 + $0x15] ss:$0 sm:$0xff] }
 0x38f   :  { %v4686_v29 = vpop.eup %4685 }
 0x390   :  { %v2049_v31 = vmul.f32 %v4686_v29, %v2043_v30  ;;  %2500 = vmatpush.bf16.msra.mxu0 %v4098_v59  ;;  %v2052_v29 = vld [vmem:[#allocation2 + $0x5] ss:$0 sm:$0xff]  ;;  %2699 = vmatpush.bf16.msrb.mxu2 %v4152_v44 }
 0x391   :  { %v4562_v59 = vld [vmem:[#allocation4 + $0x38] sm:$0xf0]  ;;  %2779 = vmatpush.bf16.msrb.mxu3 %v4184_v49 }
 0x392   :  { %2050 = vst [vmem:[#allocation3 + $0x4] sm:$0x1] %v2049_v31  ;;  %v2051_v32 = vpack.c.bf16 %v2049_v31, %v2049_v31  ;;  %v2150_v31 = vld [vmem:[#allocation2 + $0xd] ss:$0 sm:$0xff]  ;;  %2601 = vmatpush.bf16.msra.mxu1 %v4119_v43  ;;  %v4180_v63 = vor.u32 %v4562_v59, %v4179_v58 }
 0x394   :  { %2125 = vmatmul.bf16.vlgmr.msrb.gmra.mxu0 %v2051_v32  ;;  %2223 = vmatmul.bf16.vlgmr.msrb.gmra.mxu1 %v2051_v32 }
 0x395   :  { %2321 = vmatmul.bf16.vlgmr.msra.gmra.mxu2 %v2051_v32  ;;  %2401 = vmatmul.bf16.vlgmr.msra.gmra.mxu3 %v2051_v32 }
 0x396   :  { %2501 = vmatpush.bf16.msra.mxu0 %v4094_v5  ;;  %v4545_v5 = vld [vmem:[#allocation4 + $0x10] sm:$0xf0]  ;;  %2602 = vmatpush.bf16.msra.mxu1 %v4115_v56 }
 0x397   :  { %2700 = vmatpush.bf16.msrb.mxu2 %v4148_v62  ;;  %v4111_v8 = vor.u32 %v4545_v5, %v4110_v0  ;;  %2780 = vmatpush.bf16.msrb.mxu3 %v4180_v63 }
 0x39a   :  { %2502 = vmatpush.bf16.msra.mxu0 %v4090_v18  ;;  %2603 = vmatpush.bf16.msra.mxu1 %v4111_v8  ;;  %v4335_v8 = vor.u32 %v4600_v7, %v4334_v6  ;;  %v2709_v6 = vld [vmem:[#allocation2 + $0x1e] ss:$0 sm:$0xff] }
 0x39b   :  { %2701 = vmatpush.bf16.msrb.mxu2 %v4144_v9  ;;  %2781 = vmatpush.bf16.msrb.mxu3 %v4176_v15  ;;  %v4232_v9 = vld [vmem:[#allocation4 + $0xc0] sm:$0xf]  ;;  %v4298_v15 = vld [vmem:[#allocation4 + $0xc8] sm:$0xf] }
 0x39e   :  { %2503 = vmatpush.bf16.msra.mxu0 %v4086_v37 }
 0x39f   :  { %3155 = vmatpush.bf16.msra.mxu3 %v4335_v8 }
 0x3a2   :  { %2504 = vmatpush.bf16.msra.mxu0 %v4082_v50 }
 0x3a6   :  { %2505 = vmatpush.bf16.msra.mxu0 %v4078_v4 }
 0x411   :  { %v2126_v30 = vpop.f32.mrf.mxu0  ;;  %v2224_v32 = vpop.f32.mrf.mxu1 }
 0x412   :  { %v2130_v54 = vadd.f32 %v2126_v30, %v2052_v29  ;;  %v2228_v33 = vadd.f32 %v2224_v32, %v2150_v31 }
 0x414   :  { %v3976_v41 = vmul.f32 -1.442695, %v2130_v54  ;;  %v4009_v42 = vmul.f32 -1.442695, %v2228_v33 }
 0x416   :  { %4687 = vpow2.f32 %v3976_v41 }
 0x417   :  { %4689 = vpow2.f32 %v4009_v42 }
 0x418   :  { %v2322_v60 = vpop.f32.mrf.mxu2  ;;  %v2402_v61 = vpop.f32.mrf.mxu3 }
 0x419   :  { %v2406_v1 = vadd.f32 %v2402_v61, %v2328_v48  ;;  %v2128_v2 = vpop.f32.mrf.mxu0  ;;  %v2226_v3 = vpop.f32.mrf.mxu1  ;;  %v2326_v28 = vadd.f32 %v2322_v60, %v2248_v25  ;;  %v4228_v25 = vld [vmem:[#allocation4 + $0xa0] sm:$0xf] }
 0x41a   :  { %v4302_v2 = vld [vmem:[#allocation4 + $0xe8] sm:$0xf]  ;;  %v4592_v3 = vld [vmem:[#allocation4 + $0xf4] sm:$0xf0] }
 0x41b   :  { %v4074_v13 = vmul.f32 -1.442695, %v2406_v1  ;;  %v4584_v1 = vld [vmem:[#allocation4 + $0xf0] sm:$0xf0]  ;;  %v4303_v5 = vor.u32 %v4592_v3, %v4302_v2  ;;  %v4216_v2 = vld [vmem:[#allocation4 + $0x40] sm:$0xf] }
 0x41c   :  { %v4688_v14 = vpop.eup %4687  ;;  %v4270_v4 = vor.u32 %v4584_v1, %v4269_v22  ;;  %v4571_v3 = vld [vmem:[#allocation4 + $0x4c] sm:$0xf0] }
 0x41d   :  { %v4690_v16 = vpop.eup %4689  ;;  %v2134_v17 = vadd.f32 1.0, %v4688_v14  ;;  %4691 = vpow2.f32 %v4074_v13  ;;  %3075 = vmatpush.bf16.msra.mxu2 %v4303_v5  ;;  %v4233_v13 = vor.u32 %v4575_v10, %v4232_v9  ;;  %v4583_v14 = vld [vmem:[#allocation4 + $0xd0] sm:$0xf0]  ;;  %v4217_v7 = vor.u32 %v4571_v3, %v4216_v2  ;;  %v4282_v9 = vld [vmem:[#allocation4 + $0x48] sm:$0xf] }
 0x41e   :  { %v2232_v18 = vadd.f32 1.0, %v4690_v16  ;;  %2977 = vmatpush.bf16.msrb.mxu1 %v4270_v4  ;;  %v4591_v16 = vld [vmem:[#allocation4 + $0xd4] sm:$0xf0]  ;;  %v4249_v4 = vld [vmem:[#allocation4 + $0x44] sm:$0xf] }
 0x41f   :  { %4693 = vrcp.f32 %v2134_v17  ;;  %v2146_v54 = vand.u32 2147483648, %v2134_v17  ;;  %v2144_v35 = vand.u32 2147483647, %v2134_v17  ;;  %vm2140_vm3 = vweird.f32 %v2134_v17  ;;  %v4579_v5 = vld [vmem:[#allocation4 + $0x50] sm:$0xf0] }
 0x420   :  { %4695 = vrcp.f32 %v2232_v18  ;;  %v2324_v19 = vpop.f32.mrf.mxu2  ;;  %v2404_v20 = vpop.f32.mrf.mxu3  ;;  %v2244_v33 = vand.u32 2147483648, %v2232_v18  ;;  %v2242_v37 = vand.u32 2147483647, %v2232_v18  ;;  %vm2238_vm4 = vweird.f32 %v2232_v18  ;;  %v4587_v10 = vld [vmem:[#allocation4 + $0x54] sm:$0xf0] }
 0x421   :  { %v2147_v40 = vor.u32 1.1754944e-38, %v2146_v54  ;;  %vm2145_vm7 = vcmp.eq.f32.partialorder %v2144_v35, 8.507059e+37  ;;  %v4330_v19 = vld [vmem:[#allocation4 + $0xcc] sm:$0xf]  ;;  %v4599_v20 = vld [vmem:[#allocation4 + $0xd8] sm:$0xf0]  ;;  %v4250_v8 = vor.u32 %v4579_v5, %v4249_v4 }
 0x422   :  { %v2245_v43 = vor.u32 1.1754944e-38, %v2244_v33  ;;  %vm2243_vm8 = vcmp.eq.f32.partialorder %v2242_v37, 8.507059e+37  ;;  %v4326_v54 = vld [vmem:[#allocation4 + $0xac] sm:$0xf]  ;;  %v4598_v33 = vld [vmem:[#allocation4 + $0xb8] sm:$0xf0] }
 0x423   :  { %v4692_v24 = vpop.eup %4691  ;;  %v4224_v35 = vld [vmem:[#allocation4 + $0x80] sm:$0xf]  ;;  %v4257_v37 = vld [vmem:[#allocation4 + $0x84] sm:$0xf] }
 0x424   :  { %v2410_v26 = vadd.f32 1.0, %v4692_v24  ;;  %v4331_v24 = vor.u32 %v4599_v20, %v4330_v19 }
 0x425   :  { %v4694_v27 = vpop.eup %4693 }
 0x426   :  { %v4696_v29 = vpop.eup %4695  ;;  %v2136_v30 = vmul.f32 %v4694_v27, %v2134_v17  ;;  %4697 = vrcp.f32 %v2410_v26  ;;  %vm2141_vm1 = vweird.f32 %v4694_v27  ;;  %v2422_v56 = vand.u32 2147483648, %v2410_v26  ;;  %3156 = vmatpush.bf16.msra.mxu3 %v4331_v24  ;;  %v4245_v24 = vld [vmem:[#allocation4 + $0x24] sm:$0xf] }
 0x427   :  { %v2234_v31 = vmul.f32 %v4696_v29, %v2232_v18  ;;  %4699 = vtanh.f32 %v2326_v28  ;;  %vm2239_vm2 = vweird.f32 %v4696_v29  ;;  %vm2142_vm5 = vmor %vm2140_vm3, %vm2141_vm1  ;;  %vm2416_vm10 = vweird.f32 %v2410_v26 }
 0x428   :  { %v2137_v32 = vsub.f32 1.0, %v2136_v30  ;;  %vm2240_vm6 = vmor %vm2238_vm4, %vm2239_vm2  ;;  %v2420_v57 = vand.u32 2147483647, %v2410_v26  ;;  %v2423_v59 = vor.u32 1.1754944e-38, %v2422_v56  ;;  %v4266_v17 = vor.u32 %v4583_v14, %v4265_v11  ;;  %v4294_v30 = vld [vmem:[#allocation4 + $0xa8] sm:$0xf] }
 0x429   :  { %v2235_v53 = vsub.f32 1.0, %v2234_v31  ;;  %v4299_v18 = vor.u32 %v4591_v16, %v4298_v15  ;;  %v4590_v31 = vld [vmem:[#allocation4 + $0xb4] sm:$0xf0]  ;;  %v4314_v11 = vld [vmem:[#allocation4 + $0x4c] sm:$0xf] }
 0x42a   :  { %v2138_v34 = vmul.f32 %v4694_v27, %v2137_v32  ;;  %vm2421_vm12 = vcmp.eq.f32.partialorder %v2420_v57, 8.507059e+37  ;;  %2978 = vmatpush.bf16.msrb.mxu1 %v4266_v17  ;;  %v4580_v57 = vld [vmem:[#allocation4 + $0x70] sm:$0xf0]  ;;  %v4595_v14 = vld [vmem:[#allocation4 + $0x58] sm:$0xf0] }
 0x42b   :  { %v2236_v36 = vmul.f32 %v4696_v29, %v2235_v53  ;;  %3076 = vmatpush.bf16.msra.mxu2 %v4299_v18  ;;  %v4295_v53 = vor.u32 %v4590_v31, %v4294_v30  ;;  %v4212_v15 = vld [vmem:[#allocation4 + $0x20] sm:$0xf]  ;;  %v4570_v16 = vld [vmem:[#allocation4 + $0x2c] sm:$0xf0]  ;;  %v4315_v19 = vor.u32 %v4595_v14, %v4314_v11  ;;  %v4586_v31 = vld [vmem:[#allocation4 + $0x34] sm:$0xf0] }
 0x42c   :  { %v4698_v38 = vpop.eup %4697  ;;  %v2139_v39 = vadd.f32 %v4694_v27, %v2138_v34  ;;  %v4327_v34 = vor.u32 %v4598_v33, %v4326_v54  ;;  %v4213_v20 = vor.u32 %v4570_v16, %v4212_v15 }
 0x42d   :  { %v2237_v41 = vadd.f32 %v4696_v29, %v2236_v36  ;;  %v2412_v42 = vmul.f32 %v4698_v38, %v2410_v26  ;;  %v4700_v45 = vpop.eup %4699  ;;  %vm2417_vm9 = vweird.f32 %v4698_v38  ;;  %v4574_v26 = vld [vmem:[#allocation4 + $0xac] sm:$0xf0] }
 0x42e   :  { %v2143_v44 = vsel %vm2142_vm5, %v4694_v27, %v2139_v39  ;;  %vm2418_vm11 = vmor %vm2416_vm10, %vm2417_vm9  ;;  %v4261_v27 = vld [vmem:[#allocation4 + $0xa4] sm:$0xf]  ;;  %v4229_v28 = vor.u32 %v4574_v26, %v4228_v25  ;;  %v4573_v36 = vld [vmem:[#allocation4 + $0x8c] sm:$0xf0]  ;;  %3157 = vmatpush.bf16.msra.mxu3 %v4327_v34 }
 0x42f   :  { %v2148_v46 = vsel %vm2145_vm7, %v2147_v40, %v2143_v44  ;;  %v2241_v23 = vsel %vm2240_vm6, %v4696_v29, %v2237_v41  ;;  %v2413_v47 = vsub.f32 1.0, %v2412_v42  ;;  %v4582_v29 = vld [vmem:[#allocation4 + $0xb0] sm:$0xf0]  ;;  %3077 = vmatpush.bf16.msra.mxu2 %v4295_v53  ;;  %v4290_v40 = vld [vmem:[#allocation4 + $0x88] sm:$0xf] }
 0x430   :  { %v2246_v48 = vsel %vm2243_vm8, %v2245_v43, %v2241_v23  ;;  %v2427_v49 = vmul.f32 %v4700_v45, %v2148_v46  ;;  %v4262_v32 = vor.u32 %v4582_v29, %v4261_v27  ;;  %v4581_v39 = vld [vmem:[#allocation4 + $0x90] sm:$0xf0]  ;;  %v4589_v41 = vld [vmem:[#allocation4 + $0x94] sm:$0xf0]  ;;  %v4322_v44 = vld [vmem:[#allocation4 + $0x8c] sm:$0xf] }
 0x431   :  { %v2426_v50 = vmul.f32 %v2246_v48, %v4909_v12  ;;  %v2414_v51 = vmul.f32 %v4698_v38, %v2413_v47  ;;  %v4236_v12 = vld [vmem:[#allocation4 + $0xe0] sm:$0xf]  ;;  %v4258_v42 = vor.u32 %v4581_v39, %v4257_v37  ;;  %v4291_v43 = vor.u32 %v4589_v41, %v4290_v40  ;;  %v4597_v45 = vld [vmem:[#allocation4 + $0x98] sm:$0xf0]  ;;  %v2531_v23 = vld [vmem:[#allocation2 + $0xe] ss:$0 sm:$0xff] }
 0x432   :  { %v4237_v0 = vor.u32 %v4576_v21, %v4236_v12  ;;  %2979 = vmatpush.bf16.msrb.mxu1 %v4262_v32  ;;  %v2433_v46 = vld [vmem:[#allocation2 + $0x6] ss:$0 sm:$0xff]  ;;  %v4323_v47 = vor.u32 %v4597_v45, %v4322_v44  ;;  %v4220_v48 = vld [vmem:[#allocation4 + $0x60] sm:$0xf]  ;;  %v4318_v12 = vld [vmem:[#allocation4 + $0x6c] sm:$0xf] }
 0x433   :  { %v4913_v52 = vadd.f32 %v2427_v49, %v2426_v50  ;;  %v2415_v55 = vadd.f32 %v4698_v38, %v2414_v51  ;;  %3078 = vmatpush.bf16.msra.mxu2 %v4291_v43  ;;  %v4572_v49 = vld [vmem:[#allocation4 + $0x6c] sm:$0xf0]  ;;  %v4253_v50 = vld [vmem:[#allocation4 + $0x64] sm:$0xf]  ;;  %v4596_v21 = vld [vmem:[#allocation4 + $0x78] sm:$0xf0] }
 0x434   :  { %2879 = vmatpush.bf16.msrb.mxu0 %v4237_v0  ;;  %3158 = vmatpush.bf16.msra.mxu3 %v4323_v47  ;;  %v4221_v56 = vor.u32 %v4572_v49, %v4220_v48  ;;  %v4319_v22 = vor.u32 %v4596_v21, %v4318_v12  ;;  %v4578_v25 = vld [vmem:[#allocation4 + $0x30] sm:$0xf0]  ;;  %v4278_v26 = vld [vmem:[#allocation4 + $0x28] sm:$0xf]  ;;  %v4310_v32 = vld [vmem:[#allocation4 + $0x2c] sm:$0xf] }
 0x435   :  { %4701 = vtanh.f32 %v4913_v52  ;;  %v2419_v58 = vsel %vm2418_vm11, %v4698_v38, %v2415_v55  ;;  %v4225_v38 = vor.u32 %v4573_v36, %v4224_v35  ;;  %v4246_v30 = vor.u32 %v4578_v25, %v4245_v24  ;;  %v4594_v53 = vld [vmem:[#allocation4 + $0x38] sm:$0xf0]  ;;  %v4208_v34 = vld [vmem:[#allocation4] sm:$0xf]  ;;  %v4569_v35 = vld [vmem:[#allocation4 + $0xc] sm:$0xf0] }
 0x436   :  { %v2424_v61 = vsel %vm2421_vm12, %v2423_v59, %v2419_v58  ;;  %2980 = vmatpush.bf16.msrb.mxu1 %v4258_v42  ;;  %v4286_v58 = vld [vmem:[#allocation4 + $0x68] sm:$0xf]  ;;  %v4588_v59 = vld [vmem:[#allocation4 + $0x74] sm:$0xf0]  ;;  %v4279_v54 = vor.u32 %v4586_v31, %v4278_v26  ;;  %v4311_v33 = vor.u32 %v4594_v53, %v4310_v32  ;;  %v4241_v36 = vld [vmem:[#allocation4 + $0x4] sm:$0xf]  ;;  %v4209_v41 = vor.u32 %v4569_v35, %v4208_v34 }
 0x437   :  { %v4274_v39 = vld [vmem:[#allocation4 + $0x8] sm:$0xf]  ;;  %v4585_v43 = vld [vmem:[#allocation4 + $0x14] sm:$0xf0]  ;;  %v4306_v44 = vld [vmem:[#allocation4 + $0xc] sm:$0xf] }
 0x438   :  { %2880 = vmatpush.bf16.msrb.mxu0 %v4233_v13  ;;  %3159 = vmatpush.bf16.msra.mxu3 %v4319_v22  ;;  %v4283_v13 = vor.u32 %v4587_v10, %v4282_v9  ;;  %v4593_v45 = vld [vmem:[#allocation4 + $0x18] sm:$0xf0]  ;;  %v4275_v47 = vor.u32 %v4585_v43, %v4274_v39  ;;  %v3209_v39 = vld [vmem:[%s4979_s3 + $0x70] sm:$0xff] }
 0x439   :  { %v4307_v49 = vor.u32 %v4593_v45, %v4306_v44  ;;  %v3207_v44 = vld [vmem:[%s4979_s3 + $0x60] sm:$0xff] }
 0x43b   :  { %v4702_v60 = vpop.eup %4701 }
 0x43c   :  { %v2430_v62 = vmul.f32 %v4702_v60, %v2424_v61  ;;  %2881 = vmatpush.bf16.msrb.mxu0 %v4229_v28  ;;  %3160 = vmatpush.bf16.msra.mxu3 %v4315_v19 }
 0x43e   :  { %2431 = vst [vmem:[#allocation3 + $0x5] sm:$0x1] %v2430_v62  ;;  %v2432_v63 = vpack.c.bf16 %v2430_v62, %v2430_v62  ;;  %v4254_v62 = vor.u32 %v4580_v57, %v4253_v50 }
 0x440   :  { %2506 = vmatmul.bf16.vlgmr.msra.gmra.mxu0 %v2432_v63  ;;  %2604 = vmatmul.bf16.vlgmr.msra.gmra.mxu1 %v2432_v63 }
 0x441   :  { %2702 = vmatmul.bf16.vlgmr.msrb.gmra.mxu2 %v2432_v63  ;;  %2782 = vmatmul.bf16.vlgmr.msrb.gmra.mxu3 %v2432_v63  ;;  %v4287_v63 = vor.u32 %v4588_v59, %v4286_v58 }
 0x442   :  { %2882 = vmatpush.bf16.msrb.mxu0 %v4225_v38  ;;  %2981 = vmatpush.bf16.msrb.mxu1 %v4254_v62  ;;  %v4577_v38 = vld [vmem:[#allocation4 + $0x10] sm:$0xf0] }
 0x443   :  { %3079 = vmatpush.bf16.msra.mxu2 %v4287_v63  ;;  %v4242_v42 = vor.u32 %v4577_v38, %v4241_v36  ;;  %3161 = vmatpush.bf16.msra.mxu3 %v4311_v33  ;;  %v3210_v36 = vld [vmem:[%s4979_s3 + $0x78] sm:$0xff] }
 0x446   :  { %2883 = vmatpush.bf16.msrb.mxu0 %v4221_v56  ;;  %2982 = vmatpush.bf16.msrb.mxu1 %v4250_v8  ;;  %v2629_v56 = vld [vmem:[#allocation2 + $0x16] ss:$0 sm:$0xff] }
 0x447   :  { %3080 = vmatpush.bf16.msra.mxu2 %v4283_v13  ;;  %3162 = vmatpush.bf16.msra.mxu3 %v4307_v49 }
 0x44a   :  { %2884 = vmatpush.bf16.msrb.mxu0 %v4217_v7  ;;  %2983 = vmatpush.bf16.msrb.mxu1 %v4246_v30 }
 0x44b   :  { %3081 = vmatpush.bf16.msra.mxu2 %v4279_v54  ;;  %v2912_v54 = vld [vmem:[#allocation2 + $0xf] ss:$0 sm:$0xff] }
 0x44e   :  { %2885 = vmatpush.bf16.msrb.mxu0 %v4213_v20  ;;  %2984 = vmatpush.bf16.msrb.mxu1 %v4242_v42  ;;  %v3090_v42 = vld [vmem:[#allocation2 + $0x1f] ss:$0 sm:$0xff] }
 0x44f   :  { %3082 = vmatpush.bf16.msra.mxu2 %v4275_v47  ;;  %v3206_v47 = vld [vmem:[%s4979_s3 + $0x58] sm:$0xff] }
 0x452   :  { %2886 = vmatpush.bf16.msrb.mxu0 %v4209_v41 }
 0x456   :  { %3215 = vmatpush.msra.mxu0 %v3210_v36 }
 0x458   :  { %3216 = vmatpush.msra.mxu0 %v3209_v39 }
 0x4bd   :  { %v2507_v51 = vpop.f32.mrf.mxu0  ;;  %v2605_v55 = vpop.f32.mrf.mxu1 }
 0x4be   :  { %v2511_v60 = vadd.f32 %v2507_v51, %v2433_v46  ;;  %v2609_v61 = vadd.f32 %v2605_v55, %v2531_v23 }
 0x4c0   :  { %v4107_v0 = vmul.f32 -1.442695, %v2511_v60  ;;  %v4140_v1 = vmul.f32 -1.442695, %v2609_v61 }
 0x4c2   :  { %4703 = vpow2.f32 %v4107_v0 }
 0x4c3   :  { %4705 = vpow2.f32 %v4140_v1 }
 0x4c4   :  { %v2703_v17 = vpop.f32.mrf.mxu2  ;;  %v2783_v18 = vpop.f32.mrf.mxu3 }
 0x4c5   :  { %v2787_v27 = vadd.f32 %v2783_v18, %v2709_v6  ;;  %v2509_v28 = vpop.f32.mrf.mxu0  ;;  %v2607_v29 = vpop.f32.mrf.mxu1  ;;  %v2707_v59 = vadd.f32 %v2703_v17, %v2629_v56 }
 0x4c7   :  { %v4205_v37 = vmul.f32 -1.442695, %v2787_v27 }
 0x4c8   :  { %v4704_v40 = vpop.eup %4703 }
 0x4c9   :  { %v4706_v46 = vpop.eup %4705  ;;  %v2515_v23 = vadd.f32 1.0, %v4704_v40  ;;  %4707 = vpow2.f32 %v4205_v37  ;;  %v3208_v40 = vld [vmem:[%s4979_s3 + $0x68] sm:$0xff] }
 0x4ca   :  { %v2613_v48 = vadd.f32 1.0, %v4706_v46  ;;  %3217 = vmatpush.msra.mxu0 %v3208_v40 }
 0x4cb   :  { %4709 = vrcp.f32 %v2515_v23  ;;  %v2527_v21 = vand.u32 2147483648, %v2515_v23  ;;  %v2525_v1 = vand.u32 2147483647, %v2515_v23  ;;  %vm2521_vm15 = vweird.f32 %v2515_v23 }
 0x4cc   :  { %4711 = vrcp.f32 %v2613_v48  ;;  %v2705_v50 = vpop.f32.mrf.mxu2  ;;  %v2785_v51 = vpop.f32.mrf.mxu3  ;;  %v2625_v22 = vand.u32 2147483648, %v2613_v48  ;;  %v2623_v3 = vand.u32 2147483647, %v2613_v48  ;;  %vm2619_vm1 = vweird.f32 %v2613_v48  ;;  %3218 = vmatpush.msra.mxu0 %v3207_v44 }
 0x4cd   :  { %v2528_v6 = vor.u32 1.1754944e-38, %v2527_v21  ;;  %vm2526_vm4 = vcmp.eq.f32.partialorder %v2525_v1, 8.507059e+37  ;;  %v3205_v50 = vld [vmem:[%s4979_s3 + $0x50] sm:$0xff] }
 0x4ce   :  { %v2626_v9 = vor.u32 1.1754944e-38, %v2625_v22  ;;  %vm2624_vm5 = vcmp.eq.f32.partialorder %v2623_v3, 8.507059e+37  ;;  %3219 = vmatpush.msra.mxu0 %v3206_v47  ;;  %v3200_v22 = vld [vmem:[%s4979_s3 + $0x28] sm:$0xff] }
 0x4cf   :  { %v4708_v55 = vpop.eup %4707 }
 0x4d0   :  { %v2791_v57 = vadd.f32 1.0, %v4708_v55  ;;  %3220 = vmatpush.msra.mxu0 %v3205_v50 }
 0x4d1   :  { %v4710_v58 = vpop.eup %4709 }
 0x4d2   :  { %v4712_v60 = vpop.eup %4711  ;;  %v2517_v61 = vmul.f32 %v4710_v58, %v2515_v23  ;;  %4713 = vrcp.f32 %v2791_v57  ;;  %vm2522_vm13 = vweird.f32 %v4710_v58  ;;  %v2803_v25 = vand.u32 2147483648, %v2791_v57 }
 0x4d3   :  { %v2615_v62 = vmul.f32 %v4712_v60, %v2613_v48  ;;  %4715 = vtanh.f32 %v2707_v59  ;;  %vm2620_vm14 = vweird.f32 %v4712_v60  ;;  %vm2523_vm2 = vmor %vm2521_vm15, %vm2522_vm13  ;;  %vm2797_vm7 = vweird.f32 %v2791_v57 }
 0x4d4   :  { %v2518_v63 = vsub.f32 1.0, %v2517_v61  ;;  %vm2621_vm3 = vmor %vm2619_vm1, %vm2620_vm14  ;;  %v2801_v26 = vand.u32 2147483647, %v2791_v57  ;;  %v2804_v28 = vor.u32 1.1754944e-38, %v2803_v25  ;;  %v3202_v61 = vld [vmem:[%s4979_s3 + $0x38] sm:$0xff] }
 0x4d5   :  { %v2616_v12 = vsub.f32 1.0, %v2615_v62  ;;  %v3201_v62 = vld [vmem:[%s4979_s3 + $0x30] sm:$0xff] }
 0x4d6   :  { %v2519_v0 = vmul.f32 %v4710_v58, %v2518_v63  ;;  %vm2802_vm9 = vcmp.eq.f32.partialorder %v2801_v26, 8.507059e+37 }
 0x4d7   :  { %v2617_v2 = vmul.f32 %v4712_v60, %v2616_v12  ;;  %v3010_v12 = vld [vmem:[#allocation2 + $0x17] ss:$0 sm:$0xff] }
 0x4d8   :  { %v4714_v4 = vpop.eup %4713  ;;  %v2520_v5 = vadd.f32 %v4710_v58, %v2519_v0 }
 0x4d9   :  { %v2618_v7 = vadd.f32 %v4712_v60, %v2617_v2  ;;  %v2793_v8 = vmul.f32 %v4714_v4, %v2791_v57  ;;  %v4716_v11 = vpop.eup %4715  ;;  %vm2798_vm6 = vweird.f32 %v4714_v4  ;;  %v3204_v57 = vld [vmem:[%s4979_s3 + $0x48] sm:$0xff] }
 0x4da   :  { %v2524_v10 = vsel %vm2523_vm2, %v4710_v58, %v2520_v5  ;;  %vm2799_vm8 = vmor %vm2797_vm7, %vm2798_vm6  ;;  %v3203_v58 = vld [vmem:[%s4979_s3 + $0x40] sm:$0xff]  ;;  %3221 = vmatpush.msra.mxu0 %v3204_v57 }
 0x4db   :  { %v2529_v13 = vsel %vm2526_vm4, %v2528_v6, %v2524_v10  ;;  %v2622_v14 = vsel %vm2621_vm3, %v4712_v60, %v2618_v7  ;;  %v2794_v15 = vsub.f32 1.0, %v2793_v8  ;;  %v3198_v7 = vld [vmem:[%s4979_s3 + $0x18] sm:$0xff] }
 0x4dc   :  { %v2627_v16 = vsel %vm2624_vm5, %v2626_v9, %v2622_v14  ;;  %v2808_v17 = vmul.f32 %v4716_v11, %v2529_v13  ;;  %3222 = vmatpush.msra.mxu0 %v3203_v58  ;;  %v3197_v14 = vld [vmem:[%s4979_s3 + $0x10] sm:$0xff] }
 0x4dd   :  { %v2807_v18 = vmul.f32 %v2627_v16, %v4913_v52  ;;  %v2795_v19 = vmul.f32 %v4714_v4, %v2794_v15  ;;  %v2814_v52 = vld [vmem:[#allocation2 + $0x7] ss:$0 sm:$0xff] }
 0x4de   :  { %3223 = vmatpush.msra.mxu0 %v3202_v61 }
 0x4df   :  { %v4917_v20 = vadd.f32 %v2808_v17, %v2807_v18  ;;  %v2796_v24 = vadd.f32 %v4714_v4, %v2795_v19  ;;  %v3196_v19 = vld [vmem:[%s4979_s3 + $0x8] sm:$0xff] }
 0x4e0   :  { %3224 = vmatpush.msra.mxu0 %v3201_v62 }
 0x4e1   :  { %4717 = vtanh.f32 %v4917_v20  ;;  %v2800_v27 = vsel %vm2799_vm8, %v4714_v4, %v2796_v24  ;;  %v3199_v4 = vld [vmem:[%s4979_s3 + $0x20] sm:$0xff] }
 0x4e2   :  { %v2805_v30 = vsel %vm2802_vm9, %v2804_v28, %v2800_v27  ;;  %3225 = vmatpush.msra.mxu0 %v3200_v22 }
 0x4e4   :  { %3226 = vmatpush.msra.mxu0 %v3199_v4 }
 0x4e6   :  { %3227 = vmatpush.msra.mxu0 %v3198_v7 }
 0x4e7   :  { %v4718_v29 = vpop.eup %4717 }
 0x4e8   :  { %v2811_v31 = vmul.f32 %v4718_v29, %v2805_v30  ;;  %3228 = vmatpush.msra.mxu0 %v3197_v14  ;;  %v3195_v29 = vld [vmem:[%s4979_s3] sm:$0xff] }
 0x4ea   :  { %2812 = vst [vmem:[#allocation3 + $0x6] sm:$0x1] %v2811_v31  ;;  %v2813_v32 = vpack.c.bf16 %v2811_v31, %v2811_v31  ;;  %3229 = vmatpush.msra.mxu0 %v3196_v19 }
 0x4ec   :  { %2887 = vmatmul.bf16.vlgmr.msrb.gmra.mxu0 %v2813_v32  ;;  %2985 = vmatmul.bf16.vlgmr.msrb.gmra.mxu1 %v2813_v32 }
 0x4ed   :  { %3083 = vmatmul.bf16.vlgmr.msra.gmra.mxu2 %v2813_v32  ;;  %3163 = vmatmul.bf16.vlgmr.msra.gmra.mxu3 %v2813_v32 }
 0x4ee   :  { %3230 = vmatpush.msra.mxu0 %v3195_v29 }
 0x569   :  { %v2888_v53 = vpop.f32.mrf.mxu0  ;;  %v2986_v33 = vpop.f32.mrf.mxu1 }
 0x56a   :  { %v2892_v34 = vadd.f32 %v2888_v53, %v2814_v52  ;;  %v2990_v35 = vadd.f32 %v2986_v33, %v2912_v54 }
 0x56c   :  { %v4238_v37 = vmul.f32 -1.442695, %v2892_v34  ;;  %v4271_v38 = vmul.f32 -1.442695, %v2990_v35 }
 0x56e   :  { %4719 = vpow2.f32 %v4238_v37 }
 0x56f   :  { %4721 = vpow2.f32 %v4271_v38 }
 0x570   :  { %v3084_v41 = vpop.f32.mrf.mxu2  ;;  %v3164_v43 = vpop.f32.mrf.mxu3 }
 0x571   :  { %v3168_v45 = vadd.f32 %v3164_v43, %v3090_v42  ;;  %v2890_v46 = vpop.f32.mrf.mxu0  ;;  %v2988_v23 = vpop.f32.mrf.mxu1  ;;  %v3088_v1 = vadd.f32 %v3084_v41, %v3010_v12 }
 0x573   :  { %v4336_v48 = vmul.f32 -1.442695, %v3168_v45 }
 0x574   :  { %v4720_v49 = vpop.eup %4719 }
 0x575   :  { %v4722_v51 = vpop.eup %4721  ;;  %v2896_v55 = vadd.f32 1.0, %v4720_v49  ;;  %4723 = vpow2.f32 %v4336_v48 }
 0x576   :  { %v2994_v56 = vadd.f32 1.0, %v4722_v51 }
 0x577   :  { %4725 = vrcp.f32 %v2896_v55  ;;  %v2908_v9 = vand.u32 2147483648, %v2896_v55  ;;  %v2906_v13 = vand.u32 2147483647, %v2896_v55  ;;  %vm2902_vm12 = vweird.f32 %v2896_v55 }
 0x578   :  { %4727 = vrcp.f32 %v2994_v56  ;;  %v3086_v59 = vpop.f32.mrf.mxu2  ;;  %v3166_v60 = vpop.f32.mrf.mxu3  ;;  %v3006_v10 = vand.u32 2147483648, %v2994_v56  ;;  %v3004_v16 = vand.u32 2147483647, %v2994_v56  ;;  %vm3000_vm13 = vweird.f32 %v2994_v56 }
 0x579   :  { %v2909_v24 = vor.u32 1.1754944e-38, %v2908_v9  ;;  %vm2907_vm1 = vcmp.eq.f32.partialorder %v2906_v13, 8.507059e+37 }
 0x57a   :  { %v3007_v27 = vor.u32 1.1754944e-38, %v3006_v10  ;;  %vm3005_vm2 = vcmp.eq.f32.partialorder %v3004_v16, 8.507059e+37 }
 0x57b   :  { %v4724_v63 = vpop.eup %4723 }
 0x57c   :  { %v3172_v21 = vadd.f32 1.0, %v4724_v63 }
 0x57d   :  { %v4726_v0 = vpop.eup %4725 }
 0x57e   :  { %v4728_v2 = vpop.eup %4727  ;;  %v2898_v3 = vmul.f32 %v4726_v0, %v2896_v55  ;;  %4729 = vrcp.f32 %v3172_v21  ;;  %vm2903_vm10 = vweird.f32 %v4726_v0  ;;  %v3184_v37 = vand.u32 2147483648, %v3172_v21 }
 0x57f   :  { %v2996_v5 = vmul.f32 %v4728_v2, %v2994_v56  ;;  %4731 = vtanh.f32 %v3088_v1  ;;  %vm3001_vm11 = vweird.f32 %v4728_v2  ;;  %vm2904_vm14 = vmor %vm2902_vm12, %vm2903_vm10  ;;  %vm3178_vm4 = vweird.f32 %v3172_v21 }
 0x580   :  { %v2899_v6 = vsub.f32 1.0, %v2898_v3  ;;  %vm3002_vm15 = vmor %vm3000_vm13, %vm3001_vm11  ;;  %v3182_v38 = vand.u32 2147483647, %v3172_v21  ;;  %v3185_v40 = vor.u32 1.1754944e-38, %v3184_v37 }
 0x581   :  { %v2997_v8 = vsub.f32 1.0, %v2996_v5 }
 0x582   :  { %v2900_v11 = vmul.f32 %v4726_v0, %v2899_v6  ;;  %vm3183_vm6 = vcmp.eq.f32.partialorder %v3182_v38, 8.507059e+37 }
 0x583   :  { %v2998_v15 = vmul.f32 %v4728_v2, %v2997_v8 }
 0x584   :  { %v4730_v17 = vpop.eup %4729  ;;  %v2901_v18 = vadd.f32 %v4726_v0, %v2900_v11 }
 0x585   :  { %v2999_v25 = vadd.f32 %v4728_v2, %v2998_v15  ;;  %v3174_v26 = vmul.f32 %v4730_v17, %v3172_v21  ;;  %v4732_v30 = vpop.eup %4731  ;;  %vm3179_vm3 = vweird.f32 %v4730_v17 }
 0x586   :  { %v2905_v28 = vsel %vm2904_vm14, %v4726_v0, %v2901_v18  ;;  %vm3180_vm5 = vmor %vm3178_vm4, %vm3179_vm3 }
 0x587   :  { %v2910_v31 = vsel %vm2907_vm1, %v2909_v24, %v2905_v28  ;;  %v3003_v32 = vsel %vm3002_vm15, %v4728_v2, %v2999_v25  ;;  %v3175_v52 = vsub.f32 1.0, %v3174_v26 }
 0x588   :  { %v3008_v53 = vsel %vm3005_vm2, %v3007_v27, %v3003_v32  ;;  %v3189_v54 = vmul.f32 %v4732_v30, %v2910_v31 }
 0x589   :  { %v3188_v33 = vmul.f32 %v3008_v53, %v4917_v20  ;;  %v3176_v34 = vmul.f32 %v4730_v17, %v3175_v52  ;;  %v4606_v20 = vld [vmem:[%s4980_s4] ss:$0 sm:$0xff] }
 0x58b   :  { %v3190_v35 = vadd.f32 %v3189_v54, %v3188_v33  ;;  %v3177_v36 = vadd.f32 %v4730_v17, %v3176_v34 }
 0x58d   :  { %4733 = vtanh.f32 %v3190_v35  ;;  %v3181_v39 = vsel %vm3180_vm5, %v4730_v17, %v3177_v36 }
 0x58e   :  { %v3186_v42 = vsel %vm3183_vm6, %v3185_v40, %v3181_v39 }
 0x593   :  { %v4734_v41 = vpop.eup %4733 }
 0x594   :  { %v3192_v43 = vmul.f32 %v4734_v41, %v3186_v42 }
 0x596   :  { %3193 = vst [vmem:[#allocation3 + $0x7] sm:$0x1] %v3192_v43 }
 0x59d   :  { %v3194_v44 = vld [vmem:[#allocation3] sm:$0xff] }
 0x59e   :  { %3231 = vmatmul.f32.vlgmr.msra.gmra.mxu0 %v3194_v44 }
 0x61b   :  { %v3232_v45 = vpop.f32.mrf.mxu0 }
 0x61c   :  { %v3233_v46 = vadd.f32 %v4606_v20, %v3232_v45 }
 0x61e   :  { %3235 = vst.msk [vmem:[#allocation7] sm:$0xff] %vm87_vm0, %v3233_v46 }
 0x61f   :  { %3246 = dma.vmem_to_hbm [thread:$0]  %s3242_s11, 128, %s3244_s14, [#allocation6]  }
 0x620   :  { %4785 = dma.done.wait [#allocation6], 128  }
 0x621   :  { %4786 = vsyncadd [#allocation6], 4294967168 }
 0x622   :  { %3251 = vsyncpa [#allocation5], 1 }
 0x623   :  { %3252 = vsyncpa [#allocation6], 1 }

</bundles_post_ra>
